<compile_context>
chip_gen: v5e
topology: v5e:2x2
jax: 0.10.0
libtpu: 0.0.40
codegen_flags: <defaults>
</compile_context>

<pallas_src>
import functools

import jax
import jax.numpy as jnp
from jax import lax
from jax.experimental import pallas as pl
from jax.experimental.pallas import tpu as pltpu


def _generator_kernel(noise_ref, feat_ref,
                      w1n, w1f, w2, w3, w4, w5, b5,
                      o_ref):
    """Whole MLP forward in one kernel (all bf16 weights fit easily in VMEM)."""

    def lrelu(h):
        return jnp.where(h > 0, h, 0.02 * h)

    def batchnorm(h):
        # PyTorch BatchNorm1d in training mode: batch mean, biased variance,
        # eps=1e-5, gamma=1 / beta=0 (defaults -> affine is identity).
        mean = jnp.mean(h, axis=0, keepdims=True)
        centered = h - mean
        var = jnp.mean(centered * centered, axis=0, keepdims=True)
        return centered * lax.rsqrt(var + 1e-5)

    def matmul(h, w_ref):
        # bf16 operands on the MXU, f32 accumulation.
        return jnp.dot(h.astype(jnp.bfloat16), w_ref[...],
                       preferred_element_type=jnp.float32)

    # Layer 1: cat([noise, features]) @ W1  ==  noise @ W1n + features @ W1f
    h = matmul(noise_ref[...], w1n) + matmul(feat_ref[...], w1f)
    h = batchnorm(lrelu(h))
    h = batchnorm(lrelu(matmul(h, w2)))
    h = batchnorm(lrelu(matmul(h, w3)))
    h = batchnorm(lrelu(matmul(h, w4)))
    o_ref[...] = jnp.tanh(matmul(h, w5) + b5[...]).astype(o_ref.dtype)


def generator_forward(noise, features, params, channels, time_steps):
    """JAX wrapper: split W1, run the Pallas kernel, reshape the output."""
    batch, noise_dim = noise.shape
    feature_dim = features.shape[1]
    out_dim = channels * time_steps

    (w1, _b1), (w2, _b2), (w3, _b3), (w4, _b4), (w5, b5) = params

    # Hidden biases b1..b4 are zero after initialize_weights(); they are
    # intentionally omitted from the kernel (exact no-op, fewer DMAs).
    w1n = w1[:noise_dim]            # [noise_dim, 128]   bf16
    w1f = w1[noise_dim:]            # [feature_dim, 128] bf16
    b5_2d = b5[None, :].astype(jnp.float32)   # [1, out_dim], 2-D for TPU layout

    weights = (w1n, w1f, w2, w3, w4, w5)

    # Advisory cost estimate for XLA's scheduler.
    dims = [noise_dim + feature_dim, 128, 256, 512, 1024, out_dim]
    flops = 2 * batch * sum(dims[i] * dims[i + 1] for i in range(len(dims) - 1))
    transcendentals = batch * out_dim + sum(dims[1:5])          # tanh + rsqrt
    weight_bytes = 2 * sum(dims[i] * dims[i + 1] for i in range(len(dims) - 1))
    io_bytes = 4 * (batch * (noise_dim + feature_dim) + batch * out_dim + out_dim)
    cost = pl.CostEstimate(flops=flops,
                           transcendentals=transcendentals,
                           bytes_accessed=weight_bytes + io_bytes)

    vmem_spec = pl.BlockSpec(memory_space=pltpu.MemorySpace.VMEM)

    out = pl.pallas_call(
        _generator_kernel,
        out_shape=jax.ShapeDtypeStruct((batch, out_dim), jnp.float32),
        in_specs=[vmem_spec] * (2 + len(weights) + 1),
        out_specs=vmem_spec,
        cost_estimate=cost,
        compiler_params=pltpu.CompilerParams(
            vmem_limit_bytes=32 * 1024 * 1024),
    )(noise, features, *weights, b5_2d)

    # TODO(synk): for training-size batches on v7x, split the batch over the
    # 2 TensorCores with a parallel grid axis (per-core BN stats).
    return out.reshape(batch, channels, time_steps)


def _xavier_normal(key, fan_in, fan_out):
    std = (2.0 / (fan_in + fan_out)) ** 0.5
    # stored as [in, out] (transposed relative to PyTorch's [out, in]),
    # computed in f32 then cast to bf16 for storage / DMA.
    w = std * jax.random.normal(key, (fan_in, fan_out), dtype=jnp.float32)
    return w.astype(jnp.bfloat16)


def init_generator_params(key, noise_dim, feature_dim, channels, time_steps):
    dims = [noise_dim + feature_dim, 128, 256, 512, 1024, channels * time_steps]
    params = []
    for i in range(len(dims) - 1):
        key, sub = jax.random.split(key)
        w = _xavier_normal(sub, dims[i], dims[i + 1])
        b = jnp.zeros((dims[i + 1],), dtype=jnp.float32)   # nn.init.zeros_(bias)
        params.append((w, b))
    return params


if __name__ == "__main__":
    # Small but shape-consistent config.
    NOISE_DIM = 32
    FEATURE_DIM = 3
    CHANNELS = 3
    TIME_STEPS = 128
    BATCH = 8

    key = jax.random.PRNGKey(0)
    k_noise, k_feat, k_params = jax.random.split(key, 3)

    noise = jax.random.normal(k_noise, (BATCH, NOISE_DIM), dtype=jnp.float32)
    features = jax.random.normal(k_feat, (BATCH, FEATURE_DIM), dtype=jnp.float32)

    params = init_generator_params(k_params, NOISE_DIM, FEATURE_DIM,
                                   CHANNELS, TIME_STEPS)

    fwd = jax.jit(functools.partial(generator_forward,
                                    channels=CHANNELS, time_steps=TIME_STEPS))
    out = fwd(noise, features, params)
    jax.block_until_ready(out)

    assert out.shape == (BATCH, CHANNELS, TIME_STEPS)
    assert bool(jnp.all(jnp.isfinite(out)))
    assert bool(jnp.all(jnp.abs(out) <= 1.0))   # tanh range

    print("KERNEL_OK")
</pallas_src>

<mosaic_0001>
module attributes {stable_mosaic.version = 11 : i64} {
  func.func @_generator_kernel(%arg0: memref<8x32xf32, #tpu.memory_space<vmem>>, %arg1: memref<8x3xf32, #tpu.memory_space<vmem>>, %arg2: memref<32x128xbf16, #tpu.memory_space<vmem>>, %arg3: memref<3x128xbf16, #tpu.memory_space<vmem>>, %arg4: memref<128x256xbf16, #tpu.memory_space<vmem>>, %arg5: memref<256x512xbf16, #tpu.memory_space<vmem>>, %arg6: memref<512x1024xbf16, #tpu.memory_space<vmem>>, %arg7: memref<1024x384xbf16, #tpu.memory_space<vmem>>, %arg8: memref<1x384xf32, #tpu.memory_space<vmem>>, %arg9: memref<8x384xf32, #tpu.memory_space<vmem>>) attributes {dimension_semantics = [], scalar_prefetch = 0 : i64, scratch_operands = 0 : i64, tpu.core_type = #tpu.core_type<tc>} {
    %c0 = arith.constant 0 : index
    %c0_0 = arith.constant 0 : index
    %0 = vector.load %arg0[%c0, %c0_0] : memref<8x32xf32, #tpu.memory_space<vmem>>, vector<8x32xf32>
    %1 = arith.truncf %0 : vector<8x32xf32> to vector<8x32xbf16>
    %c0_1 = arith.constant 0 : index
    %c0_2 = arith.constant 0 : index
    %2 = vector.load %arg2[%c0_1, %c0_2] : memref<32x128xbf16, #tpu.memory_space<vmem>>, vector<32x128xbf16>
    %cst = arith.constant dense<0.000000e+00> : vector<8x128xf32>
    %3 = tpu.matmul %1, %2, %cst {dimension_numbers = #tpu.dot_dimension_numbers<[1], [0], [0], [1], [0, 0, 1, 1], [], []>} : vector<8x32xbf16>, vector<32x128xbf16>, vector<8x128xf32> -> vector<8x128xf32>
    %c0_3 = arith.constant 0 : index
    %c0_4 = arith.constant 0 : index
    %4 = vector.load %arg1[%c0_3, %c0_4] : memref<8x3xf32, #tpu.memory_space<vmem>>, vector<8x3xf32>
    %5 = arith.truncf %4 : vector<8x3xf32> to vector<8x3xbf16>
    %c0_5 = arith.constant 0 : index
    %c0_6 = arith.constant 0 : index
    %6 = vector.load %arg3[%c0_5, %c0_6] : memref<3x128xbf16, #tpu.memory_space<vmem>>, vector<3x128xbf16>
    %cst_7 = arith.constant dense<0.000000e+00> : vector<8x128xf32>
    %7 = tpu.matmul %5, %6, %cst_7 {dimension_numbers = #tpu.dot_dimension_numbers<[1], [0], [0], [1], [0, 0, 1, 1], [], []>} : vector<8x3xbf16>, vector<3x128xbf16>, vector<8x128xf32> -> vector<8x128xf32>
    %8 = arith.addf %3, %7 : vector<8x128xf32>
    %cst_8 = arith.constant 0.000000e+00 : f32
    %9 = vector.broadcast %cst_8 : f32 to vector<8x128xf32>
    %10 = arith.cmpf ogt, %8, %9 : vector<8x128xf32>
    %cst_9 = arith.constant 2.000000e-02 : f32
    %11 = vector.broadcast %cst_9 : f32 to vector<8x128xf32>
    %12 = arith.mulf %11, %8 : vector<8x128xf32>
    %13 = arith.select %10, %8, %12 : vector<8x128xi1>, vector<8x128xf32>
    %cst_10 = arith.constant dense<0.000000e+00> : vector<128xf32>
    %14 = vector.multi_reduction <add>, %13, %cst_10 [0] : vector<8x128xf32> to vector<128xf32>
    %15 = vector.shape_cast %14 : vector<128xf32> to vector<1x128xf32>
    %cst_11 = arith.constant 8.000000e+00 : f32
    %16 = vector.broadcast %cst_11 : f32 to vector<1x128xf32>
    %17 = arith.divf %15, %16 : vector<1x128xf32>
    %18 = vector.broadcast %17 : vector<1x128xf32> to vector<8x128xf32>
    %19 = arith.subf %13, %18 : vector<8x128xf32>
    %20 = arith.mulf %19, %19 : vector<8x128xf32>
    %cst_12 = arith.constant dense<0.000000e+00> : vector<128xf32>
    %21 = vector.multi_reduction <add>, %20, %cst_12 [0] : vector<8x128xf32> to vector<128xf32>
    %22 = vector.shape_cast %21 : vector<128xf32> to vector<1x128xf32>
    %cst_13 = arith.constant 8.000000e+00 : f32
    %23 = vector.broadcast %cst_13 : f32 to vector<1x128xf32>
    %24 = arith.divf %22, %23 : vector<1x128xf32>
    %cst_14 = arith.constant 9.99999974E-6 : f32
    %25 = vector.broadcast %cst_14 : f32 to vector<1x128xf32>
    %26 = arith.addf %24, %25 : vector<1x128xf32>
    %27 = math.rsqrt %26 : vector<1x128xf32>
    %28 = vector.broadcast %27 : vector<1x128xf32> to vector<8x128xf32>
    %29 = arith.mulf %19, %28 : vector<8x128xf32>
    %30 = arith.truncf %29 : vector<8x128xf32> to vector<8x128xbf16>
    %c0_15 = arith.constant 0 : index
    %c0_16 = arith.constant 0 : index
    %31 = vector.load %arg4[%c0_15, %c0_16] : memref<128x256xbf16, #tpu.memory_space<vmem>>, vector<128x256xbf16>
    %cst_17 = arith.constant dense<0.000000e+00> : vector<8x256xf32>
    %32 = tpu.matmul %30, %31, %cst_17 {dimension_numbers = #tpu.dot_dimension_numbers<[1], [0], [0], [1], [0, 0, 1, 1], [], []>} : vector<8x128xbf16>, vector<128x256xbf16>, vector<8x256xf32> -> vector<8x256xf32>
    %cst_18 = arith.constant 0.000000e+00 : f32
    %33 = vector.broadcast %cst_18 : f32 to vector<8x256xf32>
    %34 = arith.cmpf ogt, %32, %33 : vector<8x256xf32>
    %cst_19 = arith.constant 2.000000e-02 : f32
    %35 = vector.broadcast %cst_19 : f32 to vector<8x256xf32>
    %36 = arith.mulf %35, %32 : vector<8x256xf32>
    %37 = arith.select %34, %32, %36 : vector<8x256xi1>, vector<8x256xf32>
    %cst_20 = arith.constant dense<0.000000e+00> : vector<256xf32>
    %38 = vector.multi_reduction <add>, %37, %cst_20 [0] : vector<8x256xf32> to vector<256xf32>
    %39 = vector.shape_cast %38 : vector<256xf32> to vector<1x256xf32>
    %cst_21 = arith.constant 8.000000e+00 : f32
    %40 = vector.broadcast %cst_21 : f32 to vector<1x256xf32>
    %41 = arith.divf %39, %40 : vector<1x256xf32>
    %42 = vector.broadcast %41 : vector<1x256xf32> to vector<8x256xf32>
    %43 = arith.subf %37, %42 : vector<8x256xf32>
    %44 = arith.mulf %43, %43 : vector<8x256xf32>
    %cst_22 = arith.constant dense<0.000000e+00> : vector<256xf32>
    %45 = vector.multi_reduction <add>, %44, %cst_22 [0] : vector<8x256xf32> to vector<256xf32>
    %46 = vector.shape_cast %45 : vector<256xf32> to vector<1x256xf32>
    %cst_23 = arith.constant 8.000000e+00 : f32
    %47 = vector.broadcast %cst_23 : f32 to vector<1x256xf32>
    %48 = arith.divf %46, %47 : vector<1x256xf32>
    %cst_24 = arith.constant 9.99999974E-6 : f32
    %49 = vector.broadcast %cst_24 : f32 to vector<1x256xf32>
    %50 = arith.addf %48, %49 : vector<1x256xf32>
    %51 = math.rsqrt %50 : vector<1x256xf32>
    %52 = vector.broadcast %51 : vector<1x256xf32> to vector<8x256xf32>
    %53 = arith.mulf %43, %52 : vector<8x256xf32>
    %54 = arith.truncf %53 : vector<8x256xf32> to vector<8x256xbf16>
    %c0_25 = arith.constant 0 : index
    %c0_26 = arith.constant 0 : index
    %55 = vector.load %arg5[%c0_25, %c0_26] : memref<256x512xbf16, #tpu.memory_space<vmem>>, vector<256x512xbf16>
    %cst_27 = arith.constant dense<0.000000e+00> : vector<8x512xf32>
    %56 = tpu.matmul %54, %55, %cst_27 {dimension_numbers = #tpu.dot_dimension_numbers<[1], [0], [0], [1], [0, 0, 1, 1], [], []>} : vector<8x256xbf16>, vector<256x512xbf16>, vector<8x512xf32> -> vector<8x512xf32>
    %cst_28 = arith.constant 0.000000e+00 : f32
    %57 = vector.broadcast %cst_28 : f32 to vector<8x512xf32>
    %58 = arith.cmpf ogt, %56, %57 : vector<8x512xf32>
    %cst_29 = arith.constant 2.000000e-02 : f32
    %59 = vector.broadcast %cst_29 : f32 to vector<8x512xf32>
    %60 = arith.mulf %59, %56 : vector<8x512xf32>
    %61 = arith.select %58, %56, %60 : vector<8x512xi1>, vector<8x512xf32>
    %cst_30 = arith.constant dense<0.000000e+00> : vector<512xf32>
    %62 = vector.multi_reduction <add>, %61, %cst_30 [0] : vector<8x512xf32> to vector<512xf32>
    %63 = vector.shape_cast %62 : vector<512xf32> to vector<1x512xf32>
    %cst_31 = arith.constant 8.000000e+00 : f32
    %64 = vector.broadcast %cst_31 : f32 to vector<1x512xf32>
    %65 = arith.divf %63, %64 : vector<1x512xf32>
    %66 = vector.broadcast %65 : vector<1x512xf32> to vector<8x512xf32>
    %67 = arith.subf %61, %66 : vector<8x512xf32>
    %68 = arith.mulf %67, %67 : vector<8x512xf32>
    %cst_32 = arith.constant dense<0.000000e+00> : vector<512xf32>
    %69 = vector.multi_reduction <add>, %68, %cst_32 [0] : vector<8x512xf32> to vector<512xf32>
    %70 = vector.shape_cast %69 : vector<512xf32> to vector<1x512xf32>
    %cst_33 = arith.constant 8.000000e+00 : f32
    %71 = vector.broadcast %cst_33 : f32 to vector<1x512xf32>
    %72 = arith.divf %70, %71 : vector<1x512xf32>
    %cst_34 = arith.constant 9.99999974E-6 : f32
    %73 = vector.broadcast %cst_34 : f32 to vector<1x512xf32>
    %74 = arith.addf %72, %73 : vector<1x512xf32>
    %75 = math.rsqrt %74 : vector<1x512xf32>
    %76 = vector.broadcast %75 : vector<1x512xf32> to vector<8x512xf32>
    %77 = arith.mulf %67, %76 : vector<8x512xf32>
    %78 = arith.truncf %77 : vector<8x512xf32> to vector<8x512xbf16>
    %c0_35 = arith.constant 0 : index
    %c0_36 = arith.constant 0 : index
    %79 = vector.load %arg6[%c0_35, %c0_36] : memref<512x1024xbf16, #tpu.memory_space<vmem>>, vector<512x1024xbf16>
    %cst_37 = arith.constant dense<0.000000e+00> : vector<8x1024xf32>
    %80 = tpu.matmul %78, %79, %cst_37 {dimension_numbers = #tpu.dot_dimension_numbers<[1], [0], [0], [1], [0, 0, 1, 1], [], []>} : vector<8x512xbf16>, vector<512x1024xbf16>, vector<8x1024xf32> -> vector<8x1024xf32>
    %cst_38 = arith.constant 0.000000e+00 : f32
    %81 = vector.broadcast %cst_38 : f32 to vector<8x1024xf32>
    %82 = arith.cmpf ogt, %80, %81 : vector<8x1024xf32>
    %cst_39 = arith.constant 2.000000e-02 : f32
    %83 = vector.broadcast %cst_39 : f32 to vector<8x1024xf32>
    %84 = arith.mulf %83, %80 : vector<8x1024xf32>
    %85 = arith.select %82, %80, %84 : vector<8x1024xi1>, vector<8x1024xf32>
    %cst_40 = arith.constant dense<0.000000e+00> : vector<1024xf32>
    %86 = vector.multi_reduction <add>, %85, %cst_40 [0] : vector<8x1024xf32> to vector<1024xf32>
    %87 = vector.shape_cast %86 : vector<1024xf32> to vector<1x1024xf32>
    %cst_41 = arith.constant 8.000000e+00 : f32
    %88 = vector.broadcast %cst_41 : f32 to vector<1x1024xf32>
    %89 = arith.divf %87, %88 : vector<1x1024xf32>
    %90 = vector.broadcast %89 : vector<1x1024xf32> to vector<8x1024xf32>
    %91 = arith.subf %85, %90 : vector<8x1024xf32>
    %92 = arith.mulf %91, %91 : vector<8x1024xf32>
    %cst_42 = arith.constant dense<0.000000e+00> : vector<1024xf32>
    %93 = vector.multi_reduction <add>, %92, %cst_42 [0] : vector<8x1024xf32> to vector<1024xf32>
    %94 = vector.shape_cast %93 : vector<1024xf32> to vector<1x1024xf32>
    %cst_43 = arith.constant 8.000000e+00 : f32
    %95 = vector.broadcast %cst_43 : f32 to vector<1x1024xf32>
    %96 = arith.divf %94, %95 : vector<1x1024xf32>
    %cst_44 = arith.constant 9.99999974E-6 : f32
    %97 = vector.broadcast %cst_44 : f32 to vector<1x1024xf32>
    %98 = arith.addf %96, %97 : vector<1x1024xf32>
    %99 = math.rsqrt %98 : vector<1x1024xf32>
    %100 = vector.broadcast %99 : vector<1x1024xf32> to vector<8x1024xf32>
    %101 = arith.mulf %91, %100 : vector<8x1024xf32>
    %102 = arith.truncf %101 : vector<8x1024xf32> to vector<8x1024xbf16>
    %c0_45 = arith.constant 0 : index
    %c0_46 = arith.constant 0 : index
    %103 = vector.load %arg7[%c0_45, %c0_46] : memref<1024x384xbf16, #tpu.memory_space<vmem>>, vector<1024x384xbf16>
    %cst_47 = arith.constant dense<0.000000e+00> : vector<8x384xf32>
    %104 = tpu.matmul %102, %103, %cst_47 {dimension_numbers = #tpu.dot_dimension_numbers<[1], [0], [0], [1], [0, 0, 1, 1], [], []>} : vector<8x1024xbf16>, vector<1024x384xbf16>, vector<8x384xf32> -> vector<8x384xf32>
    %c0_48 = arith.constant 0 : index
    %c0_49 = arith.constant 0 : index
    %105 = vector.load %arg8[%c0_48, %c0_49] : memref<1x384xf32, #tpu.memory_space<vmem>>, vector<1x384xf32>
    %106 = vector.broadcast %105 : vector<1x384xf32> to vector<8x384xf32>
    %107 = arith.addf %104, %106 : vector<8x384xf32>
    %108 = math.tanh %107 : vector<8x384xf32>
    %c0_50 = arith.constant 0 : index
    %c0_51 = arith.constant 0 : index
    %109 = vector.load %arg9[%c0_50, %c0_51] : memref<8x384xf32, #tpu.memory_space<vmem>>, vector<8x384xf32>
    tpu.vector_store %arg9[%c0_50, %c0_51], %108 {strides = array<i32>} : memref<8x384xf32, #tpu.memory_space<vmem>>, vector<8x384xf32>,
    return
  }
}

</mosaic_0001>

<bundles_post_ra>
// kernel: generator_forward.1
= control target key start
LH: loop header
LB: loop body
LE: loop exit
PB: predicated region body
PF: predicated region fallthrough
CT: control target
= control target key end

     0   :  { %14 = vsyncpa [#allocation3], 0  ;;  %s8109_s0 = inlined_call_operand.vmem [shape: f32[8,32], index: 0, kind: input, shape index: {}]   ;;  %s8110_s1 = inlined_call_operand.vmem [shape: f32[8,3], index: 1, kind: input, shape index: {}]   ;;  %s8111_s2 = inlined_call_operand.vmem [shape: bf16[32,128], index: 2, kind: input, shape index: {}]   ;;  %s8112_s3 = inlined_call_operand.vmem [shape: bf16[3,128], index: 3, kind: input, shape index: {}]   ;;  %s8113_s4 = inlined_call_operand.hbm [shape: bf16[128,256], index: 4, kind: input, shape index: {}]   ;;  %s8114_s5 = inlined_call_operand.hbm [shape: bf16[256,512], index: 5, kind: input, shape index: {}]   ;;  %s8115_s6 = inlined_call_operand.hbm [shape: bf16[512,1024], index: 6, kind: input, shape index: {}]   ;;  %s8116_s7 = inlined_call_operand.hbm [shape: bf16[1024,384], index: 7, kind: input, shape index: {}]   ;;  %s8117_s8 = inlined_call_operand.vmem [shape: f32[1,384], index: 8, kind: input, shape index: {}]   ;;  %s8118_s9 = inlined_call_operand.hbm [shape: f32[8,384], index: 9, kind: output, shape index: {}]  }
   0x1   :  { %15 = vsyncpa [#allocation6], 0 }
   0x2   :  { %16 = vsyncpa [#allocation9], 0  ;;  %s43_s11 = sshll.u32 %s8114_s5, 4  ;;  %s44_s11 = int_to_ptr.hbm [resolvable:$true] %s43_s11 }
   0x3   :  { %17 = vsyncpa [#allocation4], 0  ;;  %s7666_s12 = smov [#allocation5]   ;;  %s30_s16 = sshll.u32 %s8113_s4, 4  ;;  %s31_s16 = int_to_ptr.hbm [resolvable:$true] %s30_s16 }
   0x4   :  { %s45_s13 = sshll.u32 %s7666_s12, 4  ;;  %s7667_s17 = smov 256   ;;  %s46_s13 = int_to_ptr.vmem [resolvable:$true] %s45_s13 }
   0x5   :  { %s7668_s18 = smov 16   ;;  %s7669_s19 = smov [#allocation2]  }
   0x6   :  { %51 = dma.hbm_to_vmem [thread:$0]  %s44_s11, 8192, %s46_s13, [#allocation6], %s7667_s17, %s7667_s17, %s7668_s18  }
   0x7   :  { %s32_s20 = sshll.u32 %s7669_s19, 4  ;;  %s7670_s21 = smov 128   ;;  %s33_s20 = int_to_ptr.vmem [resolvable:$true] %s32_s20 }
   0x8   :  { %s7671_s22 = smov 8   ;;  %s56_s24 = sshll.u32 %s8115_s6, 4  ;;  %s57_s24 = int_to_ptr.hbm [resolvable:$true] %s56_s24 }
   0x9   :  { %38 = dma.hbm_to_vmem [thread:$0]  %s31_s16, 2048, %s33_s20, [#allocation3], %s7670_s21, %s7670_s21, %s7671_s22  }
   0xa   :  { %s7672_s25 = smov [#allocation7]   ;;  %s69_s28 = sshll.u32 %s8116_s7, 4  ;;  %s70_s28 = int_to_ptr.hbm [resolvable:$true] %s69_s28 }
   0xb   :  { %s58_s26 = sshll.u32 %s7672_s25, 4  ;;  %s7673_s29 = smov 512   ;;  %s59_s26 = int_to_ptr.vmem [resolvable:$true] %s58_s26 }
   0xc   :  { %s7674_s30 = smov 32   ;;  %s7675_s10 = smov [#allocation8]  }
   0xd   :  { %64 = dma.hbm_to_vmem [thread:$0]  %s57_s24, 32768, %s59_s26, [#allocation6], %s7673_s29, %s7673_s29, %s7674_s30  }
   0xe   :  { %s71_s11 = sshll.u32 %s7675_s10, 4  ;;  %s7676_s12 = smov 192   ;;  %s72_s11 = int_to_ptr.vmem [resolvable:$true] %s71_s11 }
   0xf   :  { %s7677_s13 = smov 12  }
  0x10   :  { %77 = dma.hbm_to_vmem [thread:$0]  %s70_s28, 24576, %s72_s11, [#allocation9], %s7676_s12, %s7676_s12, %s7677_s13  }
  0x11   :  { %7658 = dma.done.wait [#allocation3], 2048  }
  0x12   :  { %7659 = vsyncadd [#allocation3], 4294965248 }
  0x13   :  { %7660 = dma.done.wait [#allocation6], 40960  }
  0x14   :  { %7661 = vsyncadd [#allocation6], 4294926336 }
  0x15   :  { %7662 = dma.done.wait [#allocation9], 24576  }
  0x16   :  { %7663 = vsyncadd [#allocation9], 4294942720  ;;  %vm110_vm0 = vcmask 1040384   ;;  %vm111_vm1 = vcmask 1041408   ;;  %v7678_v0 = vmov 65535   ;;  %v6956_v4 = vld [vmem:[%s8111_s2 + $0x8] sm:$0xff] }
  0x17   :  { %v112_v1 = vsel %vm110_vm0, 4294967295, %v7678_v0  ;;  %v105_v3 = vld [vmem:[%s8112_s3] sm:$0x3]  ;;  %152 = vmatpush.bf16.msra.mxu1 %v6956_v4  ;;  %vm106_vm2 = vcmask 23552   ;;  %vm142_vm3 = vcmask 261120   ;;  %v7679_v33 = vmov 8.0  }
  0x18   :  { %v113_v2 = vsel %vm111_vm1, %v112_v1, 0  ;;  %v103_v5 = vld [vmem:[%s8110_s1] sm:$0xff]  ;;  %v4901_v11 = vld [vmem:[#allocation2 + $0x70] sm:$0xf]  ;;  %v6972_v12 = vld [vmem:[#allocation2 + $0x74] sm:$0xf0]  ;;  %7500 = vrcp.f32 %v7679_v33 }
  0x19   :  { %v115_v6 = vand.u32 %v113_v2, %v105_v3  ;;  %v104_v7 = vpack.c.bf16 %v103_v5, %v103_v5  ;;  %v6955_v8 = vld [vmem:[%s8111_s2] sm:$0xff]  ;;  %v6971_v13 = vld [vmem:[#allocation2 + $0x74] sm:$0xf]  ;;  %v4902_v14 = vor.u32 %v6972_v12, %v4901_v11  ;;  %v4903_v15 = vld [vmem:[#allocation2 + $0x78] sm:$0xf0]  ;;  %s7680_s2 = smov [#allocation10]  }
  0x1a   :  { %v97_v9 = vld [vmem:[%s8109_s0] sm:$0xff]  ;;  %v6970_v17 = vld [vmem:[#allocation2 + $0x64] sm:$0xf0]  ;;  %v4906_v18 = vor.u32 %v6971_v13, %v4903_v15  ;;  %v4895_v20 = vld [vmem:[#allocation2 + $0x68] sm:$0xf0]  ;;  %s4819_s3 = sshll.u32 %s7680_s2, 4  ;;  %s4820_s3 = int_to_ptr.vmem [resolvable:$true] %s4819_s3 }
  0x1b   :  { %124 = vmatpush.bf16.msra.mxu0 %v115_v6  ;;  %v98_v10 = vpack.c.bf16 %v97_v9, %v97_v9  ;;  %153 = vmatpush.bf16.msra.mxu1 %v6955_v8  ;;  %v4893_v16 = vld [vmem:[#allocation2 + $0x60] sm:$0xf]  ;;  %v6969_v19 = vld [vmem:[#allocation2 + $0x64] sm:$0xf]  ;;  %v4885_v23 = vld [vmem:[#allocation2 + $0x50] sm:$0xf] }
  0x1c   :  { %294 = vmatpush.bf16.msra.mxu2 %v4902_v14  ;;  %v4894_v21 = vor.u32 %v6970_v17, %v4893_v16  ;;  %307 = vmatpush.bf16.msra.mxu3 %v4906_v18  ;;  %v4898_v22 = vor.u32 %v6969_v19, %v4895_v20  ;;  %v6968_v24 = vld [vmem:[#allocation2 + $0x54] sm:$0xf0]  ;;  %v6967_v25 = vld [vmem:[#allocation2 + $0x54] sm:$0xf]  ;;  %v4887_v26 = vld [vmem:[#allocation2 + $0x58] sm:$0xf0] }
  0x1d   :  { %v4886_v27 = vor.u32 %v6968_v24, %v4885_v23  ;;  %v4890_v28 = vor.u32 %v6967_v25, %v4887_v26  ;;  %v4877_v29 = vld [vmem:[#allocation2 + $0x40] sm:$0xf]  ;;  %v6966_v30 = vld [vmem:[#allocation2 + $0x44] sm:$0xf0]  ;;  %v6965_v31 = vld [vmem:[#allocation2 + $0x44] sm:$0xf] }
  0x1e   :  { %4833 = vmatmul.msk.bf16.vlgmr.msra.gmra.mxu0 %vm106_vm2, %v104_v7  ;;  %4842 = vmatmul.msk.bf16.vlgmr.msra.gmra.mxu1 %vm142_vm3, %v98_v10  ;;  %v4879_v32 = vld [vmem:[#allocation2 + $0x48] sm:$0xf0]  ;;  %v4878_v34 = vor.u32 %v6966_v30, %v4877_v29  ;;  %v4869_v36 = vld [vmem:[#allocation2 + $0x30] sm:$0xf]  ;;  %v6964_v37 = vld [vmem:[#allocation2 + $0x34] sm:$0xf0]  ;;  %v7501_v41 = vpop.eup %7500 }
  0x1f   :  { %v4882_v35 = vor.u32 %v6965_v31, %v4879_v32  ;;  %v6963_v38 = vld [vmem:[#allocation2 + $0x34] sm:$0xf]  ;;  %v4871_v39 = vld [vmem:[#allocation2 + $0x38] sm:$0xf0]  ;;  %v4870_v40 = vor.u32 %v6964_v37, %v4869_v36  ;;  %v4861_v43 = vld [vmem:[#allocation2 + $0x20] sm:$0xf]  ;;  %vm173_vm5 = vweird.f32 %v7501_v41 }
  0x20   :  { %295 = vmatpush.bf16.msra.mxu2 %v4894_v21  ;;  %308 = vmatpush.bf16.msra.mxu3 %v4898_v22  ;;  %v4874_v42 = vor.u32 %v6963_v38, %v4871_v39  ;;  %v6962_v44 = vld [vmem:[#allocation2 + $0x24] sm:$0xf0]  ;;  %v6961_v46 = vld [vmem:[#allocation2 + $0x24] sm:$0xf]  ;;  %v4863_v47 = vld [vmem:[#allocation2 + $0x28] sm:$0xf0] }
  0x21   :  { %v4862_v48 = vor.u32 %v6962_v44, %v4861_v43  ;;  %v169_v49 = vmul.f32 8.0, %v7501_v41  ;;  %v4866_v51 = vor.u32 %v6961_v46, %v4863_v47  ;;  %v4853_v52 = vld [vmem:[#allocation2 + $0x10] sm:$0xf]  ;;  %v6960_v53 = vld [vmem:[#allocation2 + $0x14] sm:$0xf0]  ;;  %s4821_s5 = sshll.u32 %s8118_s9, 4  ;;  %s4822_s5 = int_to_ptr.hbm [resolvable:$true] %s4821_s5 }
  0x22   :  { %v6959_v55 = vld [vmem:[#allocation2 + $0x14] sm:$0xf]  ;;  %v4855_v56 = vld [vmem:[#allocation2 + $0x18] sm:$0xf0]  ;;  %v4854_v58 = vor.u32 %v6960_v53, %v4853_v52  ;;  %v4845_v61 = vld [vmem:[#allocation2] sm:$0xf] }
  0x23   :  { %v170_v59 = vsub.f32 1.0, %v169_v49  ;;  %v4858_v60 = vor.u32 %v6959_v55, %v4855_v56  ;;  %v6958_v62 = vld [vmem:[#allocation2 + $0x4] sm:$0xf0]  ;;  %v6957_v1 = vld [vmem:[#allocation2 + $0x4] sm:$0xf] }
  0x24   :  { %296 = vmatpush.bf16.msra.mxu2 %v4886_v27  ;;  %309 = vmatpush.bf16.msra.mxu3 %v4890_v28  ;;  %v4847_v2 = vld [vmem:[#allocation2 + $0x8] sm:$0xf0]  ;;  %v4846_v4 = vor.u32 %v6958_v62, %v4845_v61  ;;  %v7003_v36 = vld [vmem:[#allocation5 + $0xec] sm:$0xf0]  ;;  %v5149_v37 = vld [vmem:[#allocation5 + $0x1e0] sm:$0xf] }
  0x25   :  { %v171_v5 = vmul.f32 %v7501_v41, %v170_v59  ;;  %v4850_v8 = vor.u32 %v6957_v1, %v4847_v2  ;;  %v7035_v39 = vld [vmem:[#allocation5 + $0x1ec] sm:$0xf0]  ;;  %v7033_v44 = vld [vmem:[#allocation5 + $0x1e4] sm:$0xf]  ;;  %v5005_v47 = vld [vmem:[#allocation5 + $0xc0] sm:$0xf] }
  0x26   :  { %v5133_v49 = vld [vmem:[#allocation5 + $0x1c0] sm:$0xf]  ;;  %v6997_v52 = vld [vmem:[#allocation5 + $0xc4] sm:$0xf]  ;;  %v5007_v53 = vld [vmem:[#allocation5 + $0xd0] sm:$0xf0] }
  0x27   :  { %v172_v10 = vadd.f32 %v7501_v41, %v171_v5  ;;  %v5010_v55 = vor.u32 %v6997_v52, %v5007_v53  ;;  %v7029_v56 = vld [vmem:[#allocation5 + $0x1c4] sm:$0xf]  ;;  %v4989_v59 = vld [vmem:[#allocation5 + $0xa0] sm:$0xf]  ;;  %v4991_v1 = vld [vmem:[#allocation5 + $0xb0] sm:$0xf0] }
  0x28   :  { %297 = vmatpush.bf16.msra.mxu2 %v4878_v34  ;;  %310 = vmatpush.bf16.msra.mxu3 %v4882_v35  ;;  %v5021_v35 = vld [vmem:[#allocation5 + $0xe0] sm:$0xf]  ;;  %v5119_v5 = vld [vmem:[#allocation5 + $0x1b0] sm:$0xf0] }
  0x29   :  { %v7758_v13 = vsel %vm173_vm5, %v7501_v41, %v172_v10  ;;  %v5022_v38 = vor.u32 %v7003_v36, %v5021_v35  ;;  %v5023_v41 = vld [vmem:[#allocation5 + $0xf0] sm:$0xf0]  ;;  %v5117_v61 = vld [vmem:[#allocation5 + $0x1a0] sm:$0xf] }
  0x2a   :  { %v4941_v36 = vld [vmem:[#allocation5 + $0x40] sm:$0xf] }
  0x2b   :  { %768 = vmatpush.bf16.msrb.mxu0 %v5022_v38  ;;  %v5069_v38 = vld [vmem:[#allocation5 + $0x140] sm:$0xf] }
  0x2c   :  { %298 = vmatpush.bf16.msra.mxu2 %v4870_v40  ;;  %311 = vmatpush.bf16.msra.mxu3 %v4874_v42  ;;  %v7001_v40 = vld [vmem:[#allocation5 + $0xe4] sm:$0xf]  ;;  %v5150_v42 = vor.u32 %v7035_v39, %v5149_v37  ;;  %v6983_v37 = vld [vmem:[#allocation5 + $0x4c] sm:$0xf0] }
  0x2d   :  { %v5026_v43 = vor.u32 %v7001_v40, %v5023_v41  ;;  %v4942_v41 = vor.u32 %v6983_v37, %v4941_v36  ;;  %v5013_v36 = vld [vmem:[#allocation5 + $0xc8] sm:$0xf] }
  0x2e   :  { %781 = vmatpush.bf16.msrb.mxu1 %v5150_v42  ;;  %v7015_v42 = vld [vmem:[#allocation5 + $0x14c] sm:$0xf0] }
  0x30   :  { %299 = vmatpush.bf16.msra.mxu2 %v4862_v48  ;;  %312 = vmatpush.bf16.msra.mxu3 %v4866_v51  ;;  %v6999_v48 = vld [vmem:[#allocation5 + $0xcc] sm:$0xf0] }
  0x31   :  { %v7031_v51 = vld [vmem:[#allocation5 + $0x1cc] sm:$0xf0] }
  0x34   :  { %300 = vmatpush.bf16.msra.mxu2 %v4854_v58  ;;  %313 = vmatpush.bf16.msra.mxu3 %v4858_v60  ;;  %v6995_v60 = vld [vmem:[#allocation5 + $0xac] sm:$0xf0] }
  0x35   :  { %v4990_v62 = vor.u32 %v6995_v60, %v4989_v59  ;;  %v6977_v59 = vld [vmem:[#allocation5 + $0x24] sm:$0xf]  ;;  %v4927_v60 = vld [vmem:[#allocation5 + $0x30] sm:$0xf0] }
  0x38   :  { %301 = vmatpush.bf16.msra.mxu2 %v4846_v4  ;;  %314 = vmatpush.bf16.msra.mxu3 %v4850_v8  ;;  %v7025_v4 = vld [vmem:[#allocation5 + $0x1a4] sm:$0xf]  ;;  %v6991_v8 = vld [vmem:[#allocation5 + $0x8c] sm:$0xf0] }
  0x3c   :  { %794 = vmatpush.bf16.msrb.mxu2 %v5026_v43  ;;  %v6981_v43 = vld [vmem:[#allocation5 + $0x44] sm:$0xf] }
  0x40   :  { %795 = vmatpush.bf16.msrb.mxu2 %v5010_v55  ;;  %v6979_v55 = vld [vmem:[#allocation5 + $0x2c] sm:$0xf0] }
  0x9b   :  { %v126_v45 = vpop.f32.mrf.mxu0  ;;  %v155_v50 = vpop.f32.mrf.mxu1 }
  0x9c   :  { %v156_v54 = vadd.f32 %v155_v50, %v126_v45  ;;  %v5151_v45 = vld [vmem:[#allocation5 + $0x1f0] sm:$0xf0]  ;;  %v5006_v50 = vor.u32 %v6999_v48, %v5005_v47  ;;  %v5070_v47 = vor.u32 %v7015_v42, %v5069_v38  ;;  %v7000_v42 = vld [vmem:[#allocation5 + $0xd4] sm:$0xf0] }
  0x9d   :  { %v5154_v46 = vor.u32 %v7033_v44, %v5151_v45  ;;  %v4943_v44 = vld [vmem:[#allocation5 + $0x50] sm:$0xf0] }
  0x9e   :  { %vm159_vm4 = vcmp.gt.f32.partialorder %v156_v54, 0.0  ;;  %v160_v57 = vmul.f32 0.02, %v156_v54  ;;  %769 = vmatpush.bf16.msrb.mxu0 %v5006_v50  ;;  %v4946_v48 = vor.u32 %v6981_v43, %v4943_v44  ;;  %v5071_v50 = vld [vmem:[#allocation5 + $0x150] sm:$0xf0] }
  0x9f   :  { %807 = vmatpush.bf16.msrb.mxu3 %v5154_v46  ;;  %v5141_v43 = vld [vmem:[#allocation5 + $0x1c8] sm:$0xf]  ;;  %v7032_v44 = vld [vmem:[#allocation5 + $0x1d4] sm:$0xf0] }
  0xa0   :  { %v161_v63 = vsel %vm159_vm4, %v156_v54, %v160_v57  ;;  %v5134_v54 = vor.u32 %v7031_v51, %v5133_v49  ;;  %v5135_v57 = vld [vmem:[#allocation5 + $0x1d0] sm:$0xf0]  ;;  %v7013_v49 = vld [vmem:[#allocation5 + $0x144] sm:$0xf] }
  0xa1   :  { %v162_v3 = vrot.slane %v161_v63, 4  ;;  %v5138_v58 = vor.u32 %v7029_v56, %v5135_v57  ;;  %v5074_v51 = vor.u32 %v7013_v49, %v5071_v50  ;;  %v5053_v56 = vld [vmem:[#allocation5 + $0x120] sm:$0xf]  ;;  %v7030_v49 = vld [vmem:[#allocation5 + $0x1cc] sm:$0xf] }
  0xa2   :  { %782 = vmatpush.bf16.msrb.mxu1 %v5134_v54  ;;  %770 = vmatpush.bf16.msrb.mxu0 %v4990_v62  ;;  %v4925_v54 = vld [vmem:[#allocation5 + $0x20] sm:$0xf] }
  0xa3   :  { %v128_v0 = vpop.f32.mrf.mxu0  ;;  %v163_v6 = vadd.f32 %v162_v3, %v161_v63  ;;  %v157_v7 = vpop.f32.mrf.mxu1  ;;  %808 = vmatpush.bf16.msrb.mxu3 %v5138_v58  ;;  %v4926_v57 = vor.u32 %v6979_v55, %v4925_v54  ;;  %v7011_v58 = vld [vmem:[#allocation5 + $0x12c] sm:$0xf0]  ;;  %v4997_v55 = vld [vmem:[#allocation5 + $0xa8] sm:$0xf] }
  0xa4   :  { %v6993_v0 = vld [vmem:[#allocation5 + $0xa4] sm:$0xf]  ;;  %v4973_v7 = vld [vmem:[#allocation5 + $0x80] sm:$0xf] }
  0xa5   :  { %v164_v9 = vrot.slane %v163_v6, 2  ;;  %v4994_v3 = vor.u32 %v6993_v0, %v4991_v1  ;;  %v4974_v10 = vor.u32 %v6991_v8, %v4973_v7  ;;  %v5054_v1 = vor.u32 %v7011_v58, %v5053_v56  ;;  %v4909_v8 = vld [vmem:[#allocation5] sm:$0xf]  ;;  %v6996_v56 = vld [vmem:[#allocation5 + $0xb4] sm:$0xf0] }
  0xa7   :  { %v165_v11 = vadd.f32 %v164_v9, %v163_v6  ;;  %v5122_v6 = vor.u32 %v7025_v4, %v5119_v5  ;;  %796 = vmatpush.bf16.msrb.mxu2 %v4994_v3  ;;  %v5101_v9 = vld [vmem:[#allocation5 + $0x180] sm:$0xf]  ;;  %771 = vmatpush.bf16.msrb.mxu0 %v4974_v10  ;;  %v7009_v3 = vld [vmem:[#allocation5 + $0x124] sm:$0xf]  ;;  %v5055_v4 = vld [vmem:[#allocation5 + $0x130] sm:$0xf0] }
  0xa8   :  { %v5058_v5 = vor.u32 %v7009_v3, %v5055_v4  ;;  %v5037_v10 = vld [vmem:[#allocation5 + $0x100] sm:$0xf] }
  0xa9   :  { %v166_v12 = vrot.slane %v165_v11, 1  ;;  %809 = vmatpush.bf16.msrb.mxu3 %v5122_v6 }
  0xab   :  { %v167_v14 = vadd.f32 %v166_v12, %v165_v11  ;;  %v7023_v11 = vld [vmem:[#allocation5 + $0x18c] sm:$0xf0]  ;;  %v6989_v12 = vld [vmem:[#allocation5 + $0x84] sm:$0xf] }
  0xad   :  { %v175_v15 = vmul.f32 %v7758_v13, %v167_v14  ;;  %v4975_v14 = vld [vmem:[#allocation5 + $0x90] sm:$0xf0] }
  0xaf   :  { %v176_v16 = vsub.f32 %v161_v63, %v175_v15  ;;  %v7027_v63 = vld [vmem:[#allocation5 + $0x1ac] sm:$0xf0]  ;;  %v5102_v15 = vor.u32 %v7023_v11, %v5101_v9 }
  0xb0   :  { %v5118_v2 = vor.u32 %v7027_v63, %v5117_v61  ;;  %v6975_v9 = vld [vmem:[#allocation5 + $0xc] sm:$0xf0] }
  0xb1   :  { %v177_v17 = vmul.f32 %v176_v16, %v176_v16  ;;  %v4910_v11 = vor.u32 %v6975_v9, %v4909_v8 }
  0xb2   :  { %783 = vmatpush.bf16.msrb.mxu1 %v5118_v2  ;;  %v4930_v2 = vor.u32 %v6977_v59, %v4927_v60  ;;  %v4998_v60 = vor.u32 %v6996_v56, %v4997_v55  ;;  %v4933_v55 = vld [vmem:[#allocation5 + $0x28] sm:$0xf]  ;;  %v6980_v56 = vld [vmem:[#allocation5 + $0x34] sm:$0xf0] }
  0xb3   :  { %v178_v18 = vrot.slane %v177_v17, 4 }
  0xb5   :  { %v179_v19 = vadd.f32 %v178_v18, %v177_v17  ;;  %v7021_v17 = vld [vmem:[#allocation5 + $0x184] sm:$0xf]  ;;  %v5103_v18 = vld [vmem:[#allocation5 + $0x190] sm:$0xf0] }
  0xb6   :  { %784 = vmatpush.bf16.msrb.mxu1 %v5102_v15  ;;  %v4911_v15 = vld [vmem:[#allocation5 + $0x10] sm:$0xf0] }
  0xb7   :  { %v180_v20 = vrot.slane %v179_v19, 2 }
  0xb9   :  { %v181_v21 = vadd.f32 %v180_v20, %v179_v19  ;;  %v5106_v19 = vor.u32 %v7021_v17, %v5103_v18  ;;  %v4957_v20 = vld [vmem:[#allocation5 + $0x60] sm:$0xf] }
  0xbb   :  { %v182_v22 = vrot.slane %v181_v21, 1  ;;  %810 = vmatpush.bf16.msrb.mxu3 %v5106_v19 }
  0xbd   :  { %v183_v23 = vadd.f32 %v182_v22, %v181_v21  ;;  %v6987_v21 = vld [vmem:[#allocation5 + $0x6c] sm:$0xf0]  ;;  %v5085_v22 = vld [vmem:[#allocation5 + $0x160] sm:$0xf] }
  0xbf   :  { %v184_v24 = vmul.f32 %v183_v23, %v7758_v13  ;;  %v4958_v23 = vor.u32 %v6987_v21, %v4957_v20  ;;  %v7005_v20 = vld [vmem:[#allocation5 + $0x104] sm:$0xf]  ;;  %v5039_v21 = vld [vmem:[#allocation5 + $0x110] sm:$0xf0] }
  0xc1   :  { %v185_v25 = vadd.f32 1e-05, %v184_v24  ;;  %v7019_v24 = vld [vmem:[#allocation5 + $0x16c] sm:$0xf0]  ;;  %772 = vmatpush.bf16.msrb.mxu0 %v4958_v23  ;;  %v5029_v23 = vld [vmem:[#allocation5 + $0xe8] sm:$0xf] }
  0xc3   :  { %7502 = vrsqrt.f32 %v185_v25  ;;  %vm192_vm7 = vweird.f32 %v185_v25 }
  0xc5   :  { %773 = vmatpush.bf16.msrb.mxu0 %v4942_v41 }
  0xc9   :  { %v7503_v26 = vpop.eup %7502  ;;  %774 = vmatpush.bf16.msrb.mxu0 %v4926_v57  ;;  %v5125_v57 = vld [vmem:[#allocation5 + $0x1a8] sm:$0xf] }
  0xca   :  { %v187_v27 = vmul.f32 %v7503_v26, %v185_v25  ;;  %vm193_vm6 = vweird.f32 %v7503_v26  ;;  %v6985_v25 = vld [vmem:[#allocation5 + $0x64] sm:$0xf] }
  0xcb   :  { %vm194_vm8 = vmor %vm192_vm7, %vm193_vm6 }
  0xcc   :  { %v188_v28 = vmul.f32 %v7503_v26, %v187_v27 }
  0xcd   :  { %775 = vmatpush.bf16.msrb.mxu0 %v4910_v11  ;;  %v7024_v11 = vld [vmem:[#allocation5 + $0x194] sm:$0xf0] }
  0xce   :  { %v189_v29 = vmul.f32 0.5, %v188_v28 }
  0xd0   :  { %v190_v30 = vsub.f32 1.5, %v189_v29  ;;  %v5086_v29 = vor.u32 %v7019_v24, %v5085_v22  ;;  %v5042_v22 = vor.u32 %v7005_v20, %v5039_v21  ;;  %v7004_v24 = vld [vmem:[#allocation5 + $0xf4] sm:$0xf0] }
  0xd2   :  { %v191_v31 = vmul.f32 %v7503_v26, %v190_v30  ;;  %785 = vmatpush.bf16.msrb.mxu1 %v5086_v29  ;;  %v7036_v29 = vld [vmem:[#allocation5 + $0x1f4] sm:$0xf0] }
  0xd4   :  { %v195_v32 = vsel %vm194_vm8, %v7503_v26, %v191_v31  ;;  %v4959_v26 = vld [vmem:[#allocation5 + $0x70] sm:$0xf0]  ;;  %v7017_v31 = vld [vmem:[#allocation5 + $0x164] sm:$0xf] }
  0xd5   :  { %v196_v33 = vmul.f32 %v195_v32, %v176_v16  ;;  %v4978_v16 = vor.u32 %v6989_v12, %v4975_v14  ;;  %v4962_v30 = vor.u32 %v6985_v25, %v4959_v26  ;;  %v5087_v32 = vld [vmem:[#allocation5 + $0x170] sm:$0xf0]  ;;  %v7007_v12 = vld [vmem:[#allocation5 + $0x10c] sm:$0xf0]  ;;  %v6973_v14 = vld [vmem:[#allocation5 + $0x4] sm:$0xf] }
  0xd6   :  { %v5090_v35 = vor.u32 %v7017_v31, %v5087_v32  ;;  %786 = vmatpush.bf16.msrb.mxu1 %v5070_v47  ;;  %v5038_v18 = vor.u32 %v7007_v12, %v5037_v10  ;;  %v4914_v19 = vor.u32 %v6973_v14, %v4911_v15  ;;  %v5157_v25 = vld [vmem:[#allocation5 + $0x1e8] sm:$0xf]  ;;  %v5031_v31 = vld [vmem:[#allocation5 + $0xf8] sm:$0xf0]  ;;  %v6998_v47 = vld [vmem:[#allocation5 + $0xcc] sm:$0xf] }
  0xd7   :  { %v197_v34 = vpack.c.bf16 %v196_v33, %v196_v33  ;;  %797 = vmatpush.bf16.msrb.mxu2 %v4978_v16  ;;  %v5158_v32 = vor.u32 %v7036_v29, %v5157_v25  ;;  %v6990_v12 = vld [vmem:[#allocation5 + $0x8c] sm:$0xf]  ;;  %v4983_v14 = vld [vmem:[#allocation5 + $0x98] sm:$0xf0] }
  0xd8   :  { %811 = vmatpush.bf16.msrb.mxu3 %v5090_v35  ;;  %v5159_v35 = vld [vmem:[#allocation5 + $0x1f8] sm:$0xf0]  ;;  %v6986_v29 = vld [vmem:[#allocation5 + $0x6c] sm:$0xf] }
  0xd9   :  { %302 = vmatmul.bf16.vlgmr.msra.gmra.mxu2 %v197_v34  ;;  %315 = vmatmul.bf16.vlgmr.msra.gmra.mxu3 %v197_v34 }
  0xda   :  { %787 = vmatpush.bf16.msrb.mxu1 %v5054_v1  ;;  %v5127_v1 = vld [vmem:[#allocation5 + $0x1b8] sm:$0xf0] }
  0xdb   :  { %798 = vmatpush.bf16.msrb.mxu2 %v4962_v30  ;;  %v7002_v30 = vld [vmem:[#allocation5 + $0xec] sm:$0xf] }
  0xdc   :  { %812 = vmatpush.bf16.msrb.mxu3 %v5074_v51 }
  0xde   :  { %788 = vmatpush.bf16.msrb.mxu1 %v5038_v18  ;;  %v5111_v18 = vld [vmem:[#allocation5 + $0x198] sm:$0xf0] }
  0xdf   :  { %799 = vmatpush.bf16.msrb.mxu2 %v4946_v48  ;;  %v5015_v48 = vld [vmem:[#allocation5 + $0xd8] sm:$0xf0] }
  0xe0   :  { %813 = vmatpush.bf16.msrb.mxu3 %v5058_v5  ;;  %v4981_v5 = vld [vmem:[#allocation5 + $0x88] sm:$0xf] }
  0xe2   :  { %833 = vmatpush.bf16.msra.mxu1 %v5158_v32 }
  0xe3   :  { %800 = vmatpush.bf16.msrb.mxu2 %v4930_v2 }
  0xe4   :  { %814 = vmatpush.bf16.msrb.mxu3 %v5042_v22  ;;  %v4965_v22 = vld [vmem:[#allocation5 + $0x68] sm:$0xf] }
  0xe7   :  { %801 = vmatpush.bf16.msrb.mxu2 %v4914_v19 }
 0x15c   :  { %v303_v27 = vpop.f32.mrf.mxu2  ;;  %v316_v28 = vpop.f32.mrf.mxu3 }
 0x15d   :  { %vm320_vm9 = vcmp.gt.f32.partialorder %v303_v27, 0.0  ;;  %v322_v33 = vmul.f32 0.02, %v303_v27  ;;  %vm321_vm10 = vcmp.gt.f32.partialorder %v316_v28, 0.0  ;;  %v323_v34 = vmul.f32 0.02, %v316_v28 }
 0x15f   :  { %v7762_v39 = vsel %vm320_vm9, %v303_v27, %v322_v33  ;;  %v7764_v40 = vsel %vm321_vm10, %v316_v28, %v323_v34  ;;  %v5030_v28 = vor.u32 %v7004_v24, %v5029_v23  ;;  %v5034_v33 = vor.u32 %v7002_v30, %v5031_v31  ;;  %v7034_v34 = vld [vmem:[#allocation5 + $0x1ec] sm:$0xf]  ;;  %v6988_v23 = vld [vmem:[#allocation5 + $0x74] sm:$0xf0]  ;;  %v5093_v24 = vld [vmem:[#allocation5 + $0x168] sm:$0xf] }
 0x160   :  { %v326_v45 = vrot.slane %v7762_v39, 4  ;;  %v332_v46 = vrot.slane %v7764_v40, 4  ;;  %v5162_v41 = vor.u32 %v7034_v34, %v5159_v35  ;;  %v4967_v30 = vld [vmem:[#allocation5 + $0x78] sm:$0xf0]  ;;  %v4949_v35 = vld [vmem:[#allocation5 + $0x48] sm:$0xf] }
 0x161   :  { %820 = vmatpush.bf16.msra.mxu0 %v5030_v28  ;;  %846 = vmatpush.bf16.msra.mxu2 %v5034_v33  ;;  %v7020_v28 = vld [vmem:[#allocation5 + $0x174] sm:$0xf0]  ;;  %v4970_v32 = vor.u32 %v6986_v29, %v4967_v30  ;;  %v7018_v33 = vld [vmem:[#allocation5 + $0x16c] sm:$0xf]  ;;  %v5095_v34 = vld [vmem:[#allocation5 + $0x178] sm:$0xf0] }
 0x162   :  { %v327_v52 = vadd.f32 %v326_v45, %v7762_v39  ;;  %v333_v53 = vadd.f32 %v332_v46, %v7764_v40  ;;  %v5014_v45 = vor.u32 %v7000_v42, %v5013_v36  ;;  %v5142_v46 = vor.u32 %v7032_v44, %v5141_v43  ;;  %859 = vmatpush.bf16.msra.mxu3 %v5162_v41  ;;  %v6984_v41 = vld [vmem:[#allocation5 + $0x54] sm:$0xf0]  ;;  %v5077_v42 = vld [vmem:[#allocation5 + $0x148] sm:$0xf]  ;;  %v6982_v44 = vld [vmem:[#allocation5 + $0x4c] sm:$0xf] }
 0x163   :  { %v5094_v31 = vor.u32 %v7020_v28, %v5093_v24  ;;  %v7016_v43 = vld [vmem:[#allocation5 + $0x154] sm:$0xf0] }
 0x164   :  { %v328_v61 = vrot.slane %v327_v52, 2  ;;  %v334_v62 = vrot.slane %v333_v53, 2  ;;  %v305_v63 = vpop.f32.mrf.mxu2  ;;  %v318_v0 = vpop.f32.mrf.mxu3  ;;  %834 = vmatpush.bf16.msra.mxu1 %v5142_v46 }
 0x165   :  { %821 = vmatpush.bf16.msra.mxu0 %v5014_v45  ;;  %v7026_v0 = vld [vmem:[#allocation5 + $0x1ac] sm:$0xf]  ;;  %v4951_v45 = vld [vmem:[#allocation5 + $0x58] sm:$0xf0] }
 0x166   :  { %v329_v6 = vadd.f32 %v328_v61, %v327_v52  ;;  %v335_v7 = vadd.f32 %v334_v62, %v333_v53  ;;  %v5018_v52 = vor.u32 %v6998_v47, %v5015_v48  ;;  %v5143_v53 = vld [vmem:[#allocation5 + $0x1d8] sm:$0xf0]  ;;  %v6994_v61 = vld [vmem:[#allocation5 + $0xac] sm:$0xf]  ;;  %v5130_v4 = vor.u32 %v7026_v0, %v5127_v1 }
 0x167   :  { %v5146_v54 = vor.u32 %v7030_v49, %v5143_v53  ;;  %v4999_v62 = vld [vmem:[#allocation5 + $0xb8] sm:$0xf0]  ;;  %v4950_v48 = vor.u32 %v6984_v41, %v4949_v35  ;;  %v7014_v49 = vld [vmem:[#allocation5 + $0x14c] sm:$0xf]  ;;  %v5078_v53 = vor.u32 %v7016_v43, %v5077_v42  ;;  %v5357_v42 = vld [vmem:[#allocation7 + $0x180] sm:$0xf] }
 0x168   :  { %v330_v16 = vrot.slane %v329_v6, 1  ;;  %v336_v17 = vrot.slane %v335_v7, 1  ;;  %847 = vmatpush.bf16.msra.mxu2 %v5018_v52  ;;  %v5002_v63 = vor.u32 %v6994_v61, %v4999_v62  ;;  %v5079_v52 = vld [vmem:[#allocation5 + $0x158] sm:$0xf0]  ;;  %v6978_v61 = vld [vmem:[#allocation5 + $0x2c] sm:$0xf] }
 0x169   :  { %860 = vmatpush.bf16.msra.mxu3 %v5146_v54  ;;  %822 = vmatpush.bf16.msra.mxu0 %v4998_v60  ;;  %v4954_v54 = vor.u32 %v6982_v44, %v4951_v45  ;;  %v5082_v60 = vor.u32 %v7014_v49, %v5079_v52  ;;  %v4935_v62 = vld [vmem:[#allocation5 + $0x38] sm:$0xf0]  ;;  %v7089_v43 = vld [vmem:[#allocation7 + $0x19c] sm:$0xf0] }
 0x16a   :  { %v331_v26 = vadd.f32 %v330_v16, %v329_v6  ;;  %v337_v27 = vadd.f32 %v336_v17, %v335_v7  ;;  %v6992_v6 = vld [vmem:[#allocation5 + $0x94] sm:$0xf0]  ;;  %v5109_v7 = vld [vmem:[#allocation5 + $0x188] sm:$0xf]  ;;  %v4986_v16 = vor.u32 %v6990_v12, %v4983_v14  ;;  %v7022_v17 = vld [vmem:[#allocation5 + $0x18c] sm:$0xf] }
 0x16b   :  { %v4982_v10 = vor.u32 %v6992_v6, %v4981_v5  ;;  %v5110_v15 = vor.u32 %v7024_v11, %v5109_v7  ;;  %v5114_v21 = vor.u32 %v7022_v17, %v5111_v18  ;;  %v4917_v5 = vld [vmem:[#allocation5 + $0x8] sm:$0xf]  ;;  %v6976_v6 = vld [vmem:[#allocation5 + $0x14] sm:$0xf0]  ;;  %v4919_v11 = vld [vmem:[#allocation5 + $0x18] sm:$0xf0] }
 0x16c   :  { %v338_v37 = vmul.f32 %v331_v26, %v7758_v13  ;;  %v339_v38 = vmul.f32 %v337_v27, %v7758_v13  ;;  %848 = vmatpush.bf16.msra.mxu2 %v5002_v63  ;;  %v4966_v27 = vor.u32 %v6988_v23, %v4965_v22  ;;  %v5063_v63 = vld [vmem:[#allocation5 + $0x138] sm:$0xf0]  ;;  %v5045_v7 = vld [vmem:[#allocation5 + $0x108] sm:$0xf]  ;;  %v7006_v12 = vld [vmem:[#allocation5 + $0x10c] sm:$0xf] }
 0x16d   :  { %861 = vmatpush.bf16.msra.mxu3 %v5130_v4  ;;  %823 = vmatpush.bf16.msra.mxu0 %v4982_v10  ;;  %v4938_v4 = vor.u32 %v6978_v61, %v4935_v62  ;;  %v6974_v10 = vld [vmem:[#allocation5 + $0xc] sm:$0xf]  ;;  %v5047_v14 = vld [vmem:[#allocation5 + $0x118] sm:$0xf0]  ;;  %v5645_v44 = vld [vmem:[#allocation7 + $0x3c0] sm:$0xf] }
 0x16e   :  { %v7773_v50 = vsub.f32 %v7762_v39, %v338_v37  ;;  %v7776_v51 = vsub.f32 %v7764_v40, %v339_v38  ;;  %v7028_v39 = vld [vmem:[#allocation5 + $0x1b4] sm:$0xf0]  ;;  %v5098_v38 = vor.u32 %v7018_v33, %v5095_v34  ;;  %v4922_v17 = vor.u32 %v6974_v10, %v4919_v11  ;;  %v7161_v45 = vld [vmem:[#allocation7 + $0x3dc] sm:$0xf0] }
 0x16f   :  { %v5126_v40 = vor.u32 %v7028_v39, %v5125_v57  ;;  %v5061_v57 = vld [vmem:[#allocation5 + $0x128] sm:$0xf]  ;;  %v7012_v39 = vld [vmem:[#allocation5 + $0x134] sm:$0xf0]  ;;  %v5050_v18 = vor.u32 %v7006_v12, %v5047_v14  ;;  %v5613_v49 = vld [vmem:[#allocation7 + $0x380] sm:$0xf] }
 0x170   :  { %v342_v58 = vmul.f32 %v7773_v50, %v7773_v50  ;;  %v343_v59 = vmul.f32 %v7776_v51, %v7776_v51  ;;  %849 = vmatpush.bf16.msra.mxu2 %v4986_v16  ;;  %v7153_v52 = vld [vmem:[#allocation7 + $0x39c] sm:$0xf0] }
 0x171   :  { %835 = vmatpush.bf16.msra.mxu1 %v5126_v40  ;;  %862 = vmatpush.bf16.msra.mxu3 %v5114_v21  ;;  %v7010_v40 = vld [vmem:[#allocation5 + $0x12c] sm:$0xf]  ;;  %v5901_v61 = vld [vmem:[#allocation7 + $0x5c0] sm:$0xf] }
 0x172   :  { %v344_v2 = vrot.slane %v342_v58, 4  ;;  %v350_v3 = vrot.slane %v343_v59, 4  ;;  %824 = vmatpush.bf16.msra.mxu0 %v4966_v27  ;;  %v7129_v10 = vld [vmem:[#allocation7 + $0x2dc] sm:$0xf0] }
 0x173   :  { %v6157_v11 = vld [vmem:[#allocation7 + $0x7c0] sm:$0xf] }
 0x174   :  { %v345_v8 = vadd.f32 %v344_v2, %v342_v58  ;;  %v351_v9 = vadd.f32 %v350_v3, %v343_v59  ;;  %850 = vmatpush.bf16.msra.mxu2 %v4970_v32  ;;  %v4934_v2 = vor.u32 %v6980_v56, %v4933_v55  ;;  %v5062_v3 = vor.u32 %v7012_v39, %v5061_v57  ;;  %v7073_v55 = vld [vmem:[#allocation7 + $0x11c] sm:$0xf0] }
 0x175   :  { %836 = vmatpush.bf16.msra.mxu1 %v5110_v15  ;;  %863 = vmatpush.bf16.msra.mxu3 %v5098_v38  ;;  %v4918_v15 = vor.u32 %v6976_v6, %v4917_v5  ;;  %v7097_v38 = vld [vmem:[#allocation7 + $0x1dc] sm:$0xf0] }
 0x176   :  { %v346_v19 = vrot.slane %v345_v8, 2  ;;  %v352_v20 = vrot.slane %v351_v9, 2  ;;  %825 = vmatpush.bf16.msra.mxu0 %v4950_v48  ;;  %v5581_v57 = vld [vmem:[#allocation7 + $0x340] sm:$0xf] }
 0x177   :  { %v7065_v39 = vld [vmem:[#allocation7 + $0xdc] sm:$0xf0] }
 0x178   :  { %v347_v25 = vadd.f32 %v346_v19, %v345_v8  ;;  %v353_v26 = vadd.f32 %v352_v20, %v351_v9  ;;  %851 = vmatpush.bf16.msra.mxu2 %v4954_v54  ;;  %v5066_v8 = vor.u32 %v7010_v40, %v5063_v63  ;;  %v7008_v9 = vld [vmem:[#allocation5 + $0x114] sm:$0xf0]  ;;  %v5293_v54 = vld [vmem:[#allocation7 + $0x100] sm:$0xf] }
 0x179   :  { %837 = vmatpush.bf16.msra.mxu1 %v5094_v31  ;;  %864 = vmatpush.bf16.msra.mxu3 %v5082_v60  ;;  %v5046_v16 = vor.u32 %v7008_v9, %v5045_v7  ;;  %v5294_v56 = vor.u32 %v7073_v55, %v5293_v54  ;;  %v5261_v60 = vld [vmem:[#allocation7 + $0xc0] sm:$0xf] }
 0x17a   :  { %v348_v36 = vrot.slane %v347_v25, 1  ;;  %v354_v37 = vrot.slane %v353_v26, 1  ;;  %826 = vmatpush.bf16.msra.mxu0 %v4934_v2  ;;  %v5262_v62 = vor.u32 %v7065_v39, %v5261_v60  ;;  %v7225_v40 = vld [vmem:[#allocation7 + $0x5dc] sm:$0xf0] }
 0x17b   :  { %v5902_v63 = vor.u32 %v7225_v40, %v5901_v61  ;;  %v5869_v5 = vld [vmem:[#allocation7 + $0x580] sm:$0xf]  ;;  %v7157_v40 = vld [vmem:[#allocation7 + $0x3c4] sm:$0xf] }
 0x17c   :  { %v349_v46 = vadd.f32 %v348_v36, %v347_v25  ;;  %v355_v47 = vadd.f32 %v354_v37, %v353_v26  ;;  %852 = vmatpush.bf16.msra.mxu2 %v4938_v4  ;;  %v5389_v37 = vld [vmem:[#allocation7 + $0x1c0] sm:$0xf] }
 0x17d   :  { %838 = vmatpush.bf16.msra.mxu1 %v5078_v53  ;;  %865 = vmatpush.bf16.msra.mxu3 %v5066_v8  ;;  %v5390_v41 = vor.u32 %v7097_v38, %v5389_v37  ;;  %v5614_v53 = vor.u32 %v7153_v52, %v5613_v49  ;;  %v7057_v4 = vld [vmem:[#allocation7 + $0x9c] sm:$0xf0]  ;;  %v7085_v49 = vld [vmem:[#allocation7 + $0x184] sm:$0xf] }
 0x17e   :  { %v356_v58 = vmul.f32 %v349_v46, %v7758_v13  ;;  %v357_v59 = vmul.f32 %v355_v47, %v7758_v13  ;;  %827 = vmatpush.bf16.msra.mxu0 %v4918_v15  ;;  %v5325_v46 = vld [vmem:[#allocation7 + $0x140] sm:$0xf]  ;;  %v5359_v52 = vld [vmem:[#allocation7 + $0x1a0] sm:$0xf0] }
 0x17f   :  { %v7081_v47 = vld [vmem:[#allocation7 + $0x15c] sm:$0xf0] }
 0x180   :  { %v358_v0 = vadd.f32 1e-05, %v356_v58  ;;  %v359_v1 = vadd.f32 1e-05, %v357_v59  ;;  %853 = vmatpush.bf16.msra.mxu2 %v4922_v17  ;;  %v5326_v48 = vor.u32 %v7081_v47, %v5325_v46  ;;  %v7145_v58 = vld [vmem:[#allocation7 + $0x35c] sm:$0xf0] }
 0x181   :  { %839 = vmatpush.bf16.msra.mxu1 %v5062_v3  ;;  %866 = vmatpush.bf16.msra.mxu3 %v5050_v18  ;;  %v5582_v59 = vor.u32 %v7145_v58, %v5581_v57  ;;  %v5229_v3 = vld [vmem:[#allocation7 + $0x80] sm:$0xf] }
 0x182   :  { %7504 = vrsqrt.f32 %v358_v0  ;;  %vm366_vm13 = vweird.f32 %v358_v0  ;;  %vm376_vm15 = vweird.f32 %v359_v1  ;;  %v5230_v6 = vor.u32 %v7057_v4, %v5229_v3  ;;  %v7217_v7 = vld [vmem:[#allocation7 + $0x59c] sm:$0xf0] }
 0x183   :  { %7506 = vrsqrt.f32 %v359_v1  ;;  %v5870_v8 = vor.u32 %v7217_v7, %v5869_v5  ;;  %v5517_v9 = vld [vmem:[#allocation7 + $0x2c0] sm:$0xf] }
 0x184   :  { %v5518_v12 = vor.u32 %v7129_v10, %v5517_v9  ;;  %v7289_v14 = vld [vmem:[#allocation7 + $0x7dc] sm:$0xf0]  ;;  %v7077_v9 = vld [vmem:[#allocation7 + $0x144] sm:$0xf] }
 0x185   :  { %840 = vmatpush.bf16.msra.mxu1 %v5046_v16  ;;  %v6158_v15 = vor.u32 %v7289_v14, %v6157_v11  ;;  %v5197_v16 = vld [vmem:[#allocation7 + $0x40] sm:$0xf]  ;;  %v5327_v10 = vld [vmem:[#allocation7 + $0x160] sm:$0xf0] }
 0x186   :  { %v7049_v17 = vld [vmem:[#allocation7 + $0x5c] sm:$0xf0] }
 0x187   :  { %v5837_v18 = vld [vmem:[#allocation7 + $0x540] sm:$0xf] }
 0x188   :  { %v7505_v19 = vpop.eup %7504  ;;  %v5773_v47 = vld [vmem:[#allocation7 + $0x4c0] sm:$0xf] }
 0x189   :  { %v7507_v20 = vpop.eup %7506  ;;  %v361_v21 = vmul.f32 %v7505_v19, %v358_v0  ;;  %vm367_vm11 = vweird.f32 %v7505_v19  ;;  %v5549_v0 = vld [vmem:[#allocation7 + $0x300] sm:$0xf] }
 0x18a   :  { %v371_v22 = vmul.f32 %v7507_v20, %v359_v1  ;;  %vm377_vm12 = vweird.f32 %v7507_v20  ;;  %vm368_vm14 = vmor %vm366_vm13, %vm367_vm11  ;;  %v7137_v1 = vld [vmem:[#allocation7 + $0x31c] sm:$0xf0] }
 0x18b   :  { %v362_v23 = vmul.f32 %v7505_v19, %v361_v21  ;;  %vm378_vm0 = vmor %vm376_vm15, %vm377_vm12  ;;  %v5550_v2 = vor.u32 %v7137_v1, %v5549_v0  ;;  %v5421_v57 = vld [vmem:[#allocation7 + $0x200] sm:$0xf] }
 0x18c   :  { %v372_v24 = vmul.f32 %v7507_v20, %v371_v22  ;;  %v5485_v22 = vld [vmem:[#allocation7 + $0x280] sm:$0xf] }
 0x18d   :  { %v363_v25 = vmul.f32 0.5, %v362_v23  ;;  %v7121_v23 = vld [vmem:[#allocation7 + $0x29c] sm:$0xf0] }
 0x18e   :  { %v373_v26 = vmul.f32 0.5, %v372_v24  ;;  %v6125_v24 = vld [vmem:[#allocation7 + $0x780] sm:$0xf] }
 0x18f   :  { %v364_v27 = vsub.f32 1.5, %v363_v25  ;;  %v5486_v25 = vor.u32 %v7121_v23, %v5485_v22  ;;  %v7105_v58 = vld [vmem:[#allocation7 + $0x21c] sm:$0xf0] }
 0x190   :  { %v374_v28 = vsub.f32 1.5, %v373_v26  ;;  %v7281_v26 = vld [vmem:[#allocation7 + $0x79c] sm:$0xf0]  ;;  %v5422_v61 = vor.u32 %v7105_v58, %v5421_v57 }
 0x191   :  { %v365_v29 = vmul.f32 %v7505_v19, %v364_v27  ;;  %v5741_v3 = vld [vmem:[#allocation7 + $0x480] sm:$0xf] }
 0x192   :  { %v375_v30 = vmul.f32 %v7507_v20, %v374_v28  ;;  %v6126_v28 = vor.u32 %v7281_v26, %v6125_v24  ;;  %v7185_v4 = vld [vmem:[#allocation7 + $0x49c] sm:$0xf0] }
 0x193   :  { %v369_v31 = vsel %vm368_vm14, %v7505_v19, %v365_v29  ;;  %v5198_v19 = vor.u32 %v7049_v17, %v5197_v16  ;;  %v5165_v29 = vld [vmem:[#allocation7] sm:$0xf]  ;;  %v7149_v17 = vld [vmem:[#allocation7 + $0x384] sm:$0xf] }
 0x194   :  { %v380_v32 = vmul.f32 %v369_v31, %v7773_v50  ;;  %v379_v33 = vsel %vm378_vm0, %v7507_v20, %v375_v30  ;;  %v5358_v50 = vor.u32 %v7089_v43, %v5357_v42  ;;  %v7209_v20 = vld [vmem:[#allocation7 + $0x55c] sm:$0xf0] }
 0x195   :  { %v381_v34 = vmul.f32 %v379_v33, %v7776_v51  ;;  %v5646_v51 = vor.u32 %v7161_v45, %v5645_v44  ;;  %v5838_v21 = vor.u32 %v7209_v20, %v5837_v18  ;;  %v7041_v30 = vld [vmem:[#allocation7 + $0x1c] sm:$0xf0]  ;;  %v5615_v20 = vld [vmem:[#allocation7 + $0x3a0] sm:$0xf0] }
 0x196   :  { %v382_v35 = vpack.c.bf16 %v380_v32, %v380_v32  ;;  %v5805_v31 = vld [vmem:[#allocation7 + $0x500] sm:$0xf]  ;;  %v5166_v33 = vor.u32 %v7041_v30, %v5165_v29 }
 0x197   :  { %v383_v36 = vpack.c.bf16 %v381_v34, %v381_v34  ;;  %v7201_v34 = vld [vmem:[#allocation7 + $0x51c] sm:$0xf0] }
 0x198   :  { %776 = vmatmul.bf16.vlgmr.msrb.gmra.mxu0 %v382_v35  ;;  %802 = vmatmul.bf16.vlgmr.msrb.gmra.mxu2 %v382_v35  ;;  %v5806_v38 = vor.u32 %v7201_v34, %v5805_v31  ;;  %v5453_v42 = vld [vmem:[#allocation7 + $0x240] sm:$0xf] }
 0x199   :  { %789 = vmatmul.bf16.vlgmr.msrb.gmra.mxu1 %v383_v36  ;;  %815 = vmatmul.bf16.vlgmr.msrb.gmra.mxu3 %v383_v36  ;;  %v7113_v43 = vld [vmem:[#allocation7 + $0x25c] sm:$0xf0] }
 0x19a   :  { %2536 = vmatpush.bf16.msrb.mxu0 %v5390_v41  ;;  %2549 = vmatpush.bf16.msrb.mxu1 %v5646_v51  ;;  %v5454_v44 = vor.u32 %v7113_v43, %v5453_v42  ;;  %v7273_v45 = vld [vmem:[#allocation7 + $0x75c] sm:$0xf0] }
 0x19b   :  { %2562 = vmatpush.bf16.msrb.mxu2 %v5902_v63  ;;  %2575 = vmatpush.bf16.msrb.mxu3 %v6158_v15  ;;  %v6029_v14 = vld [vmem:[#allocation7 + $0x6c0] sm:$0xf] }
 0x19c   :  { %v7257_v16 = vld [vmem:[#allocation7 + $0x6dc] sm:$0xf0] }
 0x19d   :  { %v7177_v22 = vld [vmem:[#allocation7 + $0x45c] sm:$0xf0] }
 0x19e   :  { %2537 = vmatpush.bf16.msrb.mxu0 %v5358_v50  ;;  %2550 = vmatpush.bf16.msrb.mxu1 %v5614_v53  ;;  %v6093_v50 = vld [vmem:[#allocation7 + $0x740] sm:$0xf] }
 0x19f   :  { %2563 = vmatpush.bf16.msrb.mxu2 %v5870_v8  ;;  %2576 = vmatpush.bf16.msrb.mxu3 %v6126_v28  ;;  %v6094_v46 = vor.u32 %v7273_v45, %v6093_v50  ;;  %v5742_v8 = vor.u32 %v7185_v4, %v5741_v3  ;;  %v5295_v28 = vld [vmem:[#allocation7 + $0x120] sm:$0xf0]  ;;  %v5997_v31 = vld [vmem:[#allocation7 + $0x680] sm:$0xf] }
 0x1a0   :  { %v5677_v43 = vld [vmem:[#allocation7 + $0x400] sm:$0xf]  ;;  %v5231_v3 = vld [vmem:[#allocation7 + $0xa0] sm:$0xf0] }
 0x1a1   :  { %v7169_v50 = vld [vmem:[#allocation7 + $0x41c] sm:$0xf0] }
 0x1a2   :  { %2538 = vmatpush.bf16.msrb.mxu0 %v5326_v48  ;;  %2551 = vmatpush.bf16.msrb.mxu1 %v5582_v59  ;;  %v7193_v48 = vld [vmem:[#allocation7 + $0x4dc] sm:$0xf0] }
 0x1a3   :  { %2564 = vmatpush.bf16.msrb.mxu2 %v5838_v21  ;;  %2577 = vmatpush.bf16.msrb.mxu3 %v6094_v46  ;;  %v5774_v55 = vor.u32 %v7193_v48, %v5773_v47  ;;  %v6061_v59 = vld [vmem:[#allocation7 + $0x700] sm:$0xf]  ;;  %v5678_v46 = vor.u32 %v7169_v50, %v5677_v43  ;;  %v7061_v47 = vld [vmem:[#allocation7 + $0xc4] sm:$0xf] }
 0x1a4   :  { %v5709_v21 = vld [vmem:[#allocation7 + $0x440] sm:$0xf]  ;;  %v5263_v48 = vld [vmem:[#allocation7 + $0xe0] sm:$0xf0] }
 0x1a5   :  { %v5710_v26 = vor.u32 %v7177_v22, %v5709_v21  ;;  %v5519_v21 = vld [vmem:[#allocation7 + $0x2e0] sm:$0xf0] }
 0x1a6   :  { %2539 = vmatpush.bf16.msrb.mxu0 %v5294_v56  ;;  %2552 = vmatpush.bf16.msrb.mxu1 %v5550_v2  ;;  %v5362_v56 = vor.u32 %v7085_v49, %v5359_v52  ;;  %v5647_v2 = vld [vmem:[#allocation7 + $0x3e0] sm:$0xf0]  ;;  %v5266_v52 = vor.u32 %v7061_v47, %v5263_v48 }
 0x1a7   :  { %2565 = vmatpush.bf16.msrb.mxu2 %v5806_v38  ;;  %v5650_v7 = vor.u32 %v7157_v40, %v5647_v2  ;;  %v5583_v38 = vld [vmem:[#allocation7 + $0x360] sm:$0xf0] }
 0x1a8   :  { %828 = vmatmul.bf16.vlgmr.msra.gmra.mxu0 %v382_v35  ;;  %854 = vmatmul.bf16.vlgmr.msra.gmra.mxu2 %v382_v35  ;;  %v7093_v35 = vld [vmem:[#allocation7 + $0x1c4] sm:$0xf] }
 0x1a9   :  { %841 = vmatmul.bf16.vlgmr.msra.gmra.mxu1 %v383_v36  ;;  %867 = vmatmul.bf16.vlgmr.msra.gmra.mxu3 %v383_v36  ;;  %v5391_v36 = vld [vmem:[#allocation7 + $0x1e0] sm:$0xf0] }
 0x1aa   :  { %2540 = vmatpush.bf16.msrb.mxu0 %v5262_v62  ;;  %2553 = vmatpush.bf16.msrb.mxu1 %v5518_v12  ;;  %v5394_v41 = vor.u32 %v7093_v35, %v5391_v36  ;;  %v7265_v62 = vld [vmem:[#allocation7 + $0x71c] sm:$0xf0]  ;;  %v5330_v12 = vor.u32 %v7077_v9, %v5327_v10  ;;  %v7053_v2 = vld [vmem:[#allocation7 + $0x84] sm:$0xf] }
 0x1ab   :  { %2566 = vmatpush.bf16.msrb.mxu2 %v5774_v55  ;;  %v6062_v1 = vor.u32 %v7265_v62, %v6061_v59  ;;  %v5903_v55 = vld [vmem:[#allocation7 + $0x5e0] sm:$0xf0]  ;;  %v5933_v9 = vld [vmem:[#allocation7 + $0x600] sm:$0xf] }
 0x1ac   :  { %v7285_v22 = vld [vmem:[#allocation7 + $0x7c4] sm:$0xf] }
 0x1ad   :  { %2578 = vmatpush.bf16.msrb.mxu3 %v6062_v1  ;;  %v5487_v50 = vld [vmem:[#allocation7 + $0x2a0] sm:$0xf0] }
 0x1ae   :  { %2541 = vmatpush.bf16.msrb.mxu0 %v5230_v6  ;;  %2554 = vmatpush.bf16.msrb.mxu1 %v5486_v25  ;;  %v5618_v25 = vor.u32 %v7149_v17, %v5615_v20  ;;  %v7037_v48 = vld [vmem:[#allocation7 + $0x4] sm:$0xf] }
 0x1af   :  { %2567 = vmatpush.bf16.msrb.mxu2 %v5742_v8  ;;  %v5871_v8 = vld [vmem:[#allocation7 + $0x5a0] sm:$0xf0] }
 0x1b2   :  { %2542 = vmatpush.bf16.msrb.mxu0 %v5198_v19  ;;  %2555 = vmatpush.bf16.msrb.mxu1 %v5454_v44  ;;  %v6030_v19 = vor.u32 %v7257_v16, %v6029_v14  ;;  %v7125_v16 = vld [vmem:[#allocation7 + $0x2c4] sm:$0xf] }
 0x1b3   :  { %2568 = vmatpush.bf16.msrb.mxu2 %v5710_v26 }
 0x1b4   :  { %2579 = vmatpush.bf16.msrb.mxu3 %v6030_v19 }
 0x1b6   :  { %2543 = vmatpush.bf16.msrb.mxu0 %v5166_v33  ;;  %2556 = vmatpush.bf16.msrb.mxu1 %v5422_v61  ;;  %v5551_v61 = vld [vmem:[#allocation7 + $0x320] sm:$0xf0] }
 0x1b7   :  { %2569 = vmatpush.bf16.msrb.mxu2 %v5678_v46 }
 0x1ba   :  { %2588 = vmatpush.bf16.msra.mxu0 %v5394_v41  ;;  %2601 = vmatpush.bf16.msra.mxu1 %v5650_v7  ;;  %v7213_v7 = vld [vmem:[#allocation7 + $0x584] sm:$0xf] }
 0x1bb   :  { %v5874_v14 = vor.u32 %v7213_v7, %v5871_v8 }
 0x1be   :  { %2589 = vmatpush.bf16.msra.mxu0 %v5362_v56  ;;  %2602 = vmatpush.bf16.msra.mxu1 %v5618_v25  ;;  %v5965_v56 = vld [vmem:[#allocation7 + $0x640] sm:$0xf] }
 0x1c2   :  { %2590 = vmatpush.bf16.msra.mxu0 %v5330_v12 }
 0x215   :  { %v777_v27 = vpop.f32.mrf.mxu0 }
 0x216   :  { %v790_v32 = vpop.f32.mrf.mxu1 }
 0x217   :  { %v791_v37 = vadd.f32 %v790_v32, %v777_v27  ;;  %v7069_v27 = vld [vmem:[#allocation7 + $0x104] sm:$0xf]  ;;  %v7249_v32 = vld [vmem:[#allocation7 + $0x69c] sm:$0xf0] }
 0x218   :  { %v5298_v30 = vor.u32 %v7069_v27, %v5295_v28  ;;  %v5998_v36 = vor.u32 %v7249_v32, %v5997_v31  ;;  %v5522_v28 = vor.u32 %v7125_v16, %v5519_v21 }
 0x219   :  { %vm872_vm1 = vcmp.gt.f32.partialorder %v791_v37, 0.0  ;;  %v876_v51 = vmul.f32 0.02, %v791_v37 }
 0x21a   :  { %2591 = vmatpush.bf16.msra.mxu0 %v5298_v30  ;;  %2580 = vmatpush.bf16.msrb.mxu3 %v5998_v36  ;;  %v5199_v30 = vld [vmem:[#allocation7 + $0x60] sm:$0xf0] }
 0x21b   :  { %v7786_v53 = vsel %vm872_vm1, %v791_v37, %v876_v51  ;;  %v803_v54 = vpop.f32.mrf.mxu2  ;;  %v7141_v37 = vld [vmem:[#allocation7 + $0x344] sm:$0xf] }
 0x21c   :  { %v884_v60 = vrot.slane %v7786_v53, 4  ;;  %v816_v39 = vpop.f32.mrf.mxu3  ;;  %v5586_v42 = vor.u32 %v7141_v37, %v5583_v38  ;;  %v5839_v38 = vld [vmem:[#allocation7 + $0x560] sm:$0xf0] }
 0x21d   :  { %v817_v63 = vadd.f32 %v816_v39, %v803_v54  ;;  %v779_v0 = vpop.f32.mrf.mxu0  ;;  %v7221_v54 = vld [vmem:[#allocation7 + $0x5c4] sm:$0xf] }
 0x21e   :  { %v885_v5 = vadd.f32 %v884_v60, %v7786_v53  ;;  %v792_v6 = vpop.f32.mrf.mxu1  ;;  %2603 = vmatpush.bf16.msra.mxu1 %v5586_v42  ;;  %v5906_v59 = vor.u32 %v7221_v54, %v5903_v55  ;;  %v7241_v60 = vld [vmem:[#allocation7 + $0x65c] sm:$0xf0]  ;;  %v7133_v39 = vld [vmem:[#allocation7 + $0x304] sm:$0xf]  ;;  %2592 = vmatpush.bf16.msra.mxu0 %v5266_v52 }
 0x21f   :  { %vm873_vm2 = vcmp.gt.f32.partialorder %v817_v63, 0.0  ;;  %v877_v11 = vmul.f32 0.02, %v817_v63  ;;  %v5966_v40 = vor.u32 %v7241_v60, %v5965_v56  ;;  %v5234_v6 = vor.u32 %v7053_v2, %v5231_v3  ;;  %v7269_v2 = vld [vmem:[#allocation7 + $0x744] sm:$0xf] }
 0x220   :  { %v886_v15 = vrot.slane %v885_v5, 2  ;;  %2614 = vmatpush.bf16.msra.mxu2 %v5906_v59  ;;  %v6095_v3 = vld [vmem:[#allocation7 + $0x760] sm:$0xf0] }
 0x221   :  { %v7790_v18 = vsel %vm873_vm2, %v817_v63, %v877_v11  ;;  %v5554_v63 = vor.u32 %v7133_v39, %v5551_v61  ;;  %2581 = vmatpush.bf16.msrb.mxu3 %v5966_v40  ;;  %v7109_v40 = vld [vmem:[#allocation7 + $0x244] sm:$0xf] }
 0x222   :  { %v887_v23 = vadd.f32 %v886_v15, %v885_v5  ;;  %v890_v24 = vrot.slane %v7790_v18, 4  ;;  %v7233_v15 = vld [vmem:[#allocation7 + $0x61c] sm:$0xf0]  ;;  %2593 = vmatpush.bf16.msra.mxu0 %v5234_v6 }
 0x223   :  { %v805_v29 = vpop.f32.mrf.mxu2  ;;  %2604 = vmatpush.bf16.msra.mxu1 %v5554_v63  ;;  %v5934_v20 = vor.u32 %v7233_v15, %v5933_v9  ;;  %v7189_v9 = vld [vmem:[#allocation7 + $0x4c4] sm:$0xf] }
 0x224   :  { %v888_v33 = vrot.slane %v887_v23, 1  ;;  %v891_v34 = vadd.f32 %v890_v24, %v7790_v18  ;;  %v818_v35 = vpop.f32.mrf.mxu3  ;;  %2615 = vmatpush.bf16.msra.mxu2 %v5874_v14  ;;  %v7045_v29 = vld [vmem:[#allocation7 + $0x44] sm:$0xf] }
 0x225   :  { %v829_v41 = vpop.f32.mrf.mxu0  ;;  %2582 = vmatpush.bf16.msrb.mxu3 %v5934_v20  ;;  %v5423_v20 = vld [vmem:[#allocation7 + $0x220] sm:$0xf0] }
 0x226   :  { %v889_v44 = vadd.f32 %v888_v33, %v887_v23  ;;  %v892_v45 = vrot.slane %v891_v34, 2  ;;  %v842_v51 = vpop.f32.mrf.mxu1  ;;  %v6159_v23 = vld [vmem:[#allocation7 + $0x7e0] sm:$0xf0]  ;;  %v5202_v33 = vor.u32 %v7045_v29, %v5199_v30 }
 0x227   :  { %v843_v49 = vadd.f32 %v842_v51, %v829_v41  ;;  %v6162_v32 = vor.u32 %v7285_v22, %v6159_v23  ;;  %2605 = vmatpush.bf16.msra.mxu1 %v5522_v28  ;;  %v7117_v41 = vld [vmem:[#allocation7 + $0x284] sm:$0xf] }
 0x228   :  { %v908_v57 = vmul.f32 %v889_v44, %v7758_v13  ;;  %v893_v58 = vadd.f32 %v892_v45, %v891_v34  ;;  %v7205_v34 = vld [vmem:[#allocation7 + $0x544] sm:$0xf]  ;;  %2594 = vmatpush.bf16.msra.mxu0 %v5202_v33  ;;  %v5490_v54 = vor.u32 %v7117_v41, %v5487_v50 }
 0x229   :  { %vm874_vm3 = vcmp.gt.f32.partialorder %v843_v49, 0.0  ;;  %v878_v62 = vmul.f32 0.02, %v843_v49  ;;  %2627 = vmatpush.bf16.msra.mxu3 %v6162_v32  ;;  %v5842_v43 = vor.u32 %v7205_v34, %v5839_v38  ;;  %v7277_v44 = vld [vmem:[#allocation7 + $0x784] sm:$0xf] }
 0x22a   :  { %v7796_v0 = vsub.f32 %v7786_v53, %v908_v57  ;;  %v894_v1 = vrot.slane %v893_v58, 1  ;;  %v6127_v45 = vld [vmem:[#allocation7 + $0x7a0] sm:$0xf0] }
 0x22b   :  { %v7798_v4 = vsel %vm874_vm3, %v843_v49, %v878_v62  ;;  %v855_v5 = vpop.f32.mrf.mxu2  ;;  %v5167_v49 = vld [vmem:[#allocation7 + $0x20] sm:$0xf0]  ;;  %2616 = vmatpush.bf16.msra.mxu2 %v5842_v43  ;;  %v6130_v55 = vor.u32 %v7277_v44, %v6127_v45  ;;  %2606 = vmatpush.bf16.msra.mxu1 %v5490_v54 }
 0x22c   :  { %v916_v10 = vmul.f32 %v7796_v0, %v7796_v0  ;;  %v895_v11 = vadd.f32 %v894_v1, %v893_v58  ;;  %v896_v12 = vrot.slane %v7798_v4, 4  ;;  %v868_v53 = vpop.f32.mrf.mxu3  ;;  %v5170_v56 = vor.u32 %v7037_v48, %v5167_v49  ;;  %v7197_v57 = vld [vmem:[#allocation7 + $0x504] sm:$0xf] }
 0x22d   :  { %v869_v17 = vadd.f32 %v868_v53, %v855_v5  ;;  %v831_v19 = vpop.f32.mrf.mxu0  ;;  %v5807_v58 = vld [vmem:[#allocation7 + $0x520] sm:$0xf0]  ;;  %2628 = vmatpush.bf16.msra.mxu3 %v6130_v55 }
 0x22e   :  { %v920_v24 = vrot.slane %v916_v10, 4  ;;  %v909_v25 = vmul.f32 %v895_v11, %v7758_v13  ;;  %v897_v26 = vadd.f32 %v896_v12, %v7798_v4  ;;  %v844_v27 = vpop.f32.mrf.mxu1  ;;  %v5810_v63 = vor.u32 %v7197_v57, %v5807_v58  ;;  %v5455_v1 = vld [vmem:[#allocation7 + $0x260] sm:$0xf0]  ;;  %2595 = vmatpush.bf16.msra.mxu0 %v5170_v56 }
 0x22f   :  { %vm875_vm4 = vcmp.gt.f32.partialorder %v869_v17, 0.0  ;;  %v879_v31 = vmul.f32 0.02, %v869_v17  ;;  %v5458_v11 = vor.u32 %v7109_v40, %v5455_v1  ;;  %v6098_v12 = vor.u32 %v7269_v2, %v6095_v3  ;;  %v7101_v19 = vld [vmem:[#allocation7 + $0x204] sm:$0xf] }
 0x230   :  { %v921_v35 = vadd.f32 %v920_v24, %v916_v10  ;;  %v7806_v36 = vsub.f32 %v7790_v18, %v909_v25  ;;  %v898_v37 = vrot.slane %v897_v26, 2  ;;  %v5775_v10 = vld [vmem:[#allocation7 + $0x4e0] sm:$0xf0]  ;;  %2617 = vmatpush.bf16.msra.mxu2 %v5810_v63  ;;  %v5426_v21 = vor.u32 %v7101_v19, %v5423_v20 }
 0x231   :  { %v7808_v42 = vsel %vm875_vm4, %v869_v17, %v879_v31  ;;  %v5778_v53 = vor.u32 %v7189_v9, %v5775_v10  ;;  %2607 = vmatpush.bf16.msra.mxu1 %v5458_v11  ;;  %2629 = vmatpush.bf16.msra.mxu3 %v6098_v12  ;;  %v7261_v22 = vld [vmem:[#allocation7 + $0x704] sm:$0xf] }
 0x232   :  { %v922_v51 = vrot.slane %v921_v35, 2  ;;  %v917_v46 = vmul.f32 %v7806_v36, %v7806_v36  ;;  %v899_v47 = vadd.f32 %v898_v37, %v897_v26  ;;  %v902_v18 = vrot.slane %v7808_v42, 4  ;;  %v6063_v23 = vld [vmem:[#allocation7 + $0x720] sm:$0xf0] }
 0x233   :  { %v857_v52 = vpop.f32.mrf.mxu2  ;;  %v7181_v28 = vld [vmem:[#allocation7 + $0x484] sm:$0xf]  ;;  %v6066_v29 = vor.u32 %v7261_v22, %v6063_v23  ;;  %v7098_v22 = vld [vmem:[#allocation7 + $0x1e4] sm:$0xf0] }
 0x234   :  { %v923_v59 = vadd.f32 %v922_v51, %v921_v35  ;;  %v926_v60 = vrot.slane %v917_v46, 4  ;;  %v900_v39 = vrot.slane %v899_v47, 1  ;;  %v903_v61 = vadd.f32 %v902_v18, %v7808_v42  ;;  %v870_v62 = vpop.f32.mrf.mxu3  ;;  %2618 = vmatpush.bf16.msra.mxu2 %v5778_v53  ;;  %v5743_v30 = vld [vmem:[#allocation7 + $0x4a0] sm:$0xf0] }
 0x235   :  { %v7253_v35 = vld [vmem:[#allocation7 + $0x6c4] sm:$0xf]  ;;  %2608 = vmatpush.bf16.msra.mxu1 %v5426_v21  ;;  %2630 = vmatpush.bf16.msra.mxu3 %v6066_v29  ;;  %v5746_v37 = vor.u32 %v7181_v28, %v5743_v30  ;;  %v5397_v21 = vld [vmem:[#allocation7 + $0x1c8] sm:$0xf] }
 0x236   :  { %v924_v5 = vrot.slane %v923_v59, 1  ;;  %v927_v6 = vadd.f32 %v926_v60, %v917_v46  ;;  %v901_v7 = vadd.f32 %v900_v39, %v899_v47  ;;  %v904_v8 = vrot.slane %v903_v61, 2  ;;  %v6031_v38 = vld [vmem:[#allocation7 + $0x6e0] sm:$0xf0] }
 0x237   :  { %v7173_v43 = vld [vmem:[#allocation7 + $0x444] sm:$0xf]  ;;  %v6034_v45 = vor.u32 %v7253_v35, %v6031_v38  ;;  %v5398_v30 = vor.u32 %v7098_v22, %v5397_v21  ;;  %v5653_v38 = vld [vmem:[#allocation7 + $0x3c8] sm:$0xf] }
 0x238   :  { %v925_v14 = vadd.f32 %v924_v5, %v923_v59  ;;  %v928_v15 = vrot.slane %v927_v6, 2  ;;  %v910_v16 = vmul.f32 %v901_v7, %v7758_v13  ;;  %v905_v17 = vadd.f32 %v904_v8, %v903_v61  ;;  %v5711_v50 = vld [vmem:[#allocation7 + $0x460] sm:$0xf0]  ;;  %2619 = vmatpush.bf16.msra.mxu2 %v5746_v37  ;;  %v7130_v21 = vld [vmem:[#allocation7 + $0x2e4] sm:$0xf0] }
 0x239   :  { %v5714_v51 = vor.u32 %v7173_v43, %v5711_v50  ;;  %v7245_v18 = vld [vmem:[#allocation7 + $0x684] sm:$0xf]  ;;  %2631 = vmatpush.bf16.msra.mxu3 %v6034_v45  ;;  %v7082_v45 = vld [vmem:[#allocation7 + $0x164] sm:$0xf0] }
 0x23a   :  { %v944_v24 = vmul.f32 %v925_v14, %v7758_v13  ;;  %v929_v25 = vadd.f32 %v928_v15, %v927_v6  ;;  %v7817_v26 = vsub.f32 %v7798_v4, %v910_v16  ;;  %v906_v27 = vrot.slane %v905_v17, 1  ;;  %v5999_v48 = vld [vmem:[#allocation7 + $0x6a0] sm:$0xf0]  ;;  %v6165_v22 = vld [vmem:[#allocation7 + $0x7c8] sm:$0xf] }
 0x23b   :  { %v6002_v52 = vor.u32 %v7245_v18, %v5999_v48  ;;  %v7165_v56 = vld [vmem:[#allocation7 + $0x404] sm:$0xf]  ;;  %v5621_v18 = vld [vmem:[#allocation7 + $0x388] sm:$0xf] }
 0x23c   :  { %v7819_v31 = vadd.f32 1e-05, %v944_v24  ;;  %v930_v32 = vrot.slane %v929_v25, 1  ;;  %v918_v33 = vmul.f32 %v7817_v26, %v7817_v26  ;;  %v907_v34 = vadd.f32 %v906_v27, %v905_v17  ;;  %2620 = vmatpush.bf16.msra.mxu2 %v5714_v51  ;;  %v5679_v58 = vld [vmem:[#allocation7 + $0x420] sm:$0xf0] }
 0x23d   :  { %v5682_v39 = vor.u32 %v7165_v56, %v5679_v58  ;;  %v7237_v61 = vld [vmem:[#allocation7 + $0x644] sm:$0xf]  ;;  %2632 = vmatpush.bf16.msra.mxu3 %v6002_v52  ;;  %v7154_v48 = vld [vmem:[#allocation7 + $0x3a4] sm:$0xf0] }
 0x23e   :  { %7508 = vrsqrt.f32 %v7819_v31  ;;  %v931_v4 = vadd.f32 %v930_v32, %v929_v25  ;;  %v932_v41 = vrot.slane %v918_v33, 4  ;;  %v911_v44 = vmul.f32 %v907_v34, %v7758_v13  ;;  %v7229_v6 = vld [vmem:[#allocation7 + $0x604] sm:$0xf]  ;;  %v7074_v56 = vld [vmem:[#allocation7 + $0x124] sm:$0xf0] }
 0x23f   :  { %v5935_v7 = vld [vmem:[#allocation7 + $0x620] sm:$0xf0]  ;;  %vm958_vm6 = vweird.f32 %v7819_v31 }
 0x240   :  { %v945_v46 = vmul.f32 %v931_v4, %v7758_v13  ;;  %v933_v47 = vadd.f32 %v932_v41, %v918_v33  ;;  %v7827_v49 = vsub.f32 %v7808_v42, %v911_v44  ;;  %v5967_v42 = vld [vmem:[#allocation7 + $0x660] sm:$0xf0]  ;;  %2621 = vmatpush.bf16.msra.mxu2 %v5682_v39  ;;  %v5938_v10 = vor.u32 %v7229_v6, %v5935_v7  ;;  %v7090_v33 = vld [vmem:[#allocation7 + $0x1a4] sm:$0xf0] }
 0x241   :  { %v5970_v1 = vor.u32 %v7237_v61, %v5967_v42  ;;  %v7162_v4 = vld [vmem:[#allocation7 + $0x3e4] sm:$0xf0] }
 0x242   :  { %v949_v54 = vadd.f32 1e-05, %v945_v46  ;;  %v934_v55 = vrot.slane %v933_v47, 2  ;;  %v919_v57 = vmul.f32 %v7827_v49, %v7827_v49  ;;  %v5333_v44 = vld [vmem:[#allocation7 + $0x148] sm:$0xf]  ;;  %v5654_v46 = vor.u32 %v7162_v4, %v5653_v38 }
 0x243   :  { %2633 = vmatpush.bf16.msra.mxu3 %v5970_v1  ;;  %v7146_v39 = vld [vmem:[#allocation7 + $0x364] sm:$0xf0] }
 0x244   :  { %v7509_v59 = vpop.eup %7508  ;;  %7510 = vrsqrt.f32 %v949_v54  ;;  %v935_v60 = vadd.f32 %v934_v55, %v933_v47  ;;  %v938_v40 = vrot.slane %v919_v57, 4  ;;  %vm968_vm9 = vweird.f32 %v949_v54  ;;  %v5301_v55 = vld [vmem:[#allocation7 + $0x108] sm:$0xf] }
 0x245   :  { %v953_v62 = vmul.f32 %v7509_v59, %v7819_v31  ;;  %vm959_vm5 = vweird.f32 %v7509_v59  ;;  %v5365_v31 = vld [vmem:[#allocation7 + $0x188] sm:$0xf] }
 0x246   :  { %v936_v63 = vrot.slane %v935_v60, 1  ;;  %v939_v3 = vadd.f32 %v938_v40, %v919_v57  ;;  %vm960_vm7 = vmor %vm958_vm6, %vm959_vm5  ;;  %v5366_v43 = vor.u32 %v7090_v33, %v5365_v31  ;;  %v5269_v40 = vld [vmem:[#allocation7 + $0xc8] sm:$0xf] }
 0x247   :  { %v954_v2 = vmul.f32 %v7509_v59, %v953_v62  ;;  %2634 = vmatpush.bf16.msra.mxu3 %v5938_v10  ;;  %v5302_v62 = vor.u32 %v7074_v56, %v5301_v55  ;;  %v7066_v42 = vld [vmem:[#allocation7 + $0xe4] sm:$0xf0] }
 0x248   :  { %v937_v5 = vadd.f32 %v936_v63, %v935_v60  ;;  %v940_v9 = vrot.slane %v939_v3, 2  ;;  %v5589_v60 = vld [vmem:[#allocation7 + $0x348] sm:$0xf]  ;;  %v5270_v10 = vor.u32 %v7066_v42, %v5269_v40  ;;  %v5367_v40 = vld [vmem:[#allocation7 + $0x1a8] sm:$0xf0] }
 0x249   :  { %v955_v8 = vmul.f32 0.5, %v954_v2  ;;  %v5909_v1 = vld [vmem:[#allocation7 + $0x5c8] sm:$0xf] }
 0x24a   :  { %v7511_v11 = vpop.eup %7510  ;;  %v946_v12 = vmul.f32 %v937_v5, %v7758_v13  ;;  %v941_v15 = vadd.f32 %v940_v9, %v939_v3  ;;  %v7226_v2 = vld [vmem:[#allocation7 + $0x5e4] sm:$0xf0]  ;;  %v5590_v5 = vor.u32 %v7146_v39, %v5589_v60 }
 0x24b   :  { %v956_v53 = vsub.f32 1.5, %v955_v8  ;;  %v963_v14 = vmul.f32 %v7511_v11, %v949_v54  ;;  %vm969_vm8 = vweird.f32 %v7511_v11  ;;  %v5334_v54 = vor.u32 %v7082_v45, %v5333_v44  ;;  %v5557_v8 = vld [vmem:[#allocation7 + $0x308] sm:$0xf] }
 0x24c   :  { %v950_v16 = vadd.f32 1e-05, %v946_v12  ;;  %v942_v20 = vrot.slane %v941_v15, 1  ;;  %vm970_vm10 = vmor %vm968_vm9, %vm969_vm8  ;;  %v7138_v9 = vld [vmem:[#allocation7 + $0x324] sm:$0xf0] }
 0x24d   :  { %v957_v17 = vmul.f32 %v7509_v59, %v956_v53  ;;  %v964_v19 = vmul.f32 %v7511_v11, %v963_v14  ;;  %v5237_v12 = vld [vmem:[#allocation7 + $0x88] sm:$0xf] }
 0x24e   :  { %7512 = vrsqrt.f32 %v950_v16  ;;  %v943_v25 = vadd.f32 %v942_v20, %v941_v15  ;;  %vm978_vm12 = vweird.f32 %v950_v16  ;;  %v7058_v53 = vld [vmem:[#allocation7 + $0xa4] sm:$0xf0] }
 0x24f   :  { %v961_v23 = vsel %vm960_vm7, %v7509_v59, %v957_v17  ;;  %v965_v24 = vmul.f32 0.5, %v964_v19  ;;  %v7218_v17 = vld [vmem:[#allocation7 + $0x5a4] sm:$0xf0]  ;;  %v5558_v19 = vor.u32 %v7138_v9, %v5557_v8 }
 0x250   :  { %v992_v27 = vmul.f32 %v961_v23, %v7796_v0  ;;  %v947_v29 = vmul.f32 %v943_v25, %v7758_v13  ;;  %v5238_v23 = vor.u32 %v7058_v53, %v5237_v12  ;;  %v7290_v25 = vld [vmem:[#allocation7 + $0x7e4] sm:$0xf0]  ;;  %v7078_v12 = vld [vmem:[#allocation7 + $0x14c] sm:$0xf] }
 0x251   :  { %v966_v28 = vsub.f32 1.5, %v965_v24  ;;  %v7210_v31 = vld [vmem:[#allocation7 + $0x564] sm:$0xf0]  ;;  %v5335_v53 = vld [vmem:[#allocation7 + $0x168] sm:$0xf0] }
 0x252   :  { %v7836_v32 = vpack.c.bf16 %v992_v27, %v992_v27  ;;  %v7838_v35 = vadd.f32 1e-05, %v947_v29  ;;  %v5205_v27 = vld [vmem:[#allocation7 + $0x48] sm:$0xf] }
 0x253   :  { %v967_v34 = vmul.f32 %v7511_v11, %v966_v28  ;;  %v7050_v29 = vld [vmem:[#allocation7 + $0x64] sm:$0xf0] }
 0x254   :  { %v7513_v37 = vpop.eup %7512  ;;  %2544 = vmatmul.bf16.vlgmr.msrb.gmra.mxu0 %v7836_v32  ;;  %7514 = vrsqrt.f32 %v7838_v35  ;;  %vm988_vm15 = vweird.f32 %v7838_v35  ;;  %v7122_v38 = vld [vmem:[#allocation7 + $0x2a4] sm:$0xf0] }
 0x255   :  { %v971_v0 = vsel %vm970_vm10, %v7511_v11, %v967_v34  ;;  %v973_v41 = vmul.f32 %v7513_v37, %v950_v16  ;;  %2640 = vmatpush.bf16.msrb.mxu0 %v5398_v30  ;;  %vm979_vm11 = vweird.f32 %v7513_v37  ;;  %v5910_v11 = vor.u32 %v7226_v2, %v5909_v1  ;;  %v5877_v16 = vld [vmem:[#allocation7 + $0x588] sm:$0xf] }
 0x256   :  { %v993_v50 = vmul.f32 %v971_v0, %v7806_v36  ;;  %v5622_v36 = vor.u32 %v7154_v48, %v5621_v18  ;;  %vm980_vm13 = vmor %vm978_vm12, %vm979_vm11  ;;  %v5878_v24 = vor.u32 %v7218_v17, %v5877_v16  ;;  %v5845_v30 = vld [vmem:[#allocation7 + $0x548] sm:$0xf]  ;;  %v5206_v0 = vor.u32 %v7050_v29, %v5205_v27  ;;  %v7094_v18 = vld [vmem:[#allocation7 + $0x1cc] sm:$0xf] }
 0x257   :  { %v974_v51 = vmul.f32 %v7513_v37, %v973_v41  ;;  %v5846_v41 = vor.u32 %v7210_v31, %v5845_v30  ;;  %v5173_v44 = vld [vmem:[#allocation7 + $0x8] sm:$0xf]  ;;  %v5399_v48 = vld [vmem:[#allocation7 + $0x1e8] sm:$0xf0] }
 0x258   :  { %v7843_v47 = vpack.c.bf16 %v993_v50, %v993_v50  ;;  %v7282_v50 = vld [vmem:[#allocation7 + $0x7a4] sm:$0xf0]  ;;  %v5303_v27 = vld [vmem:[#allocation7 + $0x128] sm:$0xf0] }
 0x259   :  { %v975_v52 = vmul.f32 0.5, %v974_v51  ;;  %2641 = vmatpush.bf16.msrb.mxu0 %v5366_v43  ;;  %v6133_v43 = vld [vmem:[#allocation7 + $0x788] sm:$0xf] }
 0x25a   :  { %2557 = vmatmul.bf16.vlgmr.msrb.gmra.mxu1 %v7843_v47  ;;  %v7515_v57 = vpop.eup %7514  ;;  %v7042_v45 = vld [vmem:[#allocation7 + $0x24] sm:$0xf0] }
 0x25b   :  { %v976_v58 = vsub.f32 1.5, %v975_v52  ;;  %2653 = vmatpush.bf16.msrb.mxu1 %v5654_v46  ;;  %v983_v59 = vmul.f32 %v7515_v57, %v7838_v35  ;;  %vm989_vm14 = vweird.f32 %v7515_v57  ;;  %v6166_v35 = vor.u32 %v7290_v25, %v6165_v22  ;;  %v5813_v51 = vld [vmem:[#allocation7 + $0x508] sm:$0xf]  ;;  %v7070_v25 = vld [vmem:[#allocation7 + $0x10c] sm:$0xf] }
 0x25c   :  { %vm990_vm0 = vmor %vm988_vm15, %vm989_vm14  ;;  %v7202_v46 = vld [vmem:[#allocation7 + $0x524] sm:$0xf0]  ;;  %v6134_v52 = vor.u32 %v7282_v50, %v6133_v43  ;;  %v5174_v56 = vor.u32 %v7042_v45, %v5173_v44  ;;  %v5338_v22 = vor.u32 %v7078_v12, %v5335_v53  ;;  %v5271_v43 = vld [vmem:[#allocation7 + $0xe8] sm:$0xf0] }
 0x25d   :  { %v977_v61 = vmul.f32 %v7513_v37, %v976_v58  ;;  %2642 = vmatpush.bf16.msrb.mxu0 %v5334_v54  ;;  %v984_v63 = vmul.f32 %v7515_v57, %v983_v59  ;;  %v5461_v54 = vld [vmem:[#allocation7 + $0x248] sm:$0xf]  ;;  %v5402_v59 = vor.u32 %v7094_v18, %v5399_v48  ;;  %v7222_v50 = vld [vmem:[#allocation7 + $0x5cc] sm:$0xf] }
 0x25e   :  { %v7114_v55 = vld [vmem:[#allocation7 + $0x264] sm:$0xf0]  ;;  %v5911_v44 = vld [vmem:[#allocation7 + $0x5e8] sm:$0xf0] }
 0x25f   :  { %v981_v3 = vsel %vm980_vm13, %v7513_v37, %v977_v61  ;;  %2654 = vmatpush.bf16.msrb.mxu1 %v5622_v36  ;;  %v985_v7 = vmul.f32 0.5, %v984_v63  ;;  %v5493_v37 = vld [vmem:[#allocation7 + $0x288] sm:$0xf]  ;;  %v5462_v61 = vor.u32 %v7114_v55, %v5461_v54  ;;  %v7134_v48 = vld [vmem:[#allocation7 + $0x30c] sm:$0xf]  ;;  %v5914_v55 = vor.u32 %v7222_v50, %v5911_v44 }
 0x260   :  { %v994_v6 = vmul.f32 %v981_v3, %v7817_v26  ;;  %v5525_v26 = vld [vmem:[#allocation7 + $0x2c8] sm:$0xf]  ;;  %v5495_v12 = vld [vmem:[#allocation7 + $0x2a8] sm:$0xf0] }
 0x261   :  { %2643 = vmatpush.bf16.msrb.mxu0 %v5302_v62  ;;  %v986_v15 = vsub.f32 1.5, %v985_v7  ;;  %v5526_v34 = vor.u32 %v7130_v21, %v5525_v26  ;;  %v6101_v58 = vld [vmem:[#allocation7 + $0x748] sm:$0xf]  ;;  %v7086_v62 = vld [vmem:[#allocation7 + $0x18c] sm:$0xf] }
 0x262   :  { %v7848_v14 = vpack.c.bf16 %v994_v6, %v994_v6  ;;  %v7274_v36 = vld [vmem:[#allocation7 + $0x764] sm:$0xf0]  ;;  %v7158_v6 = vld [vmem:[#allocation7 + $0x3cc] sm:$0xf]  ;;  %v5370_v8 = vor.u32 %v7086_v62, %v5367_v40 }
 0x263   :  { %2655 = vmatpush.bf16.msrb.mxu1 %v5590_v5  ;;  %v987_v20 = vmul.f32 %v7515_v57, %v986_v15  ;;  %v5781_v60 = vld [vmem:[#allocation7 + $0x4c8] sm:$0xf]  ;;  %v6102_v42 = vor.u32 %v7274_v36, %v6101_v58  ;;  %v5655_v7 = vld [vmem:[#allocation7 + $0x3e8] sm:$0xf0] }
 0x264   :  { %2570 = vmatmul.bf16.vlgmr.msrb.gmra.mxu2 %v7848_v14  ;;  %2596 = vmatmul.bf16.vlgmr.msra.gmra.mxu0 %v7836_v32  ;;  %v7194_v39 = vld [vmem:[#allocation7 + $0x4e4] sm:$0xf0]  ;;  %v5658_v16 = vor.u32 %v7158_v6, %v5655_v7  ;;  %v7150_v26 = vld [vmem:[#allocation7 + $0x38c] sm:$0xf] }
 0x265   :  { %2644 = vmatpush.bf16.msrb.mxu0 %v5270_v10  ;;  %2666 = vmatpush.bf16.msrb.mxu2 %v5910_v11  ;;  %v991_v28 = vsel %vm990_vm0, %v7515_v57, %v987_v20  ;;  %v5814_v57 = vor.u32 %v7202_v46, %v5813_v51  ;;  %v5429_v63 = vld [vmem:[#allocation7 + $0x208] sm:$0xf]  ;;  %v5782_v3 = vor.u32 %v7194_v39, %v5781_v60  ;;  %v5623_v21 = vld [vmem:[#allocation7 + $0x3a8] sm:$0xf0] }
 0x266   :  { %v995_v33 = vmul.f32 %v991_v28, %v7827_v49  ;;  %v5494_v49 = vor.u32 %v7122_v38, %v5493_v37  ;;  %v7106_v1 = vld [vmem:[#allocation7 + $0x224] sm:$0xf0]  ;;  %v5626_v29 = vor.u32 %v7150_v26, %v5623_v21  ;;  %v5306_v37 = vor.u32 %v7070_v25, %v5303_v27  ;;  %v7214_v58 = vld [vmem:[#allocation7 + $0x58c] sm:$0xf] }
 0x267   :  { %2656 = vmatpush.bf16.msrb.mxu1 %v5558_v19  ;;  %v6069_v2 = vld [vmem:[#allocation7 + $0x708] sm:$0xf]  ;;  %v5430_v11 = vor.u32 %v7106_v1, %v5429_v63  ;;  %v5879_v36 = vld [vmem:[#allocation7 + $0x5a8] sm:$0xf0] }
 0x268   :  { %v7854_v4 = vpack.c.bf16 %v995_v33, %v995_v33  ;;  %v7266_v5 = vld [vmem:[#allocation7 + $0x724] sm:$0xf0]  ;;  %v7126_v62 = vld [vmem:[#allocation7 + $0x2cc] sm:$0xf]  ;;  %v5882_v63 = vor.u32 %v7214_v58, %v5879_v36 }
 0x269   :  { %2645 = vmatpush.bf16.msrb.mxu0 %v5238_v23  ;;  %2667 = vmatpush.bf16.msrb.mxu2 %v5878_v24  ;;  %v5749_v9 = vld [vmem:[#allocation7 + $0x488] sm:$0xf]  ;;  %v6070_v15 = vor.u32 %v7266_v5, %v6069_v2  ;;  %v5527_v40 = vld [vmem:[#allocation7 + $0x2e8] sm:$0xf0] }
 0x26a   :  { %2609 = vmatmul.bf16.vlgmr.msra.gmra.mxu1 %v7843_v47  ;;  %2583 = vmatmul.bf16.vlgmr.msrb.gmra.mxu3 %v7854_v4  ;;  %v7186_v10 = vld [vmem:[#allocation7 + $0x4a4] sm:$0xf0]  ;;  %v7286_v1 = vld [vmem:[#allocation7 + $0x7cc] sm:$0xf] }
 0x26b   :  { %2657 = vmatpush.bf16.msrb.mxu1 %v5526_v34  ;;  %2679 = vmatpush.bf16.msrb.mxu3 %v6166_v35  ;;  %v6037_v17 = vld [vmem:[#allocation7 + $0x6c8] sm:$0xf]  ;;  %v5750_v19 = vor.u32 %v7186_v10, %v5749_v9  ;;  %v7142_v34 = vld [vmem:[#allocation7 + $0x34c] sm:$0xf]  ;;  %v5530_v9 = vor.u32 %v7126_v62, %v5527_v40  ;;  %v7155_v62 = vld [vmem:[#allocation7 + $0x3ac] sm:$0xf0] }
 0x26c   :  { %v7258_v20 = vld [vmem:[#allocation7 + $0x6e4] sm:$0xf0]  ;;  %v5591_v35 = vld [vmem:[#allocation7 + $0x368] sm:$0xf0] }
 0x26d   :  { %2646 = vmatpush.bf16.msrb.mxu0 %v5206_v0  ;;  %2668 = vmatpush.bf16.msrb.mxu2 %v5846_v41  ;;  %v5717_v23 = vld [vmem:[#allocation7 + $0x448] sm:$0xf]  ;;  %v6038_v28 = vor.u32 %v7258_v20, %v6037_v17  ;;  %v7062_v41 = vld [vmem:[#allocation7 + $0xcc] sm:$0xf]  ;;  %v5594_v51 = vor.u32 %v7142_v34, %v5591_v35 }
 0x26e   :  { %v7178_v24 = vld [vmem:[#allocation7 + $0x464] sm:$0xf0]  ;;  %v5274_v54 = vor.u32 %v7062_v41, %v5271_v43  ;;  %v6167_v2 = vld [vmem:[#allocation7 + $0x7e8] sm:$0xf0]  ;;  %v7091_v41 = vld [vmem:[#allocation7 + $0x1ac] sm:$0xf0] }
 0x26f   :  { %2658 = vmatpush.bf16.msrb.mxu1 %v5494_v49  ;;  %2680 = vmatpush.bf16.msrb.mxu3 %v6134_v52  ;;  %v6005_v30 = vld [vmem:[#allocation7 + $0x688] sm:$0xf]  ;;  %v5718_v31 = vor.u32 %v7178_v24, %v5717_v23  ;;  %v5559_v52 = vld [vmem:[#allocation7 + $0x328] sm:$0xf0]  ;;  %v6170_v10 = vor.u32 %v7286_v1, %v6167_v2  ;;  %v5405_v23 = vld [vmem:[#allocation7 + $0x1d0] sm:$0xf] }
 0x270   :  { %v7250_v33 = vld [vmem:[#allocation7 + $0x6a4] sm:$0xf0]  ;;  %v5562_v60 = vor.u32 %v7134_v48, %v5559_v52  ;;  %v5207_v5 = vld [vmem:[#allocation7 + $0x68] sm:$0xf0]  ;;  %v7099_v24 = vld [vmem:[#allocation7 + $0x1ec] sm:$0xf0] }
 0x271   :  { %2647 = vmatpush.bf16.msrb.mxu0 %v5174_v56  ;;  %2669 = vmatpush.bf16.msrb.mxu2 %v5814_v57  ;;  %v5685_v38 = vld [vmem:[#allocation7 + $0x408] sm:$0xf]  ;;  %v6006_v45 = vor.u32 %v7250_v33, %v6005_v30  ;;  %v7054_v56 = vld [vmem:[#allocation7 + $0x8c] sm:$0xf]  ;;  %v5406_v34 = vor.u32 %v7099_v24, %v5405_v23  ;;  %v5309_v1 = vld [vmem:[#allocation7 + $0x110] sm:$0xf] }
 0x272   :  { %v7170_v0 = vld [vmem:[#allocation7 + $0x424] sm:$0xf0]  ;;  %v5239_v57 = vld [vmem:[#allocation7 + $0xa8] sm:$0xf0]  ;;  %v7075_v2 = vld [vmem:[#allocation7 + $0x12c] sm:$0xf0] }
 0x273   :  { %2659 = vmatpush.bf16.msrb.mxu1 %v5462_v61  ;;  %2681 = vmatpush.bf16.msrb.mxu3 %v6102_v42  ;;  %v5973_v46 = vld [vmem:[#allocation7 + $0x648] sm:$0xf]  ;;  %v5686_v49 = vor.u32 %v7170_v0, %v5685_v38  ;;  %v5242_v42 = vor.u32 %v7054_v56, %v5239_v57  ;;  %v7206_v6 = vld [vmem:[#allocation7 + $0x54c] sm:$0xf]  ;;  %v5373_v0 = vld [vmem:[#allocation7 + $0x190] sm:$0xf] }
 0x274   :  { %2622 = vmatmul.bf16.vlgmr.msra.gmra.mxu2 %v7848_v14  ;;  %2648 = vmatmul.bf16.vlgmr.msrb.gmra.mxu0 %v7836_v32  ;;  %v7242_v18 = vld [vmem:[#allocation7 + $0x664] sm:$0xf0]  ;;  %v5847_v7 = vld [vmem:[#allocation7 + $0x568] sm:$0xf0]  ;;  %v5374_v48 = vor.u32 %v7091_v41, %v5373_v0  ;;  %v5341_v56 = vld [vmem:[#allocation7 + $0x150] sm:$0xf] }
 0x275   :  { %2692 = vmatpush.bf16.msra.mxu0 %v5402_v59  ;;  %2670 = vmatpush.bf16.msrb.mxu2 %v5782_v3  ;;  %v5974_v59 = vor.u32 %v7242_v18, %v5973_v46  ;;  %v5941_v39 = vld [vmem:[#allocation7 + $0x608] sm:$0xf]  ;;  %v7046_v3 = vld [vmem:[#allocation7 + $0x4c] sm:$0xf]  ;;  %v7163_v18 = vld [vmem:[#allocation7 + $0x3ec] sm:$0xf0] }
 0x276   :  { %v7234_v61 = vld [vmem:[#allocation7 + $0x624] sm:$0xf0]  ;;  %v5210_v53 = vor.u32 %v7046_v3, %v5207_v5  ;;  %v6135_v17 = vld [vmem:[#allocation7 + $0x7a8] sm:$0xf0]  ;;  %v7083_v57 = vld [vmem:[#allocation7 + $0x16c] sm:$0xf0] }
 0x277   :  { %2660 = vmatpush.bf16.msrb.mxu1 %v5430_v11  ;;  %2682 = vmatpush.bf16.msrb.mxu3 %v6070_v15  ;;  %v7118_v11 = vld [vmem:[#allocation7 + $0x28c] sm:$0xf]  ;;  %v5850_v15 = vor.u32 %v7206_v6, %v5847_v7  ;;  %v5342_v40 = vor.u32 %v7083_v57, %v5341_v56  ;;  %v5533_v0 = vld [vmem:[#allocation7 + $0x2d0] sm:$0xf] }
 0x278   :  { %v5175_v20 = vld [vmem:[#allocation7 + $0x28] sm:$0xf0]  ;;  %v7131_v41 = vld [vmem:[#allocation7 + $0x2ec] sm:$0xf0] }
 0x279   :  { %2693 = vmatpush.bf16.msra.mxu0 %v5370_v8  ;;  %2671 = vmatpush.bf16.msrb.mxu2 %v5750_v19  ;;  %v5942_v8 = vor.u32 %v7234_v61, %v5941_v39  ;;  %v7038_v19 = vld [vmem:[#allocation7 + $0xc] sm:$0xf]  ;;  %v5629_v61 = vld [vmem:[#allocation7 + $0x390] sm:$0xf] }
 0x27a   :  { %2661 = vmatmul.bf16.vlgmr.msrb.gmra.mxu1 %v7843_v47  ;;  %2635 = vmatmul.bf16.vlgmr.msra.gmra.mxu3 %v7854_v4  ;;  %v7198_v26 = vld [vmem:[#allocation7 + $0x50c] sm:$0xf]  ;;  %v5630_v5 = vor.u32 %v7155_v62, %v5629_v61  ;;  %v7123_v56 = vld [vmem:[#allocation7 + $0x2ac] sm:$0xf0] }
 0x27b   :  { %2705 = vmatpush.bf16.msra.mxu1 %v5658_v16  ;;  %2683 = vmatpush.bf16.msrb.mxu3 %v6038_v28  ;;  %v7278_v16 = vld [vmem:[#allocation7 + $0x78c] sm:$0xf]  ;;  %v5821_v61 = vld [vmem:[#allocation7 + $0x510] sm:$0xf] }
 0x27c   :  { %v5815_v21 = vld [vmem:[#allocation7 + $0x528] sm:$0xf0]  ;;  %v6138_v25 = vor.u32 %v7278_v16, %v6135_v17  ;;  %v7067_v16 = vld [vmem:[#allocation7 + $0xec] sm:$0xf0] }
 0x27d   :  { %2694 = vmatpush.bf16.msra.mxu0 %v5338_v22  ;;  %2672 = vmatpush.bf16.msrb.mxu2 %v5718_v31  ;;  %v5498_v22 = vor.u32 %v7118_v11, %v5495_v12  ;;  %v7110_v27 = vld [vmem:[#allocation7 + $0x24c] sm:$0xf]  ;;  %v5818_v30 = vor.u32 %v7198_v26, %v5815_v21  ;;  %v5310_v11 = vor.u32 %v7075_v2, %v5309_v1  ;;  %v5917_v17 = vld [vmem:[#allocation7 + $0x5d0] sm:$0xf] }
 0x27e   :  { %v5463_v28 = vld [vmem:[#allocation7 + $0x268] sm:$0xf0]  ;;  %v7203_v62 = vld [vmem:[#allocation7 + $0x52c] sm:$0xf0] }
 0x27f   :  { %2706 = vmatpush.bf16.msra.mxu1 %v5626_v29  ;;  %2684 = vmatpush.bf16.msrb.mxu3 %v6006_v45  ;;  %v5178_v29 = vor.u32 %v7038_v19, %v5175_v20  ;;  %v7270_v31 = vld [vmem:[#allocation7 + $0x74c] sm:$0xf]  ;;  %v5466_v38 = vor.u32 %v7110_v27, %v5463_v28  ;;  %v7227_v19 = vld [vmem:[#allocation7 + $0x5ec] sm:$0xf0] }
 0x280   :  { %v6103_v33 = vld [vmem:[#allocation7 + $0x768] sm:$0xf0]  ;;  %v5565_v27 = vld [vmem:[#allocation7 + $0x310] sm:$0xf] }
 0x281   :  { %2695 = vmatpush.bf16.msra.mxu0 %v5306_v37  ;;  %2673 = vmatpush.bf16.msrb.mxu2 %v5686_v49  ;;  %v7190_v35 = vld [vmem:[#allocation7 + $0x4cc] sm:$0xf]  ;;  %v6106_v43 = vor.u32 %v7270_v31, %v6103_v33  ;;  %v5661_v49 = vld [vmem:[#allocation7 + $0x3d0] sm:$0xf] }
 0x282   :  { %v5783_v37 = vld [vmem:[#allocation7 + $0x4e8] sm:$0xf0]  ;;  %v5662_v36 = vor.u32 %v7163_v18, %v5661_v49  ;;  %v7139_v28 = vld [vmem:[#allocation7 + $0x32c] sm:$0xf0] }
 0x283   :  { %2707 = vmatpush.bf16.msra.mxu1 %v5594_v51  ;;  %2685 = vmatpush.bf16.msrb.mxu3 %v5974_v59  ;;  %v7102_v50 = vld [vmem:[#allocation7 + $0x20c] sm:$0xf]  ;;  %v5786_v51 = vor.u32 %v7190_v35, %v5783_v37  ;;  %v5885_v31 = vld [vmem:[#allocation7 + $0x590] sm:$0xf]  ;;  %v5566_v37 = vor.u32 %v7139_v28, %v5565_v27  ;;  %v7079_v28 = vld [vmem:[#allocation7 + $0x154] sm:$0xf] }
 0x284   :  { %2674 = vmatmul.bf16.vlgmr.msrb.gmra.mxu2 %v7848_v14  ;;  %v5431_v44 = vld [vmem:[#allocation7 + $0x228] sm:$0xf0]  ;;  %v7219_v33 = vld [vmem:[#allocation7 + $0x5ac] sm:$0xf0] }
 0x285   :  { %2696 = vmatpush.bf16.msra.mxu0 %v5274_v54  ;;  %2718 = vmatpush.bf16.msra.mxu2 %v5914_v55  ;;  %v7262_v45 = vld [vmem:[#allocation7 + $0x70c] sm:$0xf]  ;;  %v5434_v55 = vor.u32 %v7102_v50, %v5431_v44  ;;  %v5886_v50 = vor.u32 %v7219_v33, %v5885_v31  ;;  %v6173_v44 = vld [vmem:[#allocation7 + $0x7d0] sm:$0xf] }
 0x286   :  { %v6071_v46 = vld [vmem:[#allocation7 + $0x728] sm:$0xf0]  ;;  %v5853_v49 = vld [vmem:[#allocation7 + $0x550] sm:$0xf] }
 0x287   :  { %2708 = vmatpush.bf16.msra.mxu1 %v5562_v60  ;;  %2686 = vmatpush.bf16.msrb.mxu3 %v5942_v8  ;;  %v7182_v52 = vld [vmem:[#allocation7 + $0x48c] sm:$0xf]  ;;  %v6074_v58 = vor.u32 %v7262_v45, %v6071_v46  ;;  %v7291_v45 = vld [vmem:[#allocation7 + $0x7ec] sm:$0xf0] }
 0x288   :  { %v5751_v54 = vld [vmem:[#allocation7 + $0x4a8] sm:$0xf0]  ;;  %v7051_v46 = vld [vmem:[#allocation7 + $0x6c] sm:$0xf0] }
 0x289   :  { %2697 = vmatpush.bf16.msra.mxu0 %v5242_v42  ;;  %2719 = vmatpush.bf16.msra.mxu2 %v5882_v63  ;;  %v7254_v59 = vld [vmem:[#allocation7 + $0x6cc] sm:$0xf]  ;;  %v5754_v60 = vor.u32 %v7182_v52, %v5751_v54  ;;  %v7211_v18 = vld [vmem:[#allocation7 + $0x56c] sm:$0xf0]  ;;  %v5534_v52 = vor.u32 %v7131_v41, %v5533_v0  ;;  %v6174_v54 = vor.u32 %v7291_v45, %v6173_v44  ;;  %v5631_v41 = vld [vmem:[#allocation7 + $0x3b0] sm:$0xf0] }
 0x28a   :  { %2687 = vmatmul.bf16.vlgmr.msrb.gmra.mxu3 %v7854_v4  ;;  %v6039_v39 = vld [vmem:[#allocation7 + $0x6e8] sm:$0xf0]  ;;  %v5469_v2 = vld [vmem:[#allocation7 + $0x250] sm:$0xf]  ;;  %v7071_v44 = vld [vmem:[#allocation7 + $0x114] sm:$0xf] }
 0x28b   :  { %2709 = vmatpush.bf16.msra.mxu1 %v5530_v9  ;;  %2731 = vmatpush.bf16.msra.mxu3 %v6170_v10  ;;  %v7174_v42 = vld [vmem:[#allocation7 + $0x44c] sm:$0xf]  ;;  %v6042_v3 = vor.u32 %v7254_v59, %v6039_v39  ;;  %v5597_v9 = vld [vmem:[#allocation7 + $0x350] sm:$0xf]  ;;  %v5311_v45 = vld [vmem:[#allocation7 + $0x130] sm:$0xf0] }
 0x28c   :  { %v5719_v63 = vld [vmem:[#allocation7 + $0x468] sm:$0xf0]  ;;  %v7147_v10 = vld [vmem:[#allocation7 + $0x36c] sm:$0xf0] }
 0x28d   :  { %2698 = vmatpush.bf16.msra.mxu0 %v5210_v53  ;;  %2720 = vmatpush.bf16.msra.mxu2 %v5850_v15  ;;  %v7246_v6 = vld [vmem:[#allocation7 + $0x68c] sm:$0xf]  ;;  %v5722_v7 = vor.u32 %v7174_v42, %v5719_v63  ;;  %v5277_v15 = vld [vmem:[#allocation7 + $0xd0] sm:$0xf]  ;;  %v5598_v26 = vor.u32 %v7147_v10, %v5597_v9  ;;  %v5407_v42 = vld [vmem:[#allocation7 + $0x1f0] sm:$0xf0] }
 0x28e   :  { %v6007_v8 = vld [vmem:[#allocation7 + $0x6a8] sm:$0xf0]  ;;  %v5278_v24 = vor.u32 %v7067_v16, %v5277_v15  ;;  %v7283_v59 = vld [vmem:[#allocation7 + $0x7ac] sm:$0xf0] }
 0x28f   :  { %2710 = vmatpush.bf16.msra.mxu1 %v5498_v22  ;;  %2732 = vmatpush.bf16.msra.mxu3 %v6138_v25  ;;  %v7166_v12 = vld [vmem:[#allocation7 + $0x40c] sm:$0xf]  ;;  %v6010_v20 = vor.u32 %v7246_v6, %v6007_v8  ;;  %v5918_v25 = vor.u32 %v7227_v19, %v5917_v17  ;;  %v7043_v39 = vld [vmem:[#allocation7 + $0x2c] sm:$0xf0] }
 0x290   :  { %v5687_v53 = vld [vmem:[#allocation7 + $0x428] sm:$0xf0]  ;;  %v7115_v6 = vld [vmem:[#allocation7 + $0x26c] sm:$0xf0] }
 0x291   :  { %2699 = vmatpush.bf16.msra.mxu0 %v5178_v29  ;;  %2721 = vmatpush.bf16.msra.mxu2 %v5818_v30  ;;  %v5690_v21 = vor.u32 %v7166_v12, %v5687_v53  ;;  %v7238_v22 = vld [vmem:[#allocation7 + $0x64c] sm:$0xf]  ;;  %v5245_v29 = vld [vmem:[#allocation7 + $0x90] sm:$0xf]  ;;  %v7087_v12 = vld [vmem:[#allocation7 + $0x194] sm:$0xf]  ;;  %v5470_v15 = vor.u32 %v7115_v6, %v5469_v2 }
 0x292   :  { %v5975_v23 = vld [vmem:[#allocation7 + $0x668] sm:$0xf0]  ;;  %v7059_v30 = vld [vmem:[#allocation7 + $0xac] sm:$0xf0]  ;;  %v5375_v53 = vld [vmem:[#allocation7 + $0x1b0] sm:$0xf0] }
 0x293   :  { %2711 = vmatpush.bf16.msra.mxu1 %v5466_v38  ;;  %2733 = vmatpush.bf16.msra.mxu3 %v6106_v43  ;;  %v7230_v35 = vld [vmem:[#allocation7 + $0x60c] sm:$0xf]  ;;  %v5246_v43 = vor.u32 %v7059_v30, %v5245_v29  ;;  %v7275_v8 = vld [vmem:[#allocation7 + $0x76c] sm:$0xf0]  ;;  %v5343_v29 = vld [vmem:[#allocation7 + $0x170] sm:$0xf0] }
 0x294   :  { %2700 = vmatmul.bf16.vlgmr.msra.gmra.mxu0 %v7836_v32  ;;  %v5943_v38 = vld [vmem:[#allocation7 + $0x628] sm:$0xf0]  ;;  %v5789_v10 = vld [vmem:[#allocation7 + $0x4d0] sm:$0xf]  ;;  %v5346_v0 = vor.u32 %v7079_v28, %v5343_v29  ;;  %v7135_v2 = vld [vmem:[#allocation7 + $0x314] sm:$0xf] }
 0x295   :  { %2744 = vmatpush.bf16.msrb.mxu0 %v5406_v34  ;;  %2722 = vmatpush.bf16.msra.mxu2 %v5786_v51  ;;  %v5978_v34 = vor.u32 %v7238_v22, %v5975_v23  ;;  %v5213_v51 = vld [vmem:[#allocation7 + $0x50] sm:$0xf]  ;;  %v7159_v22 = vld [vmem:[#allocation7 + $0x3d4] sm:$0xf]  ;;  %v5378_v23 = vor.u32 %v7087_v12, %v5375_v53 }
 0x296   :  { %v5214_v57 = vor.u32 %v7051_v46, %v5213_v51  ;;  %v5437_v17 = vld [vmem:[#allocation7 + $0x210] sm:$0xf]  ;;  %v5247_v6 = vld [vmem:[#allocation7 + $0xb0] sm:$0xf0] }
 0x297   :  { %2712 = vmatpush.bf16.msra.mxu1 %v5434_v55  ;;  %2734 = vmatpush.bf16.msra.mxu3 %v6074_v58  ;;  %v5501_v55 = vld [vmem:[#allocation7 + $0x290] sm:$0xf]  ;;  %v5854_v58 = vor.u32 %v7211_v18, %v5853_v49  ;;  %v7127_v53 = vld [vmem:[#allocation7 + $0x2d4] sm:$0xf] }
 0x298   :  { %v5502_v63 = vor.u32 %v7123_v56, %v5501_v55  ;;  %v7107_v19 = vld [vmem:[#allocation7 + $0x22c] sm:$0xf0]  ;;  %v5314_v55 = vor.u32 %v7071_v44, %v5311_v45  ;;  %v7119_v28 = vld [vmem:[#allocation7 + $0x294] sm:$0xf] }
 0x299   :  { %2745 = vmatpush.bf16.msrb.mxu0 %v5374_v48  ;;  %2723 = vmatpush.bf16.msra.mxu2 %v5754_v60  ;;  %v5946_v48 = vor.u32 %v7230_v35, %v5943_v38  ;;  %v5181_v60 = vld [vmem:[#allocation7 + $0x10] sm:$0xf]  ;;  %v5438_v30 = vor.u32 %v7107_v19, %v5437_v17  ;;  %v7151_v38 = vld [vmem:[#allocation7 + $0x394] sm:$0xf] }
 0x29a   :  { %2713 = vmatmul.bf16.vlgmr.msra.gmra.mxu1 %v7843_v47  ;;  %v7187_v27 = vld [vmem:[#allocation7 + $0x4ac] sm:$0xf0]  ;;  %v5634_v49 = vor.u32 %v7151_v38, %v5631_v41  ;;  %v7287_v19 = vld [vmem:[#allocation7 + $0x7d4] sm:$0xf]  ;;  %v5413_v41 = vld [vmem:[#allocation7 + $0x1d8] sm:$0xf] }
 0x29b   :  { %2757 = vmatpush.bf16.msrb.mxu1 %v5662_v36  ;;  %2735 = vmatpush.bf16.msra.mxu3 %v6042_v3  ;;  %v6141_v36 = vld [vmem:[#allocation7 + $0x790] sm:$0xf]  ;;  %v5182_v3 = vor.u32 %v7043_v39, %v5181_v60  ;;  %v5919_v60 = vld [vmem:[#allocation7 + $0x5f0] sm:$0xf0] }
 0x29c   :  { %v6142_v1 = vor.u32 %v7283_v59, %v6141_v36  ;;  %v6045_v35 = vld [vmem:[#allocation7 + $0x6d0] sm:$0xf]  ;;  %v5279_v36 = vld [vmem:[#allocation7 + $0xf0] sm:$0xf0] }
 0x29d   :  { %2746 = vmatpush.bf16.msrb.mxu0 %v5342_v40  ;;  %2724 = vmatpush.bf16.msra.mxu2 %v5722_v7  ;;  %v7095_v40 = vld [vmem:[#allocation7 + $0x1d4] sm:$0xf]  ;;  %v6109_v7 = vld [vmem:[#allocation7 + $0x750] sm:$0xf] }
 0x29e   :  { %v5410_v9 = vor.u32 %v7095_v40, %v5407_v42  ;;  %v6110_v16 = vor.u32 %v7275_v8, %v6109_v7  ;;  %v6013_v46 = vld [vmem:[#allocation7 + $0x690] sm:$0xf]  ;;  %v7223_v59 = vld [vmem:[#allocation7 + $0x5d4] sm:$0xf] }
 0x29f   :  { %2758 = vmatpush.bf16.msrb.mxu1 %v5630_v5  ;;  %2736 = vmatpush.bf16.msra.mxu3 %v6010_v20  ;;  %v5822_v5 = vor.u32 %v7203_v62, %v5821_v61  ;;  %v5693_v56 = vld [vmem:[#allocation7 + $0x410] sm:$0xf]  ;;  %v7215_v7 = vld [vmem:[#allocation7 + $0x594] sm:$0xf] }
 0x2a0   :  { %v5981_v40 = vld [vmem:[#allocation7 + $0x650] sm:$0xf]  ;;  %v5887_v8 = vld [vmem:[#allocation7 + $0x5b0] sm:$0xf0] }
 0x2a1   :  { %2747 = vmatpush.bf16.msrb.mxu0 %v5310_v11  ;;  %2725 = vmatpush.bf16.msra.mxu2 %v5690_v21  ;;  %v7195_v11 = vld [vmem:[#allocation7 + $0x4ec] sm:$0xf0]  ;;  %v5890_v17 = vor.u32 %v7215_v7, %v5887_v8  ;;  %v5503_v29 = vld [vmem:[#allocation7 + $0x2b0] sm:$0xf0] }
 0x2a2   :  { %v5790_v20 = vor.u32 %v7195_v11, %v5789_v10  ;;  %v7267_v21 = vld [vmem:[#allocation7 + $0x72c] sm:$0xf0]  ;;  %v7199_v38 = vld [vmem:[#allocation7 + $0x514] sm:$0xf] }
 0x2a3   :  { %2759 = vmatpush.bf16.msrb.mxu1 %v5598_v26  ;;  %2737 = vmatpush.bf16.msra.mxu3 %v5978_v34  ;;  %v6077_v26 = vld [vmem:[#allocation7 + $0x710] sm:$0xf]  ;;  %v7111_v45 = vld [vmem:[#allocation7 + $0x254] sm:$0xf] }
 0x2a4   :  { %2726 = vmatmul.bf16.vlgmr.msra.gmra.mxu2 %v7848_v14  ;;  %v6078_v31 = vor.u32 %v7267_v21, %v6077_v26  ;;  %v7243_v42 = vld [vmem:[#allocation7 + $0x66c] sm:$0xf0]  ;;  %v7047_v26 = vld [vmem:[#allocation7 + $0x54] sm:$0xf] }
 0x2a5   :  { %2748 = vmatpush.bf16.msrb.mxu0 %v5278_v24  ;;  %2770 = vmatpush.bf16.msrb.mxu2 %v5918_v25  ;;  %v5663_v24 = vld [vmem:[#allocation7 + $0x3f0] sm:$0xf0]  ;;  %v5757_v25 = vld [vmem:[#allocation7 + $0x490] sm:$0xf] }
 0x2a6   :  { %v5666_v33 = vor.u32 %v7159_v22, %v5663_v24  ;;  %v5758_v34 = vor.u32 %v7187_v27, %v5757_v25  ;;  %v5949_v10 = vld [vmem:[#allocation7 + $0x610] sm:$0xf]  ;;  %v5215_v21 = vld [vmem:[#allocation7 + $0x70] sm:$0xf0] }
 0x2a7   :  { %2760 = vmatpush.bf16.msrb.mxu1 %v5566_v37  ;;  %2738 = vmatpush.bf16.msra.mxu3 %v5946_v48  ;;  %v7259_v37 = vld [vmem:[#allocation7 + $0x6ec] sm:$0xf0]  ;;  %v7207_v22 = vld [vmem:[#allocation7 + $0x554] sm:$0xf] }
 0x2a8   :  { %v6046_v51 = vor.u32 %v7259_v37, %v6045_v35  ;;  %v7251_v48 = vld [vmem:[#allocation7 + $0x6ac] sm:$0xf0]  ;;  %v7039_v35 = vld [vmem:[#allocation7 + $0x14] sm:$0xf] }
 0x2a9   :  { %2749 = vmatpush.bf16.msrb.mxu0 %v5246_v43  ;;  %2771 = vmatpush.bf16.msrb.mxu2 %v5886_v50  ;;  %v5725_v43 = vld [vmem:[#allocation7 + $0x450] sm:$0xf]  ;;  %v6014_v39 = vor.u32 %v7251_v48, %v6013_v46  ;;  %v5183_v37 = vld [vmem:[#allocation7 + $0x30] sm:$0xf0] }
 0x2aa   :  { %2739 = vmatmul.bf16.vlgmr.msra.gmra.mxu3 %v7854_v4  ;;  %v7179_v50 = vld [vmem:[#allocation7 + $0x46c] sm:$0xf0]  ;;  %v6111_v48 = vld [vmem:[#allocation7 + $0x770] sm:$0xf0] }
 0x2ab   :  { %2761 = vmatpush.bf16.msrb.mxu1 %v5534_v52  ;;  %2783 = vmatpush.bf16.msrb.mxu3 %v6174_v54  ;;  %v5726_v18 = vor.u32 %v7179_v50, %v5725_v43  ;;  %v7143_v52 = vld [vmem:[#allocation7 + $0x354] sm:$0xf]  ;;  %v7235_v12 = vld [vmem:[#allocation7 + $0x62c] sm:$0xf0]  ;;  %v7100_v43 = vld [vmem:[#allocation7 + $0x1f4] sm:$0xf0]  ;;  %v5506_v50 = vor.u32 %v7119_v28, %v5503_v29 }
 0x2ac   :  { %v5599_v54 = vld [vmem:[#allocation7 + $0x370] sm:$0xf0]  ;;  %v5950_v24 = vor.u32 %v7235_v12, %v5949_v10  ;;  %v5637_v12 = vld [vmem:[#allocation7 + $0x398] sm:$0xf] }
 0x2ad   :  { %2750 = vmatpush.bf16.msrb.mxu0 %v5214_v57  ;;  %2772 = vmatpush.bf16.msrb.mxu2 %v5854_v58  ;;  %v7171_v57 = vld [vmem:[#allocation7 + $0x42c] sm:$0xf0]  ;;  %v7063_v58 = vld [vmem:[#allocation7 + $0xd4] sm:$0xf]  ;;  %v5602_v61 = vor.u32 %v7143_v52, %v5599_v54  ;;  %v5414_v52 = vor.u32 %v7100_v43, %v5413_v41 }
 0x2ae   :  { %v5694_v62 = vor.u32 %v7171_v57, %v5693_v56  ;;  %v7191_v54 = vld [vmem:[#allocation7 + $0x4d4] sm:$0xf]  ;;  %v5381_v56 = vld [vmem:[#allocation7 + $0x198] sm:$0xf] }
 0x2af   :  { %2762 = vmatpush.bf16.msrb.mxu1 %v5502_v63  ;;  %2784 = vmatpush.bf16.msrb.mxu3 %v6142_v1  ;;  %v5282_v63 = vor.u32 %v7063_v58, %v5279_v36  ;;  %v5922_v1 = vor.u32 %v7223_v59, %v5919_v60  ;;  %v7092_v57 = vld [vmem:[#allocation7 + $0x1b4] sm:$0xf0]  ;;  %v7103_v59 = vld [vmem:[#allocation7 + $0x214] sm:$0xf] }
 0x2b0   :  { %v5439_v60 = vld [vmem:[#allocation7 + $0x230] sm:$0xf0] }
 0x2b1   :  { %2751 = vmatpush.bf16.msrb.mxu0 %v5182_v3  ;;  %2773 = vmatpush.bf16.msrb.mxu2 %v5822_v5  ;;  %v5567_v3 = vld [vmem:[#allocation7 + $0x330] sm:$0xf0] }
 0x2b2   :  { %v7055_v5 = vld [vmem:[#allocation7 + $0x94] sm:$0xf]  ;;  %v5570_v11 = vor.u32 %v7135_v2, %v5567_v3  ;;  %v5349_v3 = vld [vmem:[#allocation7 + $0x158] sm:$0xf] }
 0x2b3   :  { %2763 = vmatpush.bf16.msrb.mxu1 %v5470_v15  ;;  %2785 = vmatpush.bf16.msrb.mxu3 %v6110_v16  ;;  %v5535_v15 = vld [vmem:[#allocation7 + $0x2f0] sm:$0xf0]  ;;  %v5250_v16 = vor.u32 %v7055_v5, %v5247_v6  ;;  %v7084_v5 = vld [vmem:[#allocation7 + $0x174] sm:$0xf0]  ;;  %v5442_v6 = vor.u32 %v7103_v59, %v5439_v60 }
 0x2b4   :  { %2752 = vmatmul.bf16.vlgmr.msrb.gmra.mxu0 %v7836_v32  ;;  %v5538_v25 = vor.u32 %v7127_v53, %v5535_v15  ;;  %v5759_v2 = vld [vmem:[#allocation7 + $0x4b0] sm:$0xf0]  ;;  %v5350_v53 = vor.u32 %v7084_v5, %v5349_v3  ;;  %v7156_v15 = vld [vmem:[#allocation7 + $0x3b4] sm:$0xf0] }
 0x2b5   :  { %2796 = vmatpush.bf16.msra.mxu0 %v5410_v9  ;;  %2774 = vmatpush.bf16.msrb.mxu2 %v5790_v20  ;;  %v5982_v9 = vor.u32 %v7243_v42, %v5981_v40  ;;  %v6175_v20 = vld [vmem:[#allocation7 + $0x7f0] sm:$0xf0]  ;;  %v5669_v40 = vld [vmem:[#allocation7 + $0x3d8] sm:$0xf]  ;;  %v5382_v42 = vor.u32 %v7092_v57, %v5381_v56 }
 0x2b6   :  { %v6178_v27 = vor.u32 %v7287_v19, %v6175_v20  ;;  %v7255_v10 = vld [vmem:[#allocation7 + $0x6d4] sm:$0xf]  ;;  %v5317_v19 = vld [vmem:[#allocation7 + $0x118] sm:$0xf] }
 0x2b7   :  { %2764 = vmatpush.bf16.msrb.mxu1 %v5438_v30  ;;  %2786 = vmatpush.bf16.msrb.mxu3 %v6078_v31  ;;  %v5218_v30 = vor.u32 %v7047_v26, %v5215_v21  ;;  %v7076_v20 = vld [vmem:[#allocation7 + $0x134] sm:$0xf0]  ;;  %v7247_v21 = vld [vmem:[#allocation7 + $0x694] sm:$0xf] }
 0x2b8   :  { %v5318_v29 = vor.u32 %v7076_v20, %v5317_v19  ;;  %v7239_v43 = vld [vmem:[#allocation7 + $0x654] sm:$0xf]  ;;  %v7132_v59 = vld [vmem:[#allocation7 + $0x2f4] sm:$0xf0]  ;;  %v7096_v20 = vld [vmem:[#allocation7 + $0x1dc] sm:$0xf] }
 0x2b9   :  { %2797 = vmatpush.bf16.msra.mxu0 %v5378_v23  ;;  %2775 = vmatpush.bf16.msrb.mxu2 %v5758_v34  ;;  %v5855_v23 = vld [vmem:[#allocation7 + $0x570] sm:$0xf0] }
 0x2ba   :  { %2765 = vmatmul.bf16.vlgmr.msrb.gmra.mxu1 %v7843_v47  ;;  %v5858_v31 = vor.u32 %v7207_v22, %v5855_v23  ;;  %v6143_v34 = vld [vmem:[#allocation7 + $0x7b0] sm:$0xf0]  ;;  %v5638_v22 = vor.u32 %v7156_v15, %v5637_v12  ;;  %v7284_v12 = vld [vmem:[#allocation7 + $0x7b4] sm:$0xf0] }
 0x2bb   :  { %2809 = vmatpush.bf16.msra.mxu1 %v5666_v33  ;;  %2787 = vmatpush.bf16.msrb.mxu3 %v6046_v51  ;;  %v7279_v33 = vld [vmem:[#allocation7 + $0x794] sm:$0xf]  ;;  %v5186_v51 = vor.u32 %v7039_v35, %v5183_v37  ;;  %v5925_v35 = vld [vmem:[#allocation7 + $0x5d8] sm:$0xf] }
 0x2bc   :  { %v6146_v44 = vor.u32 %v7279_v33, %v6143_v34  ;;  %v5285_v33 = vld [vmem:[#allocation7 + $0xd8] sm:$0xf]  ;;  %v7231_v56 = vld [vmem:[#allocation7 + $0x614] sm:$0xf] }
 0x2bd   :  { %2798 = vmatpush.bf16.msra.mxu0 %v5346_v0  ;;  %2776 = vmatpush.bf16.msrb.mxu2 %v5726_v18  ;;  %v5823_v0 = vld [vmem:[#allocation7 + $0x530] sm:$0xf0]  ;;  %v7068_v34 = vld [vmem:[#allocation7 + $0xf4] sm:$0xf0] }
 0x2be   :  { %v5826_v46 = vor.u32 %v7199_v38, %v5823_v0  ;;  %v7271_v18 = vld [vmem:[#allocation7 + $0x754] sm:$0xf]  ;;  %v7228_v37 = vld [vmem:[#allocation7 + $0x5f4] sm:$0xf0] }
 0x2bf   :  { %2810 = vmatpush.bf16.msra.mxu1 %v5634_v49  ;;  %2788 = vmatpush.bf16.msrb.mxu3 %v6014_v39  ;;  %v5471_v49 = vld [vmem:[#allocation7 + $0x270] sm:$0xf0]  ;;  %v6114_v36 = vor.u32 %v7271_v18, %v6111_v48  ;;  %v7060_v18 = vld [vmem:[#allocation7 + $0xb4] sm:$0xf0] }
 0x2c0   :  { %v5474_v58 = vor.u32 %v7111_v45, %v5471_v49  ;;  %v5926_v45 = vor.u32 %v7228_v37, %v5925_v35  ;;  %v5253_v49 = vld [vmem:[#allocation7 + $0x98] sm:$0xf]  ;;  %v7088_v37 = vld [vmem:[#allocation7 + $0x19c] sm:$0xf] }
 0x2c1   :  { %2799 = vmatpush.bf16.msra.mxu0 %v5314_v55  ;;  %2777 = vmatpush.bf16.msrb.mxu2 %v5694_v62  ;;  %v5791_v55 = vld [vmem:[#allocation7 + $0x4f0] sm:$0xf0]  ;;  %v5893_v48 = vld [vmem:[#allocation7 + $0x598] sm:$0xf] }
 0x2c2   :  { %v5794_v39 = vor.u32 %v7191_v54, %v5791_v55  ;;  %v6079_v62 = vld [vmem:[#allocation7 + $0x730] sm:$0xf0]  ;;  %v7044_v15 = vld [vmem:[#allocation7 + $0x34] sm:$0xf0] }
 0x2c3   :  { %2811 = vmatpush.bf16.msra.mxu1 %v5602_v61  ;;  %2789 = vmatpush.bf16.msrb.mxu3 %v5982_v9  ;;  %v7263_v61 = vld [vmem:[#allocation7 + $0x714] sm:$0xf]  ;;  %v7196_v35 = vld [vmem:[#allocation7 + $0x4f4] sm:$0xf0] }
 0x2c4   :  { %2778 = vmatmul.bf16.vlgmr.msrb.gmra.mxu2 %v7848_v14  ;;  %v6082_v7 = vor.u32 %v7263_v61, %v6079_v62  ;;  %v6181_v62 = vld [vmem:[#allocation7 + $0x7d8] sm:$0xf] }
 0x2c5   :  { %2800 = vmatpush.bf16.msra.mxu0 %v5282_v63  ;;  %2822 = vmatpush.bf16.msra.mxu2 %v5922_v1  ;;  %v7164_v63 = vld [vmem:[#allocation7 + $0x3f4] sm:$0xf0]  ;;  %v7183_v1 = vld [vmem:[#allocation7 + $0x494] sm:$0xf] }
 0x2c6   :  { %v5670_v8 = vor.u32 %v7164_v63, %v5669_v40  ;;  %v5762_v9 = vor.u32 %v7183_v1, %v5759_v2  ;;  %v7292_v40 = vld [vmem:[#allocation7 + $0x7f4] sm:$0xf0] }
 0x2c7   :  { %2812 = vmatpush.bf16.msra.mxu1 %v5570_v11  ;;  %2790 = vmatpush.bf16.msrb.mxu3 %v5950_v24  ;;  %v6047_v11 = vld [vmem:[#allocation7 + $0x6f0] sm:$0xf0]  ;;  %v7052_v63 = vld [vmem:[#allocation7 + $0x74] sm:$0xf0] }
 0x2c8   :  { %v6050_v26 = vor.u32 %v7255_v10, %v6047_v11  ;;  %v6015_v24 = vld [vmem:[#allocation7 + $0x6b0] sm:$0xf0]  ;;  %v5861_v1 = vld [vmem:[#allocation7 + $0x558] sm:$0xf] }
 0x2c9   :  { %2801 = vmatpush.bf16.msra.mxu0 %v5250_v16  ;;  %2823 = vmatpush.bf16.msra.mxu2 %v5890_v17  ;;  %v7175_v16 = vld [vmem:[#allocation7 + $0x454] sm:$0xf]  ;;  %v6018_v38 = vor.u32 %v7247_v21, %v6015_v24  ;;  %v7212_v2 = vld [vmem:[#allocation7 + $0x574] sm:$0xf0] }
 0x2ca   :  { %2791 = vmatmul.bf16.vlgmr.msrb.gmra.mxu3 %v7854_v4  ;;  %v5727_v17 = vld [vmem:[#allocation7 + $0x470] sm:$0xf0]  ;;  %v5862_v10 = vor.u32 %v7212_v2, %v5861_v1  ;;  %v6149_v11 = vld [vmem:[#allocation7 + $0x798] sm:$0xf]  ;;  %v5639_v1 = vld [vmem:[#allocation7 + $0x3b8] sm:$0xf0] }
 0x2cb   :  { %2813 = vmatpush.bf16.msra.mxu1 %v5538_v25  ;;  %2835 = vmatpush.bf16.msra.mxu3 %v6178_v27  ;;  %v5730_v23 = vor.u32 %v7175_v16, %v5727_v17  ;;  %v5605_v25 = vld [vmem:[#allocation7 + $0x358] sm:$0xf] }
 0x2cc   :  { %v7148_v27 = vld [vmem:[#allocation7 + $0x374] sm:$0xf0] }
 0x2cd   :  { %2802 = vmatpush.bf16.msra.mxu0 %v5218_v30  ;;  %2824 = vmatpush.bf16.msra.mxu2 %v5858_v31  ;;  %v7167_v30 = vld [vmem:[#allocation7 + $0x414] sm:$0xf]  ;;  %v5606_v0 = vor.u32 %v7148_v27, %v5605_v25  ;;  %v5829_v16 = vld [vmem:[#allocation7 + $0x518] sm:$0xf] }
 0x2ce   :  { %v5695_v31 = vld [vmem:[#allocation7 + $0x430] sm:$0xf0]  ;;  %v7204_v17 = vld [vmem:[#allocation7 + $0x534] sm:$0xf0] }
 0x2cf   :  { %2814 = vmatpush.bf16.msra.mxu1 %v5506_v50  ;;  %2836 = vmatpush.bf16.msra.mxu3 %v6146_v44  ;;  %v5698_v41 = vor.u32 %v7167_v30, %v5695_v31  ;;  %v5983_v50 = vld [vmem:[#allocation7 + $0x670] sm:$0xf0]  ;;  %v5286_v44 = vor.u32 %v7068_v34, %v5285_v33  ;;  %v5830_v27 = vor.u32 %v7204_v17, %v5829_v16  ;;  %v6117_v30 = vld [vmem:[#allocation7 + $0x758] sm:$0xf]  ;;  %v5607_v16 = vld [vmem:[#allocation7 + $0x378] sm:$0xf0] }
 0x2d0   :  { %v5986_v55 = vor.u32 %v7239_v43, %v5983_v50  ;;  %v7276_v31 = vld [vmem:[#allocation7 + $0x774] sm:$0xf0] }
 0x2d1   :  { %2803 = vmatpush.bf16.msra.mxu0 %v5186_v51  ;;  %2825 = vmatpush.bf16.msra.mxu2 %v5826_v46  ;;  %v7873_v28 = vpop.f32.mrf.mxu0  ;;  %v5573_v51 = vld [vmem:[#allocation7 + $0x318] sm:$0xf] }
 0x2d2   :  { %v7140_v46 = vld [vmem:[#allocation7 + $0x334] sm:$0xf0] }
 0x2d3   :  { %2815 = vmatpush.bf16.msra.mxu1 %v5474_v58  ;;  %2837 = vmatpush.bf16.msra.mxu3 %v6114_v36  ;;  %v5574_v57 = vor.u32 %v7140_v46, %v5573_v51  ;;  %v5951_v58 = vld [vmem:[#allocation7 + $0x630] sm:$0xf0]  ;;  %v5541_v36 = vld [vmem:[#allocation7 + $0x2d8] sm:$0xf]  ;;  %v7160_v46 = vld [vmem:[#allocation7 + $0x3dc] sm:$0xf] }
 0x2d4   :  { %2804 = vmatmul.bf16.vlgmr.msra.gmra.mxu0 %v7836_v32  ;;  %v5954_v3 = vor.u32 %v7231_v56, %v5951_v58  ;;  %v5542_v5 = vor.u32 %v7132_v59, %v5541_v36  ;;  %v5797_v34 = vld [vmem:[#allocation7 + $0x4d8] sm:$0xf]  ;;  %v5351_v58 = vld [vmem:[#allocation7 + $0x178] sm:$0xf0] }
 0x2d5   :  { %2848 = vmatpush.bf16.msrb.mxu0 %v5414_v52  ;;  %2826 = vmatpush.bf16.msra.mxu2 %v5794_v39  ;;  %v7220_v52 = vld [vmem:[#allocation7 + $0x5b4] sm:$0xf0]  ;;  %v5254_v39 = vor.u32 %v7060_v18, %v5253_v49  ;;  %v5671_v18 = vld [vmem:[#allocation7 + $0x3f8] sm:$0xf0] }
 0x2d6   :  { %v5894_v61 = vor.u32 %v7220_v52, %v5893_v48  ;;  %v5445_v43 = vld [vmem:[#allocation7 + $0x218] sm:$0xf] }
 0x2d7   :  { %2816 = vmatpush.bf16.msra.mxu1 %v5442_v6  ;;  %2838 = vmatpush.bf16.msra.mxu3 %v6082_v7  ;;  %v7876_v54 = vpop.f32.mrf.mxu1  ;;  %v6182_v6 = vor.u32 %v7292_v40, %v6181_v62  ;;  %v5509_v7 = vld [vmem:[#allocation7 + $0x298] sm:$0xf] }
 0x2d8   :  { %v7108_v50 = vld [vmem:[#allocation7 + $0x234] sm:$0xf0] }
 0x2d9   :  { %2849 = vmatpush.bf16.msrb.mxu0 %v5382_v42  ;;  %2827 = vmatpush.bf16.msra.mxu2 %v5762_v9  ;;  %v2547_v60 = vpop.f32.mrf.mxu0  ;;  %v5221_v42 = vld [vmem:[#allocation7 + $0x58] sm:$0xf]  ;;  %v5446_v36 = vor.u32 %v7108_v50, %v5445_v43  ;;  %v5575_v43 = vld [vmem:[#allocation7 + $0x338] sm:$0xf0] }
 0x2da   :  { %2817 = vmatmul.bf16.vlgmr.msra.gmra.mxu1 %v7843_v47  ;;  %v5222_v9 = vor.u32 %v7052_v63, %v5221_v42  ;;  %v7268_v51 = vld [vmem:[#allocation7 + $0x734] sm:$0xf0]  ;;  %v7152_v42 = vld [vmem:[#allocation7 + $0x39c] sm:$0xf] }
 0x2db   :  { %2861 = vmatpush.bf16.msrb.mxu1 %v5670_v8  ;;  %2839 = vmatpush.bf16.msra.mxu3 %v6050_v26  ;;  %v7124_v8 = vld [vmem:[#allocation7 + $0x2b4] sm:$0xf0]  ;;  %v5415_v26 = vld [vmem:[#allocation7 + $0x1f8] sm:$0xf0] }
 0x2dc   :  { %v5510_v21 = vor.u32 %v7124_v8, %v5509_v7  ;;  %v5418_v33 = vor.u32 %v7096_v20, %v5415_v26  ;;  %v5765_v48 = vld [vmem:[#allocation7 + $0x498] sm:$0xf]  ;;  %v5319_v7 = vld [vmem:[#allocation7 + $0x138] sm:$0xf0] }
 0x2dd   :  { %2850 = vmatpush.bf16.msrb.mxu0 %v5350_v53  ;;  %2828 = vmatpush.bf16.msra.mxu2 %v5730_v23  ;;  %v5189_v53 = vld [vmem:[#allocation7 + $0x18] sm:$0xf]  ;;  %v7056_v50 = vld [vmem:[#allocation7 + $0x9c] sm:$0xf] }
 0x2de   :  { %v5477_v23 = vld [vmem:[#allocation7 + $0x258] sm:$0xf]  ;;  %v5190_v25 = vor.u32 %v7044_v15, %v5189_v53  ;;  %v7144_v15 = vld [vmem:[#allocation7 + $0x35c] sm:$0xf] }
 0x2df   :  { %2862 = vmatpush.bf16.msrb.mxu1 %v5638_v22  ;;  %2840 = vmatpush.bf16.msra.mxu3 %v6018_v38  ;;  %v2560_v19 = vpop.f32.mrf.mxu1  ;;  %v6150_v22 = vor.u32 %v7284_v12, %v6149_v11  ;;  %v5383_v38 = vld [vmem:[#allocation7 + $0x1b8] sm:$0xf0]  ;;  %v7188_v52 = vld [vmem:[#allocation7 + $0x4b4] sm:$0xf0]  ;;  %v5642_v11 = vor.u32 %v7152_v42, %v5639_v1 }
 0x2e0   :  { %v5386_v49 = vor.u32 %v7088_v37, %v5383_v38  ;;  %v6053_v62 = vld [vmem:[#allocation7 + $0x6d8] sm:$0xf]  ;;  %v5223_v1 = vld [vmem:[#allocation7 + $0x78] sm:$0xf0] }
 0x2e1   :  { %2851 = vmatpush.bf16.msrb.mxu0 %v5318_v29  ;;  %2829 = vmatpush.bf16.msra.mxu2 %v5698_v41  ;;  %v7879_v24 = vpop.f32.mrf.mxu0  ;;  %v7116_v29 = vld [vmem:[#allocation7 + $0x274] sm:$0xf0]  ;;  %v6118_v41 = vor.u32 %v7276_v31, %v6117_v30 }
 0x2e2   :  { %v7260_v40 = vld [vmem:[#allocation7 + $0x6f4] sm:$0xf0] }
 0x2e3   :  { %2863 = vmatpush.bf16.msrb.mxu1 %v5606_v0  ;;  %2841 = vmatpush.bf16.msra.mxu3 %v5986_v55  ;;  %v5478_v0 = vor.u32 %v7116_v29, %v5477_v23  ;;  %v5733_v2 = vld [vmem:[#allocation7 + $0x458] sm:$0xf]  ;;  %v6054_v8 = vor.u32 %v7260_v40, %v6053_v62  ;;  %v5287_v23 = vld [vmem:[#allocation7 + $0xf8] sm:$0xf0] }
 0x2e4   :  { %2830 = vmatmul.bf16.vlgmr.msra.gmra.mxu2 %v7848_v14  ;;  %v7252_v53 = vld [vmem:[#allocation7 + $0x6b4] sm:$0xf0]  ;;  %v6183_v62 = vld [vmem:[#allocation7 + $0x7f8] sm:$0xf0] }
 0x2e5   :  { %2852 = vmatpush.bf16.msrb.mxu0 %v5286_v44  ;;  %2874 = vmatpush.bf16.msrb.mxu2 %v5926_v45  ;;  %v5798_v44 = vor.u32 %v7196_v35, %v5797_v34  ;;  %v6085_v45 = vld [vmem:[#allocation7 + $0x718] sm:$0xf]  ;;  %v7048_v40 = vld [vmem:[#allocation7 + $0x5c] sm:$0xf] }
 0x2e6   :  { %v6086_v59 = vor.u32 %v7268_v51, %v6085_v45  ;;  %v5701_v20 = vld [vmem:[#allocation7 + $0x418] sm:$0xf]  ;;  %v5255_v45 = vld [vmem:[#allocation7 + $0xb8] sm:$0xf0] }
 0x2e7   :  { %2864 = vmatpush.bf16.msrb.mxu1 %v5574_v57  ;;  %2842 = vmatpush.bf16.msra.mxu3 %v5954_v3  ;;  %v2571_v55 = vpop.f32.mrf.mxu2  ;;  %v7882_v56 = vpop.f32.mrf.mxu1  ;;  %v7080_v57 = vld [vmem:[#allocation7 + $0x15c] sm:$0xf]  ;;  %v7180_v3 = vld [vmem:[#allocation7 + $0x474] sm:$0xf0] }
 0x2e8   :  { %v5354_v63 = vor.u32 %v7080_v57, %v5351_v58  ;;  %v5734_v12 = vor.u32 %v7180_v3, %v5733_v2  ;;  %v7172_v26 = vld [vmem:[#allocation7 + $0x434] sm:$0xf0]  ;;  %v7216_v51 = vld [vmem:[#allocation7 + $0x59c] sm:$0xf] }
 0x2e9   :  { %2853 = vmatpush.bf16.msrb.mxu0 %v5254_v39  ;;  %2875 = vmatpush.bf16.msrb.mxu2 %v5894_v61  ;;  %v2599_v60 = vpop.f32.mrf.mxu0  ;;  %v5674_v39 = vor.u32 %v7160_v46, %v5671_v18  ;;  %v5766_v61 = vor.u32 %v7188_v52, %v5765_v48  ;;  %v5989_v30 = vld [vmem:[#allocation7 + $0x658] sm:$0xf]  ;;  %v5702_v34 = vor.u32 %v7172_v26, %v5701_v20  ;;  %v5895_v46 = vld [vmem:[#allocation7 + $0x5b8] sm:$0xf0] }
 0x2ea   :  { %2843 = vmatmul.bf16.vlgmr.msra.gmra.mxu3 %v7854_v4  ;;  %v7244_v35 = vld [vmem:[#allocation7 + $0x674] sm:$0xf0]  ;;  %v7128_v57 = vld [vmem:[#allocation7 + $0x2dc] sm:$0xf]  ;;  %v5258_v60 = vor.u32 %v7056_v50, %v5255_v45  ;;  %v2611_v20 = vadd.f32 %v7882_v56, %v7879_v24 }
 0x2eb   :  { %2865 = vmatpush.bf16.msrb.mxu1 %v5542_v5  ;;  %2887 = vmatpush.bf16.msrb.mxu3 %v6182_v6  ;;  %v2559_v5 = vadd.f32 %v7876_v54, %v7873_v28  ;;  %v7072_v6 = vld [vmem:[#allocation7 + $0x11c] sm:$0xf]  ;;  %v5990_v18 = vor.u32 %v7244_v35, %v5989_v30  ;;  %v5957_v48 = vld [vmem:[#allocation7 + $0x618] sm:$0xf] }
 0x2ec   :  { %v5322_v19 = vor.u32 %v7072_v6, %v5319_v7  ;;  %v7064_v28 = vld [vmem:[#allocation7 + $0xdc] sm:$0xf] }
 0x2ed   :  { %2854 = vmatpush.bf16.msrb.mxu0 %v5222_v9  ;;  %2876 = vmatpush.bf16.msrb.mxu2 %v5862_v10  ;;  %v6021_v9 = vld [vmem:[#allocation7 + $0x698] sm:$0xf]  ;;  %v2572_v10 = vadd.f32 %v2571_v55, %v2559_v5  ;;  %v2584_v17 = vpop.f32.mrf.mxu3  ;;  %v5290_v38 = vor.u32 %v7064_v28, %v5287_v23  ;;  %v5543_v58 = vld [vmem:[#allocation7 + $0x2f8] sm:$0xf0]  ;;  %v7315_v23 = vld [vmem:[#allocation8 + $0xb0] sm:$0xf0] }
 0x2ee   :  { %v6022_v29 = vor.u32 %v7252_v53, %v6021_v9  ;;  %v7236_v55 = vld [vmem:[#allocation7 + $0x634] sm:$0xf0]  ;;  %v7208_v2 = vld [vmem:[#allocation7 + $0x55c] sm:$0xf]  ;;  %v5546_v7 = vor.u32 %v7128_v57, %v5543_v58  ;;  %v5226_v53 = vor.u32 %v7048_v40, %v5223_v1  ;;  %v6369_v1 = vld [vmem:[#allocation8 + $0x168] sm:$0xf] }
 0x2ef   :  { %2866 = vmatpush.bf16.msrb.mxu1 %v5510_v21  ;;  %2888 = vmatpush.bf16.msrb.mxu3 %v6150_v22  ;;  %v2585_v54 = vadd.f32 %v2584_v17, %v2572_v10  ;;  %v2573_v21 = vpop.f32.mrf.mxu2  ;;  %v2612_v22 = vpop.f32.mrf.mxu1  ;;  %v5863_v3 = vld [vmem:[#allocation7 + $0x578] sm:$0xf0]  ;;  %v5958_v6 = vor.u32 %v7236_v55, %v5957_v48 }
 0x2f0   :  { %v7120_v9 = vld [vmem:[#allocation7 + $0x29c] sm:$0xf]  ;;  %v6273_v22 = vld [vmem:[#allocation8 + $0xa8] sm:$0xf] }
 0x2f1   :  { %2855 = vmatpush.bf16.msrb.mxu0 %v5190_v25  ;;  %2877 = vmatpush.bf16.msrb.mxu2 %v5830_v27  ;;  %v7224_v25 = vld [vmem:[#allocation7 + $0x5dc] sm:$0xf]  ;;  %vm2952_vm1 = vcmp.gt.f32.partialorder %v2585_v54, 0.0  ;;  %v2960_v31 = vmul.f32 0.02, %v2585_v54  ;;  %v7888_v37 = vpop.f32.mrf.mxu0 }
 0x2f2   :  { %v5927_v27 = vld [vmem:[#allocation7 + $0x5f8] sm:$0xf0] }
 0x2f3   :  { %2867 = vmatpush.bf16.msrb.mxu1 %v5478_v0  ;;  %2889 = vmatpush.bf16.msrb.mxu3 %v6118_v41  ;;  %v5930_v0 = vor.u32 %v7224_v25, %v5927_v27  ;;  %v7136_v41 = vld [vmem:[#allocation7 + $0x31c] sm:$0xf] }
 0x2f4   :  { %2856 = vmatmul.bf16.vlgmr.msrb.gmra.mxu0 %v7836_v32  ;;  %v5578_v52 = vor.u32 %v7136_v41, %v5575_v43  ;;  %v5511_v10 = vld [vmem:[#allocation7 + $0x2b8] sm:$0xf0] }
 0x2f5   :  { %2900 = vmatpush.bf16.msra.mxu0 %v5418_v33  ;;  %2878 = vmatpush.bf16.msrb.mxu2 %v5798_v44  ;;  %v5610_v33 = vor.u32 %v7144_v15, %v5607_v16  ;;  %v7890_v44 = vsel %vm2952_vm1, %v2585_v54, %v2960_v31  ;;  %v5866_v15 = vor.u32 %v7208_v2, %v5863_v3  ;;  %v7280_v16 = vld [vmem:[#allocation7 + $0x79c] sm:$0xf]  ;;  %v7339_v2 = vld [vmem:[#allocation8 + $0x170] sm:$0xf0] }
 0x2f6   :  { %v6151_v17 = vld [vmem:[#allocation7 + $0x7b8] sm:$0xf0]  ;;  %v5514_v27 = vor.u32 %v7120_v9, %v5511_v10 }
 0x2f7   :  { %2868 = vmatpush.bf16.msrb.mxu1 %v5446_v36  ;;  %2890 = vmatpush.bf16.msrb.mxu3 %v6086_v59  ;;  %v2586_v59 = vpop.f32.mrf.mxu3  ;;  %v2623_v42 = vpop.f32.mrf.mxu2  ;;  %v5191_v26 = vld [vmem:[#allocation7 + $0x38] sm:$0xf0] }
 0x2f8   :  { %v7200_v28 = vld [vmem:[#allocation7 + $0x51c] sm:$0xf]  ;;  %v2624_v25 = vadd.f32 %v2623_v42, %v2611_v20 }
 0x2f9   :  { %2901 = vmatpush.bf16.msra.mxu0 %v5386_v49  ;;  %2879 = vmatpush.bf16.msrb.mxu2 %v5766_v61  ;;  %v2976_v49 = vrot.slane %v7890_v44, 4  ;;  %v7288_v61 = vld [vmem:[#allocation7 + $0x7dc] sm:$0xf] }
 0x2fa   :  { %2869 = vmatmul.bf16.vlgmr.msrb.gmra.mxu1 %v7843_v47  ;;  %v5831_v54 = vld [vmem:[#allocation7 + $0x538] sm:$0xf0] }
 0x2fb   :  { %2913 = vmatpush.bf16.msra.mxu1 %v5674_v39  ;;  %2891 = vmatpush.bf16.msrb.mxu3 %v6054_v8  ;;  %v2977_v36 = vadd.f32 %v2976_v49, %v7890_v44  ;;  %v5898_v39 = vor.u32 %v7216_v51, %v5895_v46  ;;  %v6186_v8 = vor.u32 %v7288_v61, %v6183_v62  ;;  %v7112_v30 = vld [vmem:[#allocation7 + $0x25c] sm:$0xf] }
 0x2fc   :  { %v5834_v35 = vor.u32 %v7200_v28, %v5831_v54  ;;  %v5479_v24 = vld [vmem:[#allocation7 + $0x278] sm:$0xf0]  ;;  %v6274_v51 = vor.u32 %v7315_v23, %v6273_v22  ;;  %v6237_v23 = vld [vmem:[#allocation8 + $0x60] sm:$0xf] }
 0x2fd   :  { %2902 = vmatpush.bf16.msra.mxu0 %v5354_v63  ;;  %2880 = vmatpush.bf16.msrb.mxu2 %v5734_v12  ;;  %v7894_v63 = vpop.f32.mrf.mxu1  ;;  %v2978_v5 = vrot.slane %v2977_v36, 2  ;;  %v2651_v12 = vpop.f32.mrf.mxu0  ;;  %v7272_v56 = vld [vmem:[#allocation7 + $0x75c] sm:$0xf]  ;;  %v5482_v55 = vor.u32 %v7112_v30, %v5479_v24  ;;  %v6225_v24 = vld [vmem:[#allocation8 + $0x48] sm:$0xf] }
 0x2fe   :  { %v7192_v50 = vld [vmem:[#allocation7 + $0x4dc] sm:$0xf] }
 0x2ff   :  { %2914 = vmatpush.bf16.msra.mxu1 %v5642_v11  ;;  %2892 = vmatpush.bf16.msrb.mxu3 %v6022_v29  ;;  %v2979_v11 = vadd.f32 %v2978_v5, %v2977_v36  ;;  %v6154_v29 = vor.u32 %v7280_v16, %v6151_v17  ;;  %v2625_v41 = vpop.f32.mrf.mxu2  ;;  %v5799_v45 = vld [vmem:[#allocation7 + $0x4f8] sm:$0xf0]  ;;  %v6370_v17 = vor.u32 %v7339_v2, %v6369_v1 }
 0x300   :  { %v7104_v49 = vld [vmem:[#allocation7 + $0x21c] sm:$0xf]  ;;  %v5802_v59 = vor.u32 %v7192_v50, %v5799_v45  ;;  %v7303_v41 = vld [vmem:[#allocation8 + $0x50] sm:$0xf0]  ;;  %v7333_v50 = vld [vmem:[#allocation8 + $0x140] sm:$0xf0] }
 0x301   :  { %2903 = vmatpush.bf16.msra.mxu0 %v5322_v19  ;;  %2881 = vmatpush.bf16.msrb.mxu2 %v5702_v34  ;;  %v7040_v19 = vld [vmem:[#allocation7 + $0x1c] sm:$0xf]  ;;  %v2980_v21 = vrot.slane %v2979_v11, 1 }
 0x302   :  { %v5194_v34 = vor.u32 %v7040_v19, %v5191_v26  ;;  %v7312_v48 = vld [vmem:[#allocation8 + $0x98] sm:$0xf0]  ;;  %v6357_v26 = vld [vmem:[#allocation8 + $0x150] sm:$0xf] }
 0x303   :  { %2915 = vmatpush.bf16.msra.mxu1 %v5610_v33  ;;  %2893 = vmatpush.bf16.msrb.mxu3 %v5990_v18  ;;  %v2981_v31 = vadd.f32 %v2980_v21, %v2979_v11  ;;  %v2636_v33 = vpop.f32.mrf.mxu3  ;;  %v6261_v18 = vld [vmem:[#allocation8 + $0x90] sm:$0xf]  ;;  %v5447_v58 = vld [vmem:[#allocation7 + $0x238] sm:$0xf0] }
 0x304   :  { %2882 = vmatmul.bf16.vlgmr.msrb.gmra.mxu2 %v7848_v14  ;;  %v7184_v61 = vld [vmem:[#allocation7 + $0x49c] sm:$0xf]  ;;  %v6262_v42 = vor.u32 %v7312_v48, %v6261_v18 }
 0x305   :  { %2904 = vmatpush.bf16.msra.mxu0 %v5290_v38  ;;  %2926 = vmatpush.bf16.msra.mxu2 %v5930_v0  ;;  %v6119_v38 = vld [vmem:[#allocation7 + $0x778] sm:$0xf0]  ;;  %v2637_v0 = vadd.f32 %v2636_v33, %v2624_v25  ;;  %v2664_v43 = vpop.f32.mrf.mxu1  ;;  %v3024_v46 = vmul.f32 %v2981_v31, %v7758_v13  ;;  %v7306_v25 = vld [vmem:[#allocation8 + $0x68] sm:$0xf0] }
 0x306   :  { %v6122_v57 = vor.u32 %v7272_v56, %v6119_v38  ;;  %v5767_v40 = vld [vmem:[#allocation7 + $0x4b8] sm:$0xf0]  ;;  %v2663_v38 = vadd.f32 %v7894_v63, %v7888_v37  ;;  %v6345_v43 = vld [vmem:[#allocation8 + $0x138] sm:$0xf] }
 0x307   :  { %2916 = vmatpush.bf16.msra.mxu1 %v5578_v52  ;;  %2894 = vmatpush.bf16.msrb.mxu3 %v5958_v6  ;;  %vm2953_vm2 = vcmp.gt.f32.partialorder %v2637_v0, 0.0  ;;  %v2961_v52 = vmul.f32 0.02, %v2637_v0  ;;  %v7902_v36 = vsub.f32 %v7890_v44, %v3024_v46  ;;  %v6249_v44 = vld [vmem:[#allocation8 + $0x78] sm:$0xf]  ;;  %v2675_v22 = vpop.f32.mrf.mxu2 }
 0x308   :  { %v7309_v6 = vld [vmem:[#allocation8 + $0x80] sm:$0xf0]  ;;  %v7256_v9 = vld [vmem:[#allocation7 + $0x6dc] sm:$0xf]  ;;  %v6465_v46 = vld [vmem:[#allocation8 + $0x228] sm:$0xf]  ;;  %v2676_v18 = vadd.f32 %v2675_v22, %v2663_v38 }
 0x309   :  { %2905 = vmatpush.bf16.msra.mxu0 %v5258_v60  ;;  %2927 = vmatpush.bf16.msra.mxu2 %v5898_v39  ;;  %v7264_v60 = vld [vmem:[#allocation7 + $0x71c] sm:$0xf]  ;;  %v7904_v62 = vsel %vm2953_vm2, %v2637_v0, %v2961_v52  ;;  %v3040_v3 = vmul.f32 %v7902_v36, %v7902_v36  ;;  %v6250_v20 = vor.u32 %v7309_v6, %v6249_v44  ;;  %v6453_v6 = vld [vmem:[#allocation8 + $0x210] sm:$0xf] }
 0x30a   :  { %2895 = vmatmul.bf16.vlgmr.msrb.gmra.mxu3 %v7854_v4  ;;  %v6087_v39 = vld [vmem:[#allocation7 + $0x738] sm:$0xf0]  ;;  %v2982_v5 = vrot.slane %v7904_v62, 4  ;;  %v6238_v0 = vor.u32 %v7306_v25, %v6237_v23  ;;  %v6309_v38 = vld [vmem:[#allocation8 + $0xf0] sm:$0xf] }
 0x30b   :  { %2917 = vmatpush.bf16.msra.mxu1 %v5546_v7  ;;  %2939 = vmatpush.bf16.msra.mxu3 %v6186_v8  ;;  %v5450_v7 = vor.u32 %v7104_v49, %v5447_v58  ;;  %v6090_v8 = vor.u32 %v7264_v60, %v6087_v39  ;;  %v3048_v10 = vrot.slane %v3040_v3, 4  ;;  %v2638_v12 = vpop.f32.mrf.mxu3  ;;  %v7176_v16 = vld [vmem:[#allocation7 + $0x45c] sm:$0xf]  ;;  %v7363_v49 = vld [vmem:[#allocation8 + $0x230] sm:$0xf0]  ;;  %v6346_v60 = vor.u32 %v7333_v50, %v6345_v43 }
 0x30c   :  { %v2983_v11 = vadd.f32 %v2982_v5, %v7904_v62  ;;  %v5735_v19 = vld [vmem:[#allocation7 + $0x478] sm:$0xf0]  ;;  %v6466_v1 = vor.u32 %v7363_v49, %v6465_v46  ;;  %v6429_v50 = vld [vmem:[#allocation8 + $0x1e0] sm:$0xf] }
 0x30d   :  { %2906 = vmatpush.bf16.msra.mxu0 %v5226_v53  ;;  %2928 = vmatpush.bf16.msra.mxu2 %v5866_v15  ;;  %v5770_v53 = vor.u32 %v7184_v61, %v5767_v40  ;;  %v6055_v15 = vld [vmem:[#allocation7 + $0x6f8] sm:$0xf0]  ;;  %v3049_v54 = vadd.f32 %v3048_v10, %v3040_v3  ;;  %v6226_v61 = vor.u32 %v7303_v41, %v6225_v24  ;;  %v6333_v40 = vld [vmem:[#allocation8 + $0x120] sm:$0xf] }
 0x30e   :  { %v7336_v28 = vld [vmem:[#allocation8 + $0x158] sm:$0xf0]  ;;  %v2984_v21 = vrot.slane %v2983_v11, 2 }
 0x30f   :  { %2918 = vmatpush.bf16.msra.mxu1 %v5514_v27  ;;  %2940 = vmatpush.bf16.msra.mxu3 %v6154_v29  ;;  %v6058_v27 = vor.u32 %v7256_v9, %v6055_v15  ;;  %v6023_v29 = vld [vmem:[#allocation7 + $0x6b8] sm:$0xf0]  ;;  %v3050_v31 = vrot.slane %v3049_v54, 2  ;;  %v6358_v56 = vor.u32 %v7336_v28, %v6357_v26  ;;  %v2677_v5 = vpop.f32.mrf.mxu2  ;;  %v7297_v15 = vld [vmem:[#allocation8 + $0x20] sm:$0xf0] }
 0x310   :  { %v7168_v30 = vld [vmem:[#allocation7 + $0x41c] sm:$0xf]  ;;  %v2985_v33 = vadd.f32 %v2984_v21, %v2983_v11  ;;  %v6321_v26 = vld [vmem:[#allocation8 + $0x108] sm:$0xf]  ;;  %v7327_v28 = vld [vmem:[#allocation8 + $0x110] sm:$0xf0] }
 0x311   :  { %2907 = vmatpush.bf16.msra.mxu0 %v5194_v34  ;;  %2929 = vmatpush.bf16.msra.mxu2 %v5834_v35  ;;  %v5738_v34 = vor.u32 %v7176_v16, %v5735_v19  ;;  %v5703_v35 = vld [vmem:[#allocation7 + $0x438] sm:$0xf0]  ;;  %v3051_v45 = vadd.f32 %v3050_v31, %v3049_v54  ;;  %v7914_v58 = vpop.f32.mrf.mxu0  ;;  %v6441_v21 = vld [vmem:[#allocation8 + $0x1f8] sm:$0xf] }
 0x312   :  { %v5706_v37 = vor.u32 %v7168_v30, %v5703_v35  ;;  %v7240_v63 = vld [vmem:[#allocation7 + $0x65c] sm:$0xf]  ;;  %v6322_v35 = vor.u32 %v7327_v28, %v6321_v26  ;;  %v6393_v26 = vld [vmem:[#allocation8 + $0x198] sm:$0xf]  ;;  %v7345_v28 = vld [vmem:[#allocation8 + $0x1a0] sm:$0xf0] }
 0x313   :  { %2919 = vmatpush.bf16.msra.mxu1 %v5482_v55  ;;  %2941 = vmatpush.bf16.msra.mxu3 %v6122_v57  ;;  %v3052_v52 = vrot.slane %v3051_v45, 1  ;;  %v2688_v57 = vpop.f32.mrf.mxu3  ;;  %v7300_v44 = vld [vmem:[#allocation8 + $0x38] sm:$0xf0] }
 0x314   :  { %2908 = vmatmul.bf16.vlgmr.msra.gmra.mxu0 %v7836_v32  ;;  %v7248_v32 = vld [vmem:[#allocation7 + $0x69c] sm:$0xf]  ;;  %v2689_v39 = vadd.f32 %v2688_v57, %v2676_v18 }
 0x315   :  { %4496 = vmatpush.bf16.msrb.mxu0 %v6274_v51  ;;  %2930 = vmatpush.bf16.msra.mxu2 %v5802_v59  ;;  %v2986_v51 = vrot.slane %v2985_v33, 1  ;;  %v6026_v48 = vor.u32 %v7248_v32, %v6023_v29  ;;  %v5991_v59 = vld [vmem:[#allocation7 + $0x678] sm:$0xf0]  ;;  %v3053_v2 = vadd.f32 %v3052_v52, %v3051_v45  ;;  %v7354_v45 = vld [vmem:[#allocation8 + $0x1e8] sm:$0xf0] }
 0x316   :  { %vm2954_vm3 = vcmp.gt.f32.partialorder %v2689_v39, 0.0  ;;  %v5994_v9 = vor.u32 %v7240_v63, %v5991_v59  ;;  %v7232_v10 = vld [vmem:[#allocation7 + $0x61c] sm:$0xf]  ;;  %v7321_v52 = vld [vmem:[#allocation8 + $0xe0] sm:$0xf0] }
 0x317   :  { %2920 = vmatpush.bf16.msra.mxu1 %v5450_v7  ;;  %2942 = vmatpush.bf16.msra.mxu3 %v6090_v8  ;;  %v2987_v55 = vadd.f32 %v2986_v51, %v2985_v33  ;;  %v7360_v7 = vld [vmem:[#allocation8 + $0x218] sm:$0xf0]  ;;  %v2962_v8 = vmul.f32 0.02, %v2689_v39  ;;  %v7926_v23 = vpop.f32.mrf.mxu1 }
 0x318   :  { %v5959_v12 = vld [vmem:[#allocation7 + $0x638] sm:$0xf0]  ;;  %v6454_v54 = vor.u32 %v7360_v7, %v6453_v6  ;;  %v6405_v7 = vld [vmem:[#allocation8 + $0x1b0] sm:$0xf] }
 0x319   :  { %4497 = vmatpush.bf16.msrb.mxu0 %v6262_v42  ;;  %2931 = vmatpush.bf16.msra.mxu2 %v5770_v53  ;;  %v7330_v42 = vld [vmem:[#allocation8 + $0x128] sm:$0xf0]  ;;  %v3025_v3 = vmul.f32 %v2987_v55, %v7758_v13  ;;  %v6201_v53 = vld [vmem:[#allocation8 + $0x18] sm:$0xf]  ;;  %v7921_v19 = vsel %vm2954_vm3, %v2689_v39, %v2962_v8  ;;  %v5962_v32 = vor.u32 %v7232_v10, %v5959_v12  ;;  %v2703_v33 = vpop.f32.mrf.mxu0  ;;  %v7351_v39 = vld [vmem:[#allocation8 + $0x1d0] sm:$0xf0] }
 0x31a   :  { %2921 = vmatmul.bf16.vlgmr.msra.gmra.mxu1 %v7843_v47  ;;  %v6213_v47 = vld [vmem:[#allocation8 + $0x30] sm:$0xf]  ;;  %v6334_v16 = vor.u32 %v7330_v42, %v6333_v40  ;;  %v2988_v22 = vrot.slane %v7921_v19, 4  ;;  %v6202_v24 = vor.u32 %v7297_v15, %v6201_v53  ;;  %v6430_v55 = vor.u32 %v7354_v45, %v6429_v50  ;;  %v7387_v33 = vld [vmem:[#allocation8 + $0x2f0] sm:$0xf0] }
 0x31b   :  { %4509 = vmatpush.bf16.msrb.mxu1 %v6370_v17  ;;  %2943 = vmatpush.bf16.msra.mxu3 %v6058_v27  ;;  %v7918_v11 = vsub.f32 %v7904_v62, %v3025_v3  ;;  %v3096_v17 = vmul.f32 %v3053_v2, %v7758_v13  ;;  %v7357_v27 = vld [vmem:[#allocation8 + $0x200] sm:$0xf0]  ;;  %v2690_v31 = vpop.f32.mrf.mxu3  ;;  %v6285_v2 = vld [vmem:[#allocation8 + $0xc0] sm:$0xf]  ;;  %v7318_v3 = vld [vmem:[#allocation8 + $0xc8] sm:$0xf0] }
 0x31c   :  { %v2989_v30 = vadd.f32 %v2988_v22, %v7921_v19  ;;  %v6442_v41 = vor.u32 %v7357_v27, %v6441_v21  ;;  %v6286_v10 = vor.u32 %v7318_v3, %v6285_v2  ;;  %v6561_v22 = vld [vmem:[#allocation8 + $0x2e8] sm:$0xf]  ;;  %v7342_v31 = vld [vmem:[#allocation8 + $0x188] sm:$0xf0]  ;;  %v7384_v50 = vld [vmem:[#allocation8 + $0x2d8] sm:$0xf0] }
 0x31d   :  { %4498 = vmatpush.bf16.msrb.mxu0 %v6250_v20  ;;  %2932 = vmatpush.bf16.msra.mxu2 %v5738_v34  ;;  %v6214_v20 = vor.u32 %v7300_v44, %v6213_v47  ;;  %v3041_v62 = vmul.f32 %v7918_v11, %v7918_v11  ;;  %v7928_v25 = vadd.f32 1e-05, %v3096_v17  ;;  %v6189_v34 = vld [vmem:[#allocation8] sm:$0xf] }
 0x31f   :  { %4510 = vmatpush.bf16.msrb.mxu1 %v6358_v56  ;;  %2944 = vmatpush.bf16.msra.mxu3 %v6026_v48  ;;  %v3054_v29 = vrot.slane %v3041_v62, 4  ;;  %7516 = vrsqrt.f32 %v7928_v25  ;;  %v7294_v56 = vld [vmem:[#allocation8 + $0x8] sm:$0xf0]  ;;  %v6297_v48 = vld [vmem:[#allocation8 + $0xd8] sm:$0xf]  ;;  %v2716_v59 = vpop.f32.mrf.mxu1  ;;  %vm3118_vm5 = vweird.f32 %v7928_v25 }
 0x320   :  { %v6190_v18 = vor.u32 %v7294_v56, %v6189_v34  ;;  %v6298_v42 = vor.u32 %v7321_v52, %v6297_v48  ;;  %v6562_v34 = vor.u32 %v7387_v33, %v6561_v22  ;;  %v7408_v48 = vld [vmem:[#allocation8 + $0x398] sm:$0xf0]  ;;  %v7381_v59 = vld [vmem:[#allocation8 + $0x2c0] sm:$0xf0] }
 0x321   :  { %4499 = vmatpush.bf16.msrb.mxu0 %v6238_v0  ;;  %2933 = vmatpush.bf16.msra.mxu2 %v5706_v37  ;;  %v7324_v0 = vld [vmem:[#allocation8 + $0xf8] sm:$0xf0]  ;;  %v3055_v43 = vadd.f32 %v3054_v29, %v3041_v62  ;;  %v6394_v62 = vor.u32 %v7345_v28, %v6393_v26  ;;  %v7402_v26 = vld [vmem:[#allocation8 + $0x368] sm:$0xf0] }
 0x322   :  { %v6310_v49 = vor.u32 %v7324_v0, %v6309_v38 }
 0x323   :  { %4511 = vmatpush.bf16.msrb.mxu1 %v6346_v60  ;;  %2945 = vmatpush.bf16.msra.mxu3 %v5994_v9  ;;  %v3056_v51 = vrot.slane %v3055_v43, 2  ;;  %v6417_v60 = vld [vmem:[#allocation8 + $0x1c8] sm:$0xf] }
 0x324   :  { %2934 = vmatmul.bf16.vlgmr.msra.gmra.mxu2 %v7848_v14  ;;  %v2990_v14 = vrot.slane %v2989_v30, 2  ;;  %v6418_v5 = vor.u32 %v7351_v39, %v6417_v60 }
 0x325   :  { %4500 = vmatpush.bf16.msrb.mxu0 %v6226_v61  ;;  %4522 = vmatpush.bf16.msrb.mxu2 %v6466_v1  ;;  %v7517_v57 = vpop.eup %7516  ;;  %v3057_v37 = vadd.f32 %v3056_v51, %v3055_v43 }
 0x326   :  { %v2991_v46 = vadd.f32 %v2990_v14, %v2989_v30  ;;  %v3113_v61 = vmul.f32 %v7517_v57, %v7928_v25  ;;  %vm3119_vm4 = vweird.f32 %v7517_v57  ;;  %v6381_v30 = vld [vmem:[#allocation8 + $0x180] sm:$0xf]  ;;  %v6657_v25 = vld [vmem:[#allocation8 + $0x3a8] sm:$0xf]  ;;  %v6549_v14 = vld [vmem:[#allocation8 + $0x2d0] sm:$0xf] }
 0x327   :  { %4512 = vmatpush.bf16.msrb.mxu1 %v6334_v16  ;;  %2946 = vmatpush.bf16.msra.mxu3 %v5962_v32  ;;  %v3058_v47 = vrot.slane %v3057_v37, 1  ;;  %v2727_v17 = vpop.f32.mrf.mxu2  ;;  %vm3120_vm6 = vmor %vm3118_vm5, %vm3119_vm4  ;;  %v2715_v32 = vadd.f32 %v7926_v23, %v7914_v58  ;;  %v6382_v43 = vor.u32 %v7342_v31, %v6381_v30  ;;  %v7399_v30 = vld [vmem:[#allocation8 + $0x350] sm:$0xf0] }
 0x328   :  { %v2992_v63 = vrot.slane %v2991_v46, 1  ;;  %v3114_v1 = vmul.f32 %v7517_v57, %v3113_v61 }
 0x329   :  { %4501 = vmatpush.bf16.msrb.mxu0 %v6214_v20  ;;  %4523 = vmatpush.bf16.msrb.mxu2 %v6454_v54  ;;  %v3059_v44 = vadd.f32 %v3058_v47, %v3057_v37  ;;  %v2728_v56 = vadd.f32 %v2727_v17, %v2715_v32  ;;  %v6621_v17 = vld [vmem:[#allocation8 + $0x360] sm:$0xf] }
 0x32a   :  { %2947 = vmatmul.bf16.vlgmr.msra.gmra.mxu3 %v7854_v4  ;;  %v2993_v40 = vadd.f32 %v2992_v63, %v2991_v46  ;;  %v7348_v4 = vld [vmem:[#allocation8 + $0x1b8] sm:$0xf0]  ;;  %v3115_v8 = vmul.f32 0.5, %v3114_v1  ;;  %v6550_v46 = vor.u32 %v7384_v50, %v6549_v14  ;;  %v6537_v63 = vld [vmem:[#allocation8 + $0x2b8] sm:$0xf]  ;;  %v6622_v28 = vor.u32 %v7402_v26, %v6621_v17 }
 0x32b   :  { %4513 = vmatpush.bf16.msrb.mxu1 %v6322_v35  ;;  %v3097_v12 = vmul.f32 %v3059_v44, %v7758_v13  ;;  %v6406_v15 = vor.u32 %v7348_v4, %v6405_v7  ;;  %v7411_v35 = vld [vmem:[#allocation8 + $0x3b0] sm:$0xf0]  ;;  %4535 = vmatpush.bf16.msrb.mxu3 %v6562_v34  ;;  %v6538_v61 = vor.u32 %v7381_v59, %v6537_v63  ;;  %v7405_v1 = vld [vmem:[#allocation8 + $0x380] sm:$0xf0]  ;;  %v6525_v4 = vld [vmem:[#allocation8 + $0x2a0] sm:$0xf] }
 0x32c   :  { %v3026_v6 = vmul.f32 %v2993_v40, %v7758_v13  ;;  %v3116_v53 = vsub.f32 1.5, %v3115_v8  ;;  %v6658_v0 = vor.u32 %v7411_v35, %v6657_v25  ;;  %v7378_v8 = vld [vmem:[#allocation8 + $0x2a8] sm:$0xf0]  ;;  %v6501_v25 = vld [vmem:[#allocation8 + $0x270] sm:$0xf] }
 0x32d   :  { %4502 = vmatpush.bf16.msrb.mxu0 %v6202_v24  ;;  %4524 = vmatpush.bf16.msrb.mxu2 %v6442_v41  ;;  %v7942_v20 = vadd.f32 1e-05, %v3097_v12  ;;  %v2740_v41 = vpop.f32.mrf.mxu3  ;;  %v7372_v35 = vld [vmem:[#allocation8 + $0x278] sm:$0xf0]  ;;  %v6477_v63 = vld [vmem:[#allocation8 + $0x240] sm:$0xf] }
 0x32e   :  { %v7937_v9 = vsub.f32 %v7921_v19, %v3026_v6  ;;  %v3117_v54 = vmul.f32 %v7517_v57, %v3116_v53  ;;  %v6526_v53 = vor.u32 %v7378_v8, %v6525_v4  ;;  %v7366_v59 = vld [vmem:[#allocation8 + $0x248] sm:$0xf0] }
 0x32f   :  { %4514 = vmatpush.bf16.msrb.mxu1 %v6310_v49  ;;  %7518 = vrsqrt.f32 %v7942_v20  ;;  %v2729_v51 = vpop.f32.mrf.mxu2  ;;  %4536 = vmatpush.bf16.msrb.mxu3 %v6550_v46  ;;  %vm3128_vm9 = vweird.f32 %v7942_v20 }
 0x330   :  { %v3042_v16 = vmul.f32 %v7937_v9, %v7937_v9  ;;  %v3121_v21 = vsel %vm3120_vm6, %v7517_v57, %v3117_v54 }
 0x331   :  { %4503 = vmatpush.bf16.msrb.mxu0 %v6190_v18  ;;  %4525 = vmatpush.bf16.msrb.mxu2 %v6430_v55  ;;  %v3192_v29 = vmul.f32 %v3121_v21, %v7902_v36  ;;  %v2741_v36 = vadd.f32 %v2740_v41, %v2728_v56  ;;  %v7951_v45 = vpop.f32.mrf.mxu0  ;;  %v6645_v18 = vld [vmem:[#allocation8 + $0x390] sm:$0xf]  ;;  %v6513_v21 = vld [vmem:[#allocation8 + $0x288] sm:$0xf]  ;;  %v6502_v56 = vor.u32 %v7372_v35, %v6501_v25 }
 0x332   :  { %v3060_v19 = vrot.slane %v3042_v16, 4  ;;  %v6646_v57 = vor.u32 %v7408_v48, %v6645_v18  ;;  %v6597_v41 = vld [vmem:[#allocation8 + $0x330] sm:$0xf]  ;;  %v6585_v48 = vld [vmem:[#allocation8 + $0x318] sm:$0xf] }
 0x333   :  { %4515 = vmatpush.bf16.msrb.mxu1 %v6298_v42  ;;  %v7949_v38 = vpack.c.bf16 %v3192_v29, %v3192_v29  ;;  %vm2955_vm7 = vcmp.gt.f32.partialorder %v2741_v36, 0.0  ;;  %v2963_v55 = vmul.f32 0.02, %v2741_v36  ;;  %v6633_v42 = vld [vmem:[#allocation8 + $0x378] sm:$0xf]  ;;  %4537 = vmatpush.bf16.msrb.mxu3 %v6538_v61 }
 0x334   :  { %v3061_v27 = vadd.f32 %v3060_v19, %v3042_v16  ;;  %v6609_v29 = vld [vmem:[#allocation8 + $0x348] sm:$0xf] }
 0x335   :  { %4526 = vmatpush.bf16.msrb.mxu2 %v6418_v5  ;;  %v7519_v58 = vpop.eup %7518  ;;  %4504 = vmatmul.bf16.vlgmr.msrb.gmra.mxu0 %v7949_v38  ;;  %v2971_v39 = vsel %vm2955_vm7, %v2741_v36, %v2963_v55  ;;  %v6634_v5 = vor.u32 %v7405_v1, %v6633_v42  ;;  %v2742_v6 = vpop.f32.mrf.mxu3  ;;  %v6610_v33 = vor.u32 %v7399_v30, %v6609_v29  ;;  %v7369_v36 = vld [vmem:[#allocation8 + $0x260] sm:$0xf0]  ;;  %v7390_v42 = vld [vmem:[#allocation8 + $0x308] sm:$0xf0] }
 0x336   :  { %v3062_v24 = vrot.slane %v3061_v27, 2  ;;  %v3123_v49 = vmul.f32 %v7519_v58, %v7942_v20  ;;  %4548 = vmatpush.bf16.msra.mxu0 %v6658_v0  ;;  %v2994_v47 = vrot.slane %v2971_v39, 4  ;;  %vm3129_vm8 = vweird.f32 %v7519_v58 }
 0x337   :  { %4516 = vmatpush.bf16.msrb.mxu1 %v6286_v10  ;;  %v7955_v2 = vpop.f32.mrf.mxu1  ;;  %vm3130_vm10 = vmor %vm3128_vm9, %vm3129_vm8  ;;  %4538 = vmatpush.bf16.msrb.mxu3 %v6526_v53 }
 0x338   :  { %v3063_v23 = vadd.f32 %v3062_v24, %v3061_v27  ;;  %v3124_v37 = vmul.f32 %v7519_v58, %v3123_v49  ;;  %v2995_v44 = vadd.f32 %v2994_v47, %v2971_v39  ;;  %v2767_v61 = vadd.f32 %v7955_v2, %v7951_v45 }
 0x339   :  { %4527 = vmatpush.bf16.msrb.mxu2 %v6406_v15  ;;  %v2755_v10 = vpop.f32.mrf.mxu0 }
 0x33a   :  { %v3064_v52 = vrot.slane %v3063_v23, 1  ;;  %v3125_v40 = vmul.f32 0.5, %v3124_v37  ;;  %4549 = vmatpush.bf16.msra.mxu0 %v6646_v57  ;;  %v2996_v15 = vrot.slane %v2995_v44, 2  ;;  %v6275_v10 = vld [vmem:[#allocation8 + $0xb4] sm:$0xf0] }
 0x33c   :  { %v3065_v60 = vadd.f32 %v3064_v52, %v3063_v23  ;;  %v3126_v7 = vsub.f32 1.5, %v3125_v40  ;;  %v2997_v54 = vadd.f32 %v2996_v15, %v2995_v44  ;;  %v6489_v23 = vld [vmem:[#allocation8 + $0x258] sm:$0xf]  ;;  %v7393_v52 = vld [vmem:[#allocation8 + $0x320] sm:$0xf0] }
 0x33d   :  { %4528 = vmatpush.bf16.msrb.mxu2 %v6394_v62  ;;  %v7375_v62 = vld [vmem:[#allocation8 + $0x290] sm:$0xf0]  ;;  %v6490_v51 = vor.u32 %v7369_v36, %v6489_v23  ;;  %v6586_v55 = vor.u32 %v7393_v52, %v6585_v48  ;;  %v6573_v40 = vld [vmem:[#allocation8 + $0x300] sm:$0xf]  ;;  %v7314_v44 = vld [vmem:[#allocation8 + $0xac] sm:$0xf] }
 0x33e   :  { %v3098_v3 = vmul.f32 %v3065_v60, %v7758_v13  ;;  %v3127_v16 = vmul.f32 %v7519_v58, %v3126_v7  ;;  %4550 = vmatpush.bf16.msra.mxu0 %v6634_v5  ;;  %v6514_v27 = vor.u32 %v7375_v62, %v6513_v21  ;;  %v2998_v32 = vrot.slane %v2997_v54, 1  ;;  %v7435_v5 = vld [vmem:[#allocation8 + $0x470] sm:$0xf0]  ;;  %v6717_v23 = vld [vmem:[#allocation8 + $0x420] sm:$0xf] }
 0x33f   :  { %v2768_v31 = vpop.f32.mrf.mxu1  ;;  %v6478_v60 = vor.u32 %v7366_v59, %v6477_v63  ;;  %v6574_v1 = vor.u32 %v7390_v42, %v6573_v40  ;;  %v6278_v15 = vor.u32 %v7314_v44, %v6275_v10  ;;  %v7426_v36 = vld [vmem:[#allocation8 + $0x428] sm:$0xf0] }
 0x340   :  { %v3106_v12 = vadd.f32 1e-05, %v3098_v3  ;;  %v3131_v19 = vsel %vm3130_vm10, %v7519_v58, %v3127_v16  ;;  %v2999_v34 = vadd.f32 %v2998_v32, %v2997_v54  ;;  %4539 = vmatpush.bf16.msrb.mxu3 %v6514_v27  ;;  %v6753_v3 = vld [vmem:[#allocation8 + $0x468] sm:$0xf]  ;;  %v7432_v54 = vld [vmem:[#allocation8 + $0x458] sm:$0xf0] }
 0x341   :  { %4529 = vmatpush.bf16.msrb.mxu2 %v6382_v43  ;;  %v3193_v22 = vmul.f32 %v3131_v19, %v7918_v11  ;;  %v7396_v43 = vld [vmem:[#allocation8 + $0x338] sm:$0xf0]  ;;  %v6754_v8 = vor.u32 %v7435_v5, %v6753_v3  ;;  %v7311_v19 = vld [vmem:[#allocation8 + $0x94] sm:$0xf]  ;;  %v6263_v27 = vld [vmem:[#allocation8 + $0x9c] sm:$0xf0] }
 0x342   :  { %7520 = vrsqrt.f32 %v3106_v12  ;;  %4551 = vmatpush.bf16.msra.mxu0 %v6622_v28  ;;  %v3027_v0 = vmul.f32 %v2999_v34, %v7758_v13  ;;  %v6598_v14 = vor.u32 %v7396_v43, %v6597_v41  ;;  %vm3138_vm12 = vweird.f32 %v3106_v12  ;;  %v6741_v28 = vld [vmem:[#allocation8 + $0x450] sm:$0xf]  ;;  %v6729_v31 = vld [vmem:[#allocation8 + $0x438] sm:$0xf]  ;;  %v7302_v59 = vld [vmem:[#allocation8 + $0x4c] sm:$0xf] }
 0x343   :  { %v7960_v20 = vpack.c.bf16 %v3193_v22, %v3193_v22  ;;  %4561 = vmatpush.bf16.msra.mxu1 %v6754_v8  ;;  %v6742_v22 = vor.u32 %v7432_v54, %v6741_v28  ;;  %v7420_v3 = vld [vmem:[#allocation8 + $0x3f8] sm:$0xf0]  ;;  %v7299_v5 = vld [vmem:[#allocation8 + $0x34] sm:$0xf]  ;;  %v6203_v28 = vld [vmem:[#allocation8 + $0x24] sm:$0xf0] }
 0x344   :  { %v7964_v50 = vsub.f32 %v2971_v39, %v3027_v0  ;;  %4540 = vmatpush.bf16.msrb.mxu3 %v6502_v56  ;;  %v6251_v56 = vld [vmem:[#allocation8 + $0x84] sm:$0xf0] }
 0x345   :  { %4517 = vmatmul.bf16.vlgmr.msrb.gmra.mxu1 %v7960_v20 }
 0x346   :  { %4552 = vmatpush.bf16.msra.mxu0 %v6610_v33  ;;  %v3043_v46 = vmul.f32 %v7964_v50, %v7964_v50  ;;  %v7429_v33 = vld [vmem:[#allocation8 + $0x440] sm:$0xf0] }
 0x347   :  { %v2779_v49 = vpop.f32.mrf.mxu2  ;;  %4562 = vmatpush.bf16.msra.mxu1 %v6742_v22  ;;  %v6730_v35 = vor.u32 %v7429_v33, %v6729_v31  ;;  %v7447_v22 = vld [vmem:[#allocation8 + $0x4d0] sm:$0xf0] }
 0x348   :  { %v7521_v24 = vpop.eup %7520  ;;  %v3066_v57 = vrot.slane %v3043_v46, 4  ;;  %4541 = vmatpush.bf16.msrb.mxu3 %v6490_v51  ;;  %v2780_v7 = vadd.f32 %v2779_v49, %v2767_v61  ;;  %v6718_v51 = vor.u32 %v7426_v36, %v6717_v23  ;;  %v6239_v49 = vld [vmem:[#allocation8 + $0x6c] sm:$0xf0] }
 0x349   :  { %v3133_v11 = vmul.f32 %v7521_v24, %v3106_v12  ;;  %vm3139_vm11 = vweird.f32 %v7521_v24 }
 0x34a   :  { %4553 = vmatpush.bf16.msra.mxu0 %v6598_v14  ;;  %v3067_v39 = vadd.f32 %v3066_v57, %v3043_v46  ;;  %vm3140_vm13 = vmor %vm3138_vm12, %vm3139_vm11  ;;  %v7305_v46 = vld [vmem:[#allocation8 + $0x64] sm:$0xf]  ;;  %v7423_v57 = vld [vmem:[#allocation8 + $0x410] sm:$0xf0] }
 0x34b   :  { %v3134_v58 = vmul.f32 %v7521_v24, %v3133_v11  ;;  %4563 = vmatpush.bf16.msra.mxu1 %v6730_v35  ;;  %v6242_v48 = vor.u32 %v7305_v46, %v6239_v49  ;;  %v6849_v35 = vld [vmem:[#allocation8 + $0x528] sm:$0xf] }
 0x34c   :  { %v3068_v6 = vrot.slane %v3067_v39, 2  ;;  %4542 = vmatpush.bf16.msrb.mxu3 %v6478_v60  ;;  %v6227_v60 = vld [vmem:[#allocation8 + $0x54] sm:$0xf0] }
 0x34d   :  { %v3135_v18 = vmul.f32 0.5, %v3134_v58  ;;  %v2792_v12 = vpop.f32.mrf.mxu3  ;;  %v6230_v61 = vor.u32 %v7302_v59, %v6227_v60 }
 0x34e   :  { %4554 = vmatpush.bf16.msra.mxu0 %v6586_v55  ;;  %v3069_v45 = vadd.f32 %v3068_v6, %v3067_v39  ;;  %v2793_v2 = vadd.f32 %v2792_v12, %v2780_v7  ;;  %v6705_v55 = vld [vmem:[#allocation8 + $0x408] sm:$0xf]  ;;  %v6215_v6 = vld [vmem:[#allocation8 + $0x3c] sm:$0xf0] }
 0x34f   :  { %v3136_v37 = vsub.f32 1.5, %v3135_v18  ;;  %v2781_v17 = vpop.f32.mrf.mxu2  ;;  %4564 = vmatpush.bf16.msra.mxu1 %v6718_v51  ;;  %v6706_v63 = vor.u32 %v7423_v57, %v6705_v55  ;;  %v6218_v8 = vor.u32 %v7299_v5, %v6215_v6  ;;  %v7456_v55 = vld [vmem:[#allocation8 + $0x518] sm:$0xf0]  ;;  %v6359_v57 = vld [vmem:[#allocation8 + $0x15c] sm:$0xf0] }
 0x350   :  { %v3070_v21 = vrot.slane %v3069_v45, 1  ;;  %vm2956_vm14 = vcmp.gt.f32.partialorder %v2793_v2, 0.0  ;;  %v2964_v62 = vmul.f32 0.02, %v2793_v2  ;;  %v7296_v17 = vld [vmem:[#allocation8 + $0x1c] sm:$0xf] }
 0x351   :  { %v3137_v47 = vmul.f32 %v7521_v24, %v3136_v37  ;;  %v7971_v16 = vpop.f32.mrf.mxu0  ;;  %v6347_v6 = vld [vmem:[#allocation8 + $0x144] sm:$0xf0] }
 0x352   :  { %4555 = vmatpush.bf16.msra.mxu0 %v6574_v1  ;;  %v3071_v32 = vadd.f32 %v3070_v21, %v3069_v45  ;;  %v2972_v29 = vsel %vm2956_vm14, %v2793_v2, %v2964_v62  ;;  %v6693_v1 = vld [vmem:[#allocation8 + $0x3f0] sm:$0xf]  ;;  %v7417_v45 = vld [vmem:[#allocation8 + $0x3e0] sm:$0xf0]  ;;  %v6206_v21 = vor.u32 %v7296_v17, %v6203_v28 }
 0x353   :  { %v3141_v4 = vsel %vm3140_vm13, %v7521_v24, %v3137_v47  ;;  %v3000_v30 = vrot.slane %v2972_v29, 4  ;;  %v7308_v24 = vld [vmem:[#allocation8 + $0x7c] sm:$0xf]  ;;  %4565 = vmatpush.bf16.msra.mxu1 %v6706_v63  ;;  %v6694_v44 = vor.u32 %v7420_v3, %v6693_v1  ;;  %v6335_v28 = vld [vmem:[#allocation8 + $0x12c] sm:$0xf0] }
 0x354   :  { %v3194_v53 = vmul.f32 %v3141_v4, %v7937_v9  ;;  %v6266_v9 = vor.u32 %v7311_v19, %v6263_v27  ;;  %v3099_v25 = vmul.f32 %v3071_v32, %v7758_v13  ;;  %v6254_v41 = vor.u32 %v7308_v24, %v6251_v56  ;;  %v6669_v32 = vld [vmem:[#allocation8 + $0x3c0] sm:$0xf]  ;;  %v7459_v24 = vld [vmem:[#allocation8 + $0x530] sm:$0xf0]  ;;  %v7332_v1 = vld [vmem:[#allocation8 + $0x13c] sm:$0xf] }
 0x355   :  { %v3001_v0 = vadd.f32 %v3000_v30, %v2972_v29  ;;  %v2794_v11 = vpop.f32.mrf.mxu3  ;;  %v7293_v30 = vld [vmem:[#allocation8 + $0x4] sm:$0xf] }
 0x356   :  { %v7973_v26 = vpack.c.bf16 %v3194_v53, %v3194_v53  ;;  %4600 = vmatpush.bf16.msrb.mxu0 %v6278_v15  ;;  %v3107_v14 = vadd.f32 1e-05, %v3099_v25  ;;  %v6681_v15 = vld [vmem:[#allocation8 + $0x3d8] sm:$0xf]  ;;  %v6191_v25 = vld [vmem:[#allocation8 + $0xc] sm:$0xf0] }
 0x357   :  { %v2818_v34 = vpop.f32.mrf.mxu1  ;;  %v3002_v58 = vrot.slane %v3001_v0, 2  ;;  %4566 = vmatpush.bf16.msra.mxu1 %v6694_v44  ;;  %v6682_v2 = vor.u32 %v7417_v45, %v6681_v15  ;;  %v7338_v11 = vld [vmem:[#allocation8 + $0x16c] sm:$0xf]  ;;  %v7329_v45 = vld [vmem:[#allocation8 + $0x124] sm:$0xf] }
 0x358   :  { %4530 = vmatmul.bf16.vlgmr.msrb.gmra.mxu2 %v7973_v26  ;;  %7522 = vrsqrt.f32 %v3107_v14  ;;  %vm3148_vm0 = vweird.f32 %v3107_v14  ;;  %v2819_v62 = vadd.f32 %v2818_v34, %v7971_v16  ;;  %v6194_v34 = vor.u32 %v7293_v30, %v6191_v25  ;;  %v7450_v15 = vld [vmem:[#allocation8 + $0x4e8] sm:$0xf0] }
 0x359   :  { %v2807_v43 = vpop.f32.mrf.mxu0  ;;  %v3003_v18 = vadd.f32 %v3002_v58, %v3001_v0  ;;  %v6850_v0 = vor.u32 %v7459_v24, %v6849_v35  ;;  %v6789_v35 = vld [vmem:[#allocation8 + $0x4b0] sm:$0xf]  ;;  %v7444_v24 = vld [vmem:[#allocation8 + $0x4b8] sm:$0xf0] }
 0x35a   :  { %4601 = vmatpush.bf16.msrb.mxu0 %v6266_v9 }
 0x35b   :  { %v3004_v52 = vrot.slane %v3003_v18, 1  ;;  %4567 = vmatpush.bf16.msra.mxu1 %v6682_v2  ;;  %4574 = vmatpush.bf16.msra.mxu2 %v6850_v0  ;;  %v7323_v0 = vld [vmem:[#allocation8 + $0xf4] sm:$0xf] }
 0x35d   :  { %v3005_v39 = vadd.f32 %v3004_v52, %v3003_v18  ;;  %v6837_v52 = vld [vmem:[#allocation8 + $0x510] sm:$0xf] }
 0x35e   :  { %4602 = vmatpush.bf16.msrb.mxu0 %v6254_v41  ;;  %v7523_v47 = vpop.eup %7522  ;;  %v6371_v41 = vld [vmem:[#allocation8 + $0x174] sm:$0xf0]  ;;  %v6838_v59 = vor.u32 %v7456_v55, %v6837_v52  ;;  %v6299_v55 = vld [vmem:[#allocation8 + $0xe4] sm:$0xf0] }
 0x35f   :  { %v2820_v37 = vpop.f32.mrf.mxu1  ;;  %v3028_v40 = vmul.f32 %v3005_v39, %v7758_v13  ;;  %v3143_v42 = vmul.f32 %v7523_v47, %v3107_v14  ;;  %vm3149_vm15 = vweird.f32 %v7523_v47  ;;  %v6374_v58 = vor.u32 %v7338_v11, %v6371_v41  ;;  %v6311_v11 = vld [vmem:[#allocation8 + $0xfc] sm:$0xf0] }
 0x360   :  { %vm7983_vm1 = vmor %vm3148_vm0, %vm3149_vm15  ;;  %4575 = vmatpush.bf16.msra.mxu2 %v6838_v59  ;;  %v6314_v41 = vor.u32 %v7323_v0, %v6311_v11  ;;  %v7410_v59 = vld [vmem:[#allocation8 + $0x3ac] sm:$0xf] }
 0x361   :  { %v7978_v7 = vsub.f32 %v2972_v29, %v3028_v40  ;;  %v3144_v4 = vmul.f32 %v7523_v47, %v3143_v42  ;;  %v7414_v29 = vld [vmem:[#allocation8 + $0x3c8] sm:$0xf0]  ;;  %v6825_v40 = vld [vmem:[#allocation8 + $0x4f8] sm:$0xf]  ;;  %v7453_v42 = vld [vmem:[#allocation8 + $0x500] sm:$0xf0] }
 0x362   :  { %4603 = vmatpush.bf16.msrb.mxu0 %v6242_v48  ;;  %v6670_v33 = vor.u32 %v7414_v29, %v6669_v32  ;;  %v6826_v44 = vor.u32 %v7453_v42, %v6825_v40  ;;  %v6323_v29 = vld [vmem:[#allocation8 + $0x114] sm:$0xf0]  ;;  %v7317_v40 = vld [vmem:[#allocation8 + $0xc4] sm:$0xf] }
 0x363   :  { %v3044_v10 = vmul.f32 %v7978_v7, %v7978_v7  ;;  %v3145_v53 = vmul.f32 0.5, %v3144_v4 }
 0x364   :  { %4568 = vmatpush.bf16.msra.mxu1 %v6670_v33  ;;  %4576 = vmatpush.bf16.msra.mxu2 %v6826_v44  ;;  %v6287_v44 = vld [vmem:[#allocation8 + $0xcc] sm:$0xf0] }
 0x365   :  { %v3072_v54 = vrot.slane %v3044_v10, 4  ;;  %v3146_v19 = vsub.f32 1.5, %v3145_v53  ;;  %v6813_v53 = vld [vmem:[#allocation8 + $0x4e0] sm:$0xf] }
 0x366   :  { %4604 = vmatpush.bf16.msrb.mxu0 %v6230_v61  ;;  %v6814_v17 = vor.u32 %v7450_v15, %v6813_v53  ;;  %v7483_v53 = vld [vmem:[#allocation8 + $0x5f0] sm:$0xf0] }
 0x367   :  { %v2831_v12 = vpop.f32.mrf.mxu2  ;;  %v3073_v27 = vadd.f32 %v3072_v54, %v3044_v10  ;;  %v3147_v9 = vmul.f32 %v7523_v47, %v3146_v19  ;;  %v6350_v10 = vor.u32 %v7332_v1, %v6347_v6  ;;  %v6338_v54 = vor.u32 %v7329_v45, %v6335_v28 }
 0x368   :  { %v2832_v31 = vadd.f32 %v2831_v12, %v2819_v62  ;;  %4613 = vmatpush.bf16.msrb.mxu1 %v6374_v58  ;;  %4577 = vmatpush.bf16.msra.mxu2 %v6814_v17  ;;  %v6801_v62 = vld [vmem:[#allocation8 + $0x4c8] sm:$0xf]  ;;  %v6647_v17 = vld [vmem:[#allocation8 + $0x39c] sm:$0xf0] }
 0x369   :  { %v3074_v56 = vrot.slane %v3073_v27, 2  ;;  %v3151_v16 = vsel %vm7983_vm1, %v7523_v47, %v3147_v9  ;;  %v6802_v32 = vor.u32 %v7447_v22, %v6801_v62 }
 0x36a   :  { %4605 = vmatpush.bf16.msrb.mxu0 %v6218_v8  ;;  %v3195_v14 = vmul.f32 %v3151_v16, %v7964_v50  ;;  %v7335_v50 = vld [vmem:[#allocation8 + $0x154] sm:$0xf] }
 0x36b   :  { %v3075_v23 = vadd.f32 %v3074_v56, %v3073_v27  ;;  %v6362_v60 = vor.u32 %v7335_v50, %v6359_v57  ;;  %v7326_v27 = vld [vmem:[#allocation8 + $0x10c] sm:$0xf] }
 0x36c   :  { %v7992_v49 = vpack.c.bf16 %v3195_v14, %v3195_v14  ;;  %4578 = vmatpush.bf16.msra.mxu2 %v6802_v32  ;;  %v7480_v32 = vld [vmem:[#allocation8 + $0x5d8] sm:$0xf0] }
 0x36d   :  { %v2844_v43 = vpop.f32.mrf.mxu3  ;;  %v3076_v18 = vrot.slane %v3075_v23, 1  ;;  %4614 = vmatpush.bf16.msrb.mxu1 %v6362_v60  ;;  %v6659_v60 = vld [vmem:[#allocation8 + $0x3b4] sm:$0xf0] }
 0x36e   :  { %4606 = vmatpush.bf16.msrb.mxu0 %v6206_v21  ;;  %v2845_v36 = vadd.f32 %v2844_v43, %v2832_v31  ;;  %4543 = vmatmul.bf16.vlgmr.msrb.gmra.mxu3 %v7992_v49  ;;  %v6326_v31 = vor.u32 %v7326_v27, %v6323_v29  ;;  %v6933_v27 = vld [vmem:[#allocation8 + $0x5d0] sm:$0xf]  ;;  %v7359_v29 = vld [vmem:[#allocation8 + $0x214] sm:$0xf] }
 0x36f   :  { %v2833_v46 = vpop.f32.mrf.mxu2  ;;  %v3077_v37 = vadd.f32 %v3076_v18, %v3075_v23  ;;  %v6777_v23 = vld [vmem:[#allocation8 + $0x498] sm:$0xf] }
 0x370   :  { %vm2957_vm2 = vcmp.gt.f32.partialorder %v2845_v36, 0.0  ;;  %v2965_v48 = vmul.f32 0.02, %v2845_v36  ;;  %v7320_v46 = vld [vmem:[#allocation8 + $0xdc] sm:$0xf] }
 0x371   :  { %v7990_v51 = vpop.f32.mrf.mxu0  ;;  %v3100_v61 = vmul.f32 %v3077_v37, %v7758_v13  ;;  %4615 = vmatpush.bf16.msrb.mxu1 %v6350_v10  ;;  %v6302_v50 = vor.u32 %v7320_v46, %v6299_v55  ;;  %v6290_v10 = vor.u32 %v7317_v40, %v6287_v44  ;;  %v6443_v46 = vld [vmem:[#allocation8 + $0x204] sm:$0xf0]  ;;  %v6431_v40 = vld [vmem:[#allocation8 + $0x1ec] sm:$0xf0]  ;;  %v6611_v44 = vld [vmem:[#allocation8 + $0x354] sm:$0xf0] }
 0x372   :  { %4607 = vmatpush.bf16.msrb.mxu0 %v6194_v34  ;;  %v2973_v63 = vsel %vm2957_vm2, %v2845_v36, %v2965_v48  ;;  %v6790_v34 = vor.u32 %v7444_v24, %v6789_v35  ;;  %v7441_v36 = vld [vmem:[#allocation8 + $0x4a0] sm:$0xf0] }
 0x373   :  { %v3006_v39 = vrot.slane %v2973_v63, 4  ;;  %v3108_v4 = vadd.f32 1e-05, %v3100_v61  ;;  %v6778_v52 = vor.u32 %v7441_v36, %v6777_v23  ;;  %v7438_v61 = vld [vmem:[#allocation8 + $0x488] sm:$0xf0] }
 0x374   :  { %4579 = vmatpush.bf16.msra.mxu2 %v6790_v34  ;;  %v6635_v34 = vld [vmem:[#allocation8 + $0x384] sm:$0xf0]  ;;  %v7356_v36 = vld [vmem:[#allocation8 + $0x1fc] sm:$0xf] }
 0x375   :  { %v3007_v3 = vadd.f32 %v3006_v39, %v2973_v63  ;;  %v2846_v5 = vpop.f32.mrf.mxu3  ;;  %7524 = vrsqrt.f32 %v3108_v4  ;;  %4616 = vmatpush.bf16.msrb.mxu1 %v6338_v54  ;;  %vm3158_vm4 = vweird.f32 %v3108_v4  ;;  %v6765_v39 = vld [vmem:[#allocation8 + $0x480] sm:$0xf]  ;;  %v7362_v54 = vld [vmem:[#allocation8 + $0x22c] sm:$0xf]  ;;  %v6446_v55 = vor.u32 %v7356_v36, %v6443_v46  ;;  %v6395_v36 = vld [vmem:[#allocation8 + $0x1a4] sm:$0xf0] }
 0x376   :  { %v6766_v5 = vor.u32 %v7438_v61, %v6765_v39 }
 0x377   :  { %v7996_v47 = vpop.f32.mrf.mxu1  ;;  %v3008_v12 = vrot.slane %v3007_v3, 2 }
 0x378   :  { %4580 = vmatpush.bf16.msra.mxu2 %v6778_v52 }
 0x379   :  { %v2859_v8 = vpop.f32.mrf.mxu0  ;;  %v3009_v2 = vadd.f32 %v3008_v12, %v3007_v3  ;;  %4617 = vmatpush.bf16.msrb.mxu1 %v6326_v31  ;;  %v6945_v12 = vld [vmem:[#allocation8 + $0x5e8] sm:$0xf] }
 0x37a   :  { %v7407_v8 = vld [vmem:[#allocation8 + $0x394] sm:$0xf]  ;;  %v6946_v28 = vor.u32 %v7483_v53, %v6945_v12 }
 0x37b   :  { %v3010_v19 = vrot.slane %v3009_v2, 1  ;;  %v7525_v30 = vpop.eup %7524 }
 0x37c   :  { %v3153_v33 = vmul.f32 %v7525_v30, %v3108_v4  ;;  %vm3159_vm3 = vweird.f32 %v7525_v30  ;;  %4581 = vmatpush.bf16.msra.mxu2 %v6766_v5  ;;  %4587 = vmatpush.bf16.msra.mxu3 %v6946_v28  ;;  %v7398_v5 = vld [vmem:[#allocation8 + $0x34c] sm:$0xf] }
 0x37d   :  { %v3011_v9 = vadd.f32 %v3010_v19, %v3009_v2  ;;  %4618 = vmatpush.bf16.msrb.mxu1 %v6314_v41  ;;  %vm3160_vm5 = vmor %vm3158_vm4, %vm3159_vm3  ;;  %v6662_v2 = vor.u32 %v7410_v59, %v6659_v60  ;;  %v6467_v19 = vld [vmem:[#allocation8 + $0x234] sm:$0xf0]  ;;  %v7474_v59 = vld [vmem:[#allocation8 + $0x5a8] sm:$0xf0] }
 0x37e   :  { %v3154_v56 = vmul.f32 %v7525_v30, %v3153_v33  ;;  %v6921_v41 = vld [vmem:[#allocation8 + $0x5b8] sm:$0xf]  ;;  %v7353_v60 = vld [vmem:[#allocation8 + $0x1e4] sm:$0xf] }
 0x37f   :  { %v2872_v21 = vpop.f32.mrf.mxu1  ;;  %v3029_v25 = vmul.f32 %v3011_v9, %v7758_v13  ;;  %v6650_v9 = vor.u32 %v7407_v8, %v6647_v17  ;;  %v7471_v8 = vld [vmem:[#allocation8 + $0x590] sm:$0xf0] }
 0x380   :  { %v3155_v43 = vmul.f32 0.5, %v3154_v56  ;;  %v7404_v56 = vld [vmem:[#allocation8 + $0x37c] sm:$0xf] }
 0x381   :  { %v7999_v16 = vsub.f32 %v2973_v63, %v3029_v25  ;;  %v2871_v63 = vadd.f32 %v7996_v47, %v7990_v51  ;;  %4619 = vmatpush.bf16.msrb.mxu1 %v6302_v50  ;;  %v6934_v25 = vor.u32 %v7480_v32, %v6933_v27  ;;  %v6638_v52 = vor.u32 %v7404_v56, %v6635_v34  ;;  %v7347_v32 = vld [vmem:[#allocation8 + $0x1b4] sm:$0xf]  ;;  %v7392_v56 = vld [vmem:[#allocation8 + $0x31c] sm:$0xf]  ;;  %v6587_v34 = vld [vmem:[#allocation8 + $0x324] sm:$0xf0] }
 0x382   :  { %v3156_v18 = vsub.f32 1.5, %v3155_v43  ;;  %v7477_v43 = vld [vmem:[#allocation8 + $0x5c0] sm:$0xf0]  ;;  %v6590_v46 = vor.u32 %v7392_v56, %v6587_v34  ;;  %v7310_v56 = vld [vmem:[#allocation8 + $0x88] sm:$0xf0] }
 0x383   :  { %v3045_v14 = vmul.f32 %v7999_v16, %v7999_v16  ;;  %4588 = vmatpush.bf16.msra.mxu3 %v6934_v25  ;;  %v6922_v23 = vor.u32 %v7477_v43, %v6921_v41  ;;  %v7344_v41 = vld [vmem:[#allocation8 + $0x19c] sm:$0xf] }
 0x384   :  { %v3157_v57 = vmul.f32 %v7525_v30, %v3156_v18 }
 0x385   :  { %v3078_v48 = vrot.slane %v3045_v14, 4  ;;  %4620 = vmatpush.bf16.msrb.mxu1 %v6290_v10  ;;  %v7350_v10 = vld [vmem:[#allocation8 + $0x1cc] sm:$0xf] }
 0x386   :  { %v3161_v42 = vsel %vm3160_vm5, %v7525_v30, %v3157_v57  ;;  %v6455_v30 = vld [vmem:[#allocation8 + $0x21c] sm:$0xf0]  ;;  %v7401_v57 = vld [vmem:[#allocation8 + $0x364] sm:$0xf] }
 0x387   :  { %v2883_v58 = vpop.f32.mrf.mxu2  ;;  %v3079_v37 = vadd.f32 %v3078_v48, %v3045_v14  ;;  %v3196_v6 = vmul.f32 %v3161_v42, %v7978_v7  ;;  %v6470_v7 = vor.u32 %v7362_v54, %v6467_v19  ;;  %v6458_v35 = vor.u32 %v7359_v29, %v6455_v30  ;;  %4589 = vmatpush.bf16.msra.mxu3 %v6922_v23  ;;  %v7395_v54 = vld [vmem:[#allocation8 + $0x334] sm:$0xf]  ;;  %v6599_v19 = vld [vmem:[#allocation8 + $0x33c] sm:$0xf0] }
 0x388   :  { %v2884_v3 = vadd.f32 %v2883_v58, %v2871_v63  ;;  %v6909_v63 = vld [vmem:[#allocation8 + $0x5a0] sm:$0xf]  ;;  %v6602_v30 = vor.u32 %v7395_v54, %v6599_v19  ;;  %v7313_v54 = vld [vmem:[#allocation8 + $0xa0] sm:$0xf0] }
 0x389   :  { %v3080_v1 = vrot.slane %v3079_v37, 2  ;;  %v8008_v21 = vpack.c.bf16 %v3196_v6, %v3196_v6  ;;  %4626 = vmatpush.bf16.msrb.mxu2 %v6470_v7  ;;  %v6910_v61 = vor.u32 %v7474_v59, %v6909_v63  ;;  %v6885_v7 = vld [vmem:[#allocation8 + $0x570] sm:$0xf]  ;;  %v6407_v29 = vld [vmem:[#allocation8 + $0x1bc] sm:$0xf0] }
 0x38a   :  { %v6281_v59 = vld [vmem:[#allocation8 + $0xb0] sm:$0xf] }
 0x38b   :  { %v3081_v51 = vadd.f32 %v3080_v1, %v3079_v37  ;;  %4556 = vmatmul.bf16.vlgmr.msra.gmra.mxu0 %v8008_v21  ;;  %v6623_v37 = vld [vmem:[#allocation8 + $0x36c] sm:$0xf0]  ;;  %v6434_v1 = vor.u32 %v7353_v60, %v6431_v40  ;;  %4590 = vmatpush.bf16.msra.mxu3 %v6910_v61  ;;  %v7316_v60 = vld [vmem:[#allocation8 + $0xb8] sm:$0xf0]  ;;  %v7462_v61 = vld [vmem:[#allocation8 + $0x548] sm:$0xf0] }
 0x38c   :  { %4652 = vmatpush.bf16.msra.mxu0 %v6662_v2  ;;  %v6626_v42 = vor.u32 %v7401_v57, %v6623_v37  ;;  %v7341_v40 = vld [vmem:[#allocation8 + $0x184] sm:$0xf] }
 0x38d   :  { %v2896_v4 = vpop.f32.mrf.mxu3  ;;  %v3082_v62 = vrot.slane %v3081_v51, 1  ;;  %4627 = vmatpush.bf16.msrb.mxu2 %v6458_v35 }
 0x38e   :  { %v2897_v47 = vadd.f32 %v2896_v4, %v2884_v3  ;;  %v6897_v4 = vld [vmem:[#allocation8 + $0x588] sm:$0xf] }
 0x38f   :  { %v2885_v45 = vpop.f32.mrf.mxu2  ;;  %v3083_v31 = vadd.f32 %v3082_v62, %v3081_v51  ;;  %v6898_v53 = vor.u32 %v7471_v8, %v6897_v4  ;;  %v6419_v51 = vld [vmem:[#allocation8 + $0x1d4] sm:$0xf0]  ;;  %v7468_v62 = vld [vmem:[#allocation8 + $0x578] sm:$0xf0]  ;;  %v7431_v8 = vld [vmem:[#allocation8 + $0x454] sm:$0xf] }
 0x390   :  { %vm2958_vm6 = vcmp.gt.f32.partialorder %v2897_v47, 0.0  ;;  %v2966_v22 = vmul.f32 0.02, %v2897_v47  ;;  %4653 = vmatpush.bf16.msra.mxu0 %v6650_v9  ;;  %v6614_v45 = vor.u32 %v7398_v5, %v6611_v44  ;;  %v6422_v2 = vor.u32 %v7350_v10, %v6419_v51  ;;  %v6383_v5 = vld [vmem:[#allocation8 + $0x18c] sm:$0xf0] }
 0x391   :  { %v8006_v15 = vpop.f32.mrf.mxu0  ;;  %v3101_v0 = vmul.f32 %v3083_v31, %v7758_v13  ;;  %4628 = vmatpush.bf16.msrb.mxu2 %v6446_v55  ;;  %4591 = vmatpush.bf16.msra.mxu3 %v6898_v53  ;;  %v6886_v9 = vor.u32 %v7468_v62, %v6885_v7  ;;  %v6410_v31 = vor.u32 %v7347_v32, %v6407_v29  ;;  %v6755_v55 = vld [vmem:[#allocation8 + $0x474] sm:$0xf0] }
 0x392   :  { %v2974_v33 = vsel %vm2958_vm6, %v2897_v47, %v2966_v22  ;;  %v6386_v10 = vor.u32 %v7341_v40, %v6383_v5  ;;  %v6282_v51 = vor.u32 %v7316_v60, %v6281_v59  ;;  %v7377_v59 = vld [vmem:[#allocation8 + $0x2a4] sm:$0xf]  ;;  %v6527_v60 = vld [vmem:[#allocation8 + $0x2ac] sm:$0xf0]  ;;  %v7422_v40 = vld [vmem:[#allocation8 + $0x40c] sm:$0xf] }
 0x393   :  { %v3012_v24 = vrot.slane %v2974_v33, 4  ;;  %v8014_v18 = vadd.f32 1e-05, %v3101_v0  ;;  %v7465_v0 = vld [vmem:[#allocation8 + $0x560] sm:$0xf0]  ;;  %v6530_v5 = vor.u32 %v7377_v59, %v6527_v60 }
 0x394   :  { %4654 = vmatpush.bf16.msra.mxu0 %v6638_v52  ;;  %v7434_v52 = vld [vmem:[#allocation8 + $0x46c] sm:$0xf]  ;;  %v6851_v59 = vld [vmem:[#allocation8 + $0x534] sm:$0xf0] }
 0x395   :  { %v3013_v14 = vadd.f32 %v3012_v24, %v2974_v33  ;;  %v2898_v58 = vpop.f32.mrf.mxu3  ;;  %7526 = vrsqrt.f32 %v8014_v18  ;;  %4629 = vmatpush.bf16.msrb.mxu2 %v6434_v1  ;;  %4592 = vmatpush.bf16.msra.mxu3 %v6886_v9  ;;  %vm3168_vm8 = vweird.f32 %v8014_v18  ;;  %v6758_v53 = vor.u32 %v7434_v52, %v6755_v55  ;;  %v6551_v9 = vld [vmem:[#allocation8 + $0x2dc] sm:$0xf0] }
 0x396   :  { %v7389_v58 = vld [vmem:[#allocation8 + $0x304] sm:$0xf] }
 0x397   :  { %v8012_v11 = vpop.f32.mrf.mxu1  ;;  %v3014_v50 = vrot.slane %v3013_v14, 2 }
 0x398   :  { %4655 = vmatpush.bf16.msra.mxu0 %v6626_v42  ;;  %v2923_v63 = vadd.f32 %v8012_v11, %v8006_v15 }
 0x399   :  { %v2911_v48 = vpop.f32.mrf.mxu0  ;;  %v3015_v39 = vadd.f32 %v3014_v50, %v3013_v14  ;;  %4630 = vmatpush.bf16.msrb.mxu2 %v6422_v2  ;;  %v6398_v50 = vor.u32 %v7344_v41, %v6395_v36  ;;  %v7386_v2 = vld [vmem:[#allocation8 + $0x2ec] sm:$0xf] }
 0x39a   :  { %v6575_v48 = vld [vmem:[#allocation8 + $0x30c] sm:$0xf0] }
 0x39b   :  { %v3016_v3 = vrot.slane %v3015_v39, 1  ;;  %v7527_v47 = vpop.eup %7526  ;;  %4608 = vmatmul.bf16.vlgmr.msrb.gmra.mxu0 %v7949_v38  ;;  %v6578_v4 = vor.u32 %v7389_v58, %v6575_v48  ;;  %v6719_v48 = vld [vmem:[#allocation8 + $0x42c] sm:$0xf0] }
 0x39c   :  { %v3163_v17 = vmul.f32 %v7527_v47, %v8014_v18  ;;  %4656 = vmatpush.bf16.msra.mxu0 %v6614_v45  ;;  %vm3169_vm7 = vweird.f32 %v7527_v47  ;;  %v6743_v45 = vld [vmem:[#allocation8 + $0x45c] sm:$0xf0] }
 0x39d   :  { %v3017_v12 = vadd.f32 %v3016_v3, %v3015_v39  ;;  %4631 = vmatpush.bf16.msrb.mxu2 %v6410_v31  ;;  %vm3170_vm9 = vmor %vm3168_vm8, %vm3169_vm7  ;;  %v6861_v39 = vld [vmem:[#allocation8 + $0x540] sm:$0xf]  ;;  %v6746_v62 = vor.u32 %v7431_v8, %v6743_v45  ;;  %v7428_v31 = vld [vmem:[#allocation8 + $0x43c] sm:$0xf] }
 0x39e   :  { %v3164_v22 = vmul.f32 %v7527_v47, %v3163_v17  ;;  %v6862_v3 = vor.u32 %v7462_v61, %v6861_v39 }
 0x39f   :  { %v2924_v6 = vpop.f32.mrf.mxu1  ;;  %v3030_v28 = vmul.f32 %v3017_v12, %v7758_v13 }
 0x3a0   :  { %v3165_v25 = vmul.f32 0.5, %v3164_v22  ;;  %4657 = vmatpush.bf16.msra.mxu0 %v6602_v30  ;;  %v7383_v22 = vld [vmem:[#allocation8 + $0x2d4] sm:$0xf] }
 0x3a1   :  { %v8019_v27 = vsub.f32 %v2974_v33, %v3030_v28  ;;  %v6873_v33 = vld [vmem:[#allocation8 + $0x558] sm:$0xf]  ;;  %4632 = vmatpush.bf16.msrb.mxu2 %v6398_v50  ;;  %v6554_v34 = vor.u32 %v7383_v22, %v6551_v9  ;;  %v6245_v50 = vld [vmem:[#allocation8 + $0x68] sm:$0xf] }
 0x3a2   :  { %v3166_v43 = vsub.f32 1.5, %v3165_v25  ;;  %v6874_v23 = vor.u32 %v7465_v0, %v6873_v33  ;;  %v6269_v28 = vld [vmem:[#allocation8 + $0x98] sm:$0xf]  ;;  %v6731_v25 = vld [vmem:[#allocation8 + $0x444] sm:$0xf0] }
 0x3a3   :  { %v3046_v35 = vmul.f32 %v8019_v27, %v8019_v27  ;;  %v6270_v30 = vor.u32 %v7313_v54, %v6269_v28  ;;  %v7301_v28 = vld [vmem:[#allocation8 + $0x40] sm:$0xf0] }
 0x3a4   :  { %v3167_v57 = vmul.f32 %v7527_v47, %v3166_v43  ;;  %4593 = vmatpush.bf16.msra.mxu3 %v6874_v23  ;;  %4658 = vmatpush.bf16.msra.mxu0 %v6590_v46  ;;  %v7380_v43 = vld [vmem:[#allocation8 + $0x2bc] sm:$0xf]  ;;  %v6734_v23 = vor.u32 %v7428_v31, %v6731_v25  ;;  %v7425_v46 = vld [vmem:[#allocation8 + $0x424] sm:$0xf]  ;;  %v6683_v31 = vld [vmem:[#allocation8 + $0x3e4] sm:$0xf0] }
 0x3a5   :  { %v3084_v14 = vrot.slane %v3046_v35, 4  ;;  %4633 = vmatpush.bf16.msrb.mxu2 %v6386_v10  ;;  %v6722_v39 = vor.u32 %v7425_v46, %v6719_v48  ;;  %v8046_v10 = vld [vmem:[%s8117_s8] sm:$0x7]  ;;  %v6671_v46 = vld [vmem:[#allocation8 + $0x3cc] sm:$0xf0] }
 0x3a6   :  { %v3171_v18 = vsel %vm3170_vm9, %v7527_v47, %v3167_v57  ;;  %v6563_v47 = vld [vmem:[#allocation8 + $0x2f4] sm:$0xf0]  ;;  %v7307_v57 = vld [vmem:[#allocation8 + $0x70] sm:$0xf0]  ;;  %v3466_v22 = vperm.slane %v8046_v10, 0 }
 0x3a7   :  { %v2935_v24 = vpop.f32.mrf.mxu2  ;;  %v3085_v37 = vadd.f32 %v3084_v14, %v3046_v35  ;;  %v3197_v44 = vmul.f32 %v3171_v18, %v7999_v16  ;;  %v6566_v19 = vor.u32 %v7386_v2, %v6563_v47  ;;  %v6539_v14 = vld [vmem:[#allocation8 + $0x2c4] sm:$0xf0]  ;;  %v6246_v61 = vor.u32 %v7307_v57, %v6245_v50  ;;  %v6707_v18 = vld [vmem:[#allocation8 + $0x414] sm:$0xf0]  ;;  %v6695_v2 = vld [vmem:[#allocation8 + $0x3fc] sm:$0xf0] }
 0x3a8   :  { %v2936_v1 = vadd.f32 %v2935_v24, %v2923_v63  ;;  %4594 = vmatpush.bf16.msra.mxu3 %v6862_v3  ;;  %4659 = vmatpush.bf16.msra.mxu0 %v6578_v4  ;;  %v6257_v24 = vld [vmem:[#allocation8 + $0x80] sm:$0xf]  ;;  %v7304_v3 = vld [vmem:[#allocation8 + $0x58] sm:$0xf0]  ;;  %v6515_v4 = vld [vmem:[#allocation8 + $0x294] sm:$0xf0] }
 0x3a9   :  { %v3086_v42 = vrot.slane %v3085_v37, 2  ;;  %v8029_v17 = vpack.c.bf16 %v3197_v44, %v3197_v44  ;;  %v6258_v36 = vor.u32 %v7310_v56, %v6257_v24  ;;  %v6221_v47 = vld [vmem:[#allocation8 + $0x38] sm:$0xf]  ;;  %v6209_v24 = vld [vmem:[#allocation8 + $0x20] sm:$0xf] }
 0x3aa   :  { %v7298_v56 = vld [vmem:[#allocation8 + $0x28] sm:$0xf0]  ;;  %v6197_v48 = vld [vmem:[#allocation8 + $0x8] sm:$0xf] }
 0x3ab   :  { %v3087_v15 = vadd.f32 %v3086_v42, %v3085_v37  ;;  %4569 = vmatmul.bf16.vlgmr.msra.gmra.mxu1 %v8029_v17  ;;  %4660 = vmatmul.bf16.vlgmr.msra.gmra.mxu0 %v8008_v21  ;;  %v6542_v37 = vor.u32 %v7380_v43, %v6539_v14 }
 0x3ac   :  { %4665 = vmatpush.bf16.msra.mxu1 %v6758_v53  ;;  %4704 = vmatpush.bf16.msrb.mxu0 %v6282_v51 }
 0x3ad   :  { %v2948_v6 = vpop.f32.mrf.mxu3  ;;  %v3088_v16 = vrot.slane %v3087_v15, 1  ;;  %4639 = vmatpush.bf16.msrb.mxu3 %v6566_v19 }
 0x3ae   :  { %v2949_v11 = vadd.f32 %v2948_v6, %v2936_v1  ;;  %v6233_v1 = vld [vmem:[#allocation8 + $0x50] sm:$0xf]  ;;  %v7374_v6 = vld [vmem:[#allocation8 + $0x28c] sm:$0xf] }
 0x3af   :  { %v2937_v12 = vpop.f32.mrf.mxu2  ;;  %v3089_v32 = vadd.f32 %v3088_v16, %v3087_v15  ;;  %v6710_v15 = vor.u32 %v7422_v40, %v6707_v18  ;;  %v6518_v54 = vor.u32 %v7374_v6, %v6515_v4  ;;  %v7455_v4 = vld [vmem:[#allocation8 + $0x514] sm:$0xf] }
 0x3b0   :  { %vm2959_vm10 = vcmp.gt.f32.partialorder %v2949_v11, 0.0  ;;  %v2967_v7 = vmul.f32 0.02, %v2949_v11  ;;  %4666 = vmatpush.bf16.msra.mxu1 %v6746_v62  ;;  %4705 = vmatpush.bf16.msrb.mxu0 %v6270_v30  ;;  %v7419_v12 = vld [vmem:[#allocation8 + $0x3f4] sm:$0xf] }
 0x3b1   :  { %v3102_v33 = vmul.f32 %v3089_v32, %v7758_v13  ;;  %4640 = vmatpush.bf16.msrb.mxu3 %v6554_v34  ;;  %v6503_v62 = vld [vmem:[#allocation8 + $0x27c] sm:$0xf0]  ;;  %v6698_v9 = vor.u32 %v7419_v12, %v6695_v2  ;;  %v6222_v32 = vor.u32 %v7301_v28, %v6221_v47  ;;  %v7416_v30 = vld [vmem:[#allocation8 + $0x3dc] sm:$0xf]  ;;  %v7337_v2 = vld [vmem:[#allocation8 + $0x160] sm:$0xf0] }
 0x3b2   :  { %v8032_v29 = vsel %vm2959_vm10, %v2949_v11, %v2967_v7  ;;  %v4505_v55 = vpop.f32.mrf.mxu0  ;;  %v6234_v11 = vor.u32 %v7304_v3, %v6233_v1  ;;  %v7371_v7 = vld [vmem:[#allocation8 + $0x274] sm:$0xf]  ;;  %v6686_v14 = vor.u32 %v7416_v30, %v6683_v31  ;;  %v7412_v1 = vld [vmem:[#allocation8 + $0x3b8] sm:$0xf0]  ;;  %v6653_v28 = vld [vmem:[#allocation8 + $0x398] sm:$0xf] }
 0x3b3   :  { %v3018_v35 = vrot.slane %v8032_v29, 4  ;;  %v8038_v58 = vadd.f32 1e-05, %v3102_v33  ;;  %v4506_v43 = vadd.f32 %v4505_v55, %v3466_v22  ;;  %v6353_v30 = vld [vmem:[#allocation8 + $0x140] sm:$0xf] }
 0x3b4   :  { %4667 = vmatpush.bf16.msra.mxu1 %v6734_v23  ;;  %4706 = vmatpush.bf16.msrb.mxu0 %v6258_v36  ;;  %v6210_v23 = vor.u32 %v7298_v56, %v6209_v24  ;;  %v7413_v36 = vld [vmem:[#allocation8 + $0x3c4] sm:$0xf]  ;;  %v7334_v31 = vld [vmem:[#allocation8 + $0x148] sm:$0xf0]  ;;  %v6641_v24 = vld [vmem:[#allocation8 + $0x380] sm:$0xf] }
 0x3b5   :  { %v3019_v0 = vadd.f32 %v3018_v35, %v8032_v29  ;;  %v2950_v41 = vpop.f32.mrf.mxu3  ;;  %7528 = vrsqrt.f32 %v8038_v58  ;;  %4641 = vmatpush.bf16.msrb.mxu3 %v6542_v37  ;;  %vm3178_vm12 = vweird.f32 %v8038_v58  ;;  %v7295_v37 = vld [vmem:[#allocation8 + $0x10] sm:$0xf0]  ;;  %v6674_v3 = vor.u32 %v7413_v36, %v6671_v46  ;;  %v7406_v56 = vld [vmem:[#allocation8 + $0x388] sm:$0xf0] }
 0x3b6   :  { %v6491_v41 = vld [vmem:[#allocation8 + $0x264] sm:$0xf0] }
 0x3b7   :  { %v3020_v52 = vrot.slane %v3019_v0, 2 }
 0x3b8   :  { %4668 = vmatpush.bf16.msra.mxu1 %v6722_v39  ;;  %4707 = vmatpush.bf16.msrb.mxu0 %v6246_v61  ;;  %v6377_v39 = vld [vmem:[#allocation8 + $0x170] sm:$0xf]  ;;  %v7340_v61 = vld [vmem:[#allocation8 + $0x178] sm:$0xf0] }
 0x3b9   :  { %v3021_v63 = vadd.f32 %v3020_v52, %v3019_v0  ;;  %4642 = vmatpush.bf16.msrb.mxu3 %v6530_v5  ;;  %v7368_v0 = vld [vmem:[#allocation8 + $0x25c] sm:$0xf]  ;;  %v6198_v5 = vor.u32 %v7295_v37, %v6197_v48  ;;  %v6378_v6 = vor.u32 %v7340_v61, %v6377_v39  ;;  %v6803_v37 = vld [vmem:[#allocation8 + $0x4d4] sm:$0xf0] }
 0x3ba   :  { %v4507_v45 = vpop.f32.mrf.mxu0  ;;  %v6494_v60 = vor.u32 %v7368_v0, %v6491_v41  ;;  %v6642_v0 = vor.u32 %v7406_v56, %v6641_v24  ;;  %v7449_v41 = vld [vmem:[#allocation8 + $0x4e4] sm:$0xf]  ;;  %v7391_v24 = vld [vmem:[#allocation8 + $0x310] sm:$0xf0]  ;;  %v7482_v56 = vld [vmem:[#allocation8 + $0x5ec] sm:$0xf] }
 0x3bb   :  { %v3022_v42 = vrot.slane %v3021_v63, 1  ;;  %v8041_v8 = vpop.eup %7528  ;;  %4621 = vmatmul.bf16.vlgmr.msrb.gmra.mxu1 %v7960_v20  ;;  %v6365_v45 = vld [vmem:[#allocation8 + $0x158] sm:$0xf] }
 0x3bc   :  { %v3173_v53 = vmul.f32 %v8041_v8, %v8038_v58  ;;  %4669 = vmatpush.bf16.msra.mxu1 %v6710_v15  ;;  %4708 = vmatpush.bf16.msrb.mxu0 %v6234_v11  ;;  %vm3179_vm11 = vweird.f32 %v8041_v8  ;;  %v7365_v15 = vld [vmem:[#allocation8 + $0x244] sm:$0xf]  ;;  %v6479_v11 = vld [vmem:[#allocation8 + $0x24c] sm:$0xf0] }
 0x3bd   :  { %v3023_v44 = vadd.f32 %v3022_v42, %v3021_v63  ;;  %4643 = vmatpush.bf16.msrb.mxu3 %v6518_v54  ;;  %v7458_v63 = vld [vmem:[#allocation8 + $0x52c] sm:$0xf]  ;;  %vm3180_vm13 = vmor %vm3178_vm12, %vm3179_vm11  ;;  %v6665_v42 = vld [vmem:[#allocation8 + $0x3b0] sm:$0xf]  ;;  %v6482_v54 = vor.u32 %v7365_v15, %v6479_v11 }
 0x3be   :  { %v3174_v19 = vmul.f32 %v8041_v8, %v3173_v53  ;;  %v6854_v53 = vor.u32 %v7458_v63, %v6851_v59  ;;  %v6617_v63 = vld [vmem:[#allocation8 + $0x350] sm:$0xf]  ;;  %v7400_v59 = vld [vmem:[#allocation8 + $0x358] sm:$0xf0] }
 0x3bf   :  { %v3031_v51 = vmul.f32 %v3023_v44, %v7758_v13 }
 0x3c0   :  { %v3175_v25 = vmul.f32 0.5, %v3174_v19  ;;  %4670 = vmatpush.bf16.msra.mxu1 %v6698_v9  ;;  %4709 = vmatpush.bf16.msrb.mxu0 %v6222_v32  ;;  %v7452_v32 = vld [vmem:[#allocation8 + $0x4fc] sm:$0xf] }
 0x3c1   :  { %v8053_v16 = vsub.f32 %v8032_v29, %v3031_v51  ;;  %v6506_v29 = vor.u32 %v7371_v7, %v6503_v62  ;;  %v6666_v51 = vor.u32 %v7412_v1, %v6665_v42  ;;  %v6366_v62 = vor.u32 %v7337_v2, %v6365_v45  ;;  %v7443_v42 = vld [vmem:[#allocation8 + $0x4b4] sm:$0xf]  ;;  %v6317_v1 = vld [vmem:[#allocation8 + $0xf8] sm:$0xf]  ;;  %v6305_v2 = vld [vmem:[#allocation8 + $0xe0] sm:$0xf] }
 0x3c2   :  { %v3176_v34 = vsub.f32 1.5, %v3175_v25  ;;  %v4518_v57 = vpop.f32.mrf.mxu1 }
 0x3c3   :  { %v3047_v35 = vmul.f32 %v8053_v16, %v8053_v16  ;;  %4644 = vmatpush.bf16.msrb.mxu3 %v6506_v29  ;;  %v8064_v55 = vadd.f32 %v4518_v57, %v4506_v43  ;;  %v6341_v43 = vld [vmem:[#allocation8 + $0x128] sm:$0xf]  ;;  %v7328_v57 = vld [vmem:[#allocation8 + $0x118] sm:$0xf0] }
 0x3c4   :  { %v3177_v52 = vmul.f32 %v8041_v8, %v3176_v34  ;;  %4671 = vmatpush.bf16.msra.mxu1 %v6686_v14  ;;  %4710 = vmatpush.bf16.msrb.mxu0 %v6210_v23  ;;  %v6354_v34 = vor.u32 %v7334_v31, %v6353_v30  ;;  %v7331_v14 = vld [vmem:[#allocation8 + $0x130] sm:$0xf0]  ;;  %v6293_v30 = vld [vmem:[#allocation8 + $0xc8] sm:$0xf] }
 0x3c5   :  { %v3090_v33 = vrot.slane %v3047_v35, 4  ;;  %v7403_v23 = vld [vmem:[#allocation8 + $0x370] sm:$0xf0]  ;;  %v6342_v36 = vor.u32 %v7331_v14, %v6341_v43 }
 0x3c6   :  { %v3181_v40 = vsel %vm3180_vm13, %v8041_v8, %v3177_v52  ;;  %v6839_v8 = vld [vmem:[#allocation8 + $0x51c] sm:$0xf0]  ;;  %v7446_v52 = vld [vmem:[#allocation8 + $0x4cc] sm:$0xf]  ;;  %v7319_v31 = vld [vmem:[#allocation8 + $0xd0] sm:$0xf0] }
 0x3c7   :  { %v3091_v50 = vadd.f32 %v3090_v33, %v3047_v35  ;;  %v3198_v58 = vmul.f32 %v3181_v40, %v8019_v27  ;;  %4645 = vmatpush.bf16.msrb.mxu3 %v6494_v60  ;;  %v7409_v27 = vld [vmem:[#allocation8 + $0x3a0] sm:$0xf0]  ;;  %v6842_v22 = vor.u32 %v7455_v4, %v6839_v8  ;;  %v6827_v35 = vld [vmem:[#allocation8 + $0x504] sm:$0xf0]  ;;  %v6806_v40 = vor.u32 %v7446_v52, %v6803_v37  ;;  %v7479_v52 = vld [vmem:[#allocation8 + $0x5d4] sm:$0xf] }
 0x3c8   :  { %4672 = vmatpush.bf16.msra.mxu1 %v6674_v3  ;;  %4711 = vmatpush.bf16.msrb.mxu0 %v6198_v5  ;;  %v6654_v9 = vor.u32 %v7409_v27, %v6653_v28  ;;  %v6830_v33 = vor.u32 %v7452_v32, %v6827_v35  ;;  %v6791_v5 = vld [vmem:[#allocation8 + $0x4bc] sm:$0xf0]  ;;  %v6779_v28 = vld [vmem:[#allocation8 + $0x4a4] sm:$0xf0]  ;;  %v6294_v14 = vor.u32 %v7319_v31, %v6293_v30  ;;  %v6461_v37 = vld [vmem:[#allocation8 + $0x218] sm:$0xf] }
 0x3c9   :  { %v3092_v18 = vrot.slane %v3091_v50, 2  ;;  %v8068_v12 = vpack.c.bf16 %v3198_v58, %v3198_v58  ;;  %v7325_v58 = vld [vmem:[#allocation8 + $0x100] sm:$0xf0]  ;;  %v6794_v8 = vor.u32 %v7443_v42, %v6791_v5  ;;  %v6593_v27 = vld [vmem:[#allocation8 + $0x320] sm:$0xf] }
 0x3ca   :  { %v4520_v7 = vpop.f32.mrf.mxu1  ;;  %v6318_v11 = vor.u32 %v7325_v58, %v6317_v1  ;;  %v6449_v42 = vld [vmem:[#allocation8 + $0x200] sm:$0xf]  ;;  %v7358_v1 = vld [vmem:[#allocation8 + $0x208] sm:$0xf0]  ;;  %v6413_v31 = vld [vmem:[#allocation8 + $0x1b8] sm:$0xf] }
 0x3cb   :  { %v3093_v44 = vadd.f32 %v3092_v18, %v3091_v50  ;;  %4582 = vmatmul.bf16.vlgmr.msra.gmra.mxu2 %v8068_v12  ;;  %4712 = vmatmul.bf16.vlgmr.msrb.gmra.mxu0 %v7949_v38  ;;  %v6629_v38 = vld [vmem:[#allocation8 + $0x368] sm:$0xf]  ;;  %v6329_v50 = vld [vmem:[#allocation8 + $0x110] sm:$0xf]  ;;  %v6618_v18 = vor.u32 %v7400_v59, %v6617_v63  ;;  %v7437_v7 = vld [vmem:[#allocation8 + $0x484] sm:$0xf] }
 0x3cc   :  { %4717 = vmatpush.bf16.msrb.mxu1 %v6378_v6  ;;  %4678 = vmatpush.bf16.msra.mxu2 %v6854_v53  ;;  %v6630_v48 = vor.u32 %v7403_v23, %v6629_v38  ;;  %v6330_v39 = vor.u32 %v7328_v57, %v6329_v50  ;;  %v7397_v6 = vld [vmem:[#allocation8 + $0x340] sm:$0xf0]  ;;  %v7440_v53 = vld [vmem:[#allocation8 + $0x49c] sm:$0xf]  ;;  %v6935_v57 = vld [vmem:[#allocation8 + $0x5dc] sm:$0xf0] }
 0x3cd   :  { %v3094_v47 = vrot.slane %v3093_v44, 1  ;;  %4756 = vmatpush.bf16.msra.mxu0 %v6666_v51  ;;  %4673 = vmatmul.bf16.vlgmr.msra.gmra.mxu1 %v8029_v17  ;;  %v7361_v63 = vld [vmem:[#allocation8 + $0x220] sm:$0xf0]  ;;  %v6737_v58 = vld [vmem:[#allocation8 + $0x440] sm:$0xf] }
 0x3ce   :  { %4646 = vmatpush.bf16.msrb.mxu3 %v6482_v54  ;;  %v7394_v54 = vld [vmem:[#allocation8 + $0x328] sm:$0xf0]  ;;  %v7433_v59 = vld [vmem:[#allocation8 + $0x460] sm:$0xf0]  ;;  %v6887_v30 = vld [vmem:[#allocation8 + $0x57c] sm:$0xf0] }
 0x3cf   :  { %v3095_v19 = vadd.f32 %v3094_v47, %v3093_v44  ;;  %v6605_v44 = vld [vmem:[#allocation8 + $0x338] sm:$0xf]  ;;  %v7322_v47 = vld [vmem:[#allocation8 + $0xe8] sm:$0xf0]  ;;  %v6594_v32 = vor.u32 %v7394_v54, %v6593_v27  ;;  %v6425_v27 = vld [vmem:[#allocation8 + $0x1d0] sm:$0xf] }
 0x3d0   :  { %4718 = vmatpush.bf16.msrb.mxu1 %v6366_v62  ;;  %4679 = vmatpush.bf16.msra.mxu2 %v6842_v22  ;;  %v6606_v45 = vor.u32 %v7397_v6, %v6605_v44  ;;  %v6767_v62 = vld [vmem:[#allocation8 + $0x48c] sm:$0xf0]  ;;  %v6450_v44 = vor.u32 %v7358_v1, %v6449_v42  ;;  %v7473_v6 = vld [vmem:[#allocation8 + $0x5a4] sm:$0xf]  ;;  %v7352_v54 = vld [vmem:[#allocation8 + $0x1d8] sm:$0xf0] }
 0x3d1   :  { %v3103_v25 = vmul.f32 %v3095_v19, %v7758_v13  ;;  %4757 = vmatpush.bf16.msra.mxu0 %v6654_v9  ;;  %v6815_v13 = vld [vmem:[#allocation8 + $0x4ec] sm:$0xf0]  ;;  %v6782_v9 = vor.u32 %v7440_v53, %v6779_v28  ;;  %v6770_v38 = vor.u32 %v7437_v7, %v6767_v62  ;;  %v6437_v53 = vld [vmem:[#allocation8 + $0x1e8] sm:$0xf]  ;;  %v6899_v28 = vld [vmem:[#allocation8 + $0x594] sm:$0xf0]  ;;  %v6426_v62 = vor.u32 %v7352_v54, %v6425_v27 }
 0x3d2   :  { %v6818_v46 = vor.u32 %v7449_v41, %v6815_v13  ;;  %v7364_v41 = vld [vmem:[#allocation8 + $0x238] sm:$0xf0]  ;;  %v7451_v27 = vld [vmem:[#allocation8 + $0x4f0] sm:$0xf0] }
 0x3d3   :  { %v8074_v29 = vadd.f32 1e-05, %v3103_v25  ;;  %v6581_v25 = vld [vmem:[#allocation8 + $0x308] sm:$0xf]  ;;  %v7436_v13 = vld [vmem:[#allocation8 + $0x478] sm:$0xf0] }
 0x3d4   :  { %4719 = vmatpush.bf16.msrb.mxu1 %v6354_v34  ;;  %4680 = vmatpush.bf16.msra.mxu2 %v6830_v33  ;;  %v6947_v33 = vld [vmem:[#allocation8 + $0x5f4] sm:$0xf0]  ;;  %v6582_v23 = vor.u32 %v7391_v24, %v6581_v25  ;;  %v7349_v25 = vld [vmem:[#allocation8 + $0x1c0] sm:$0xf0] }
 0x3d5   :  { %7530 = vrsqrt.f32 %v8074_v29  ;;  %4758 = vmatpush.bf16.msra.mxu0 %v6642_v0  ;;  %vm3188_vm15 = vweird.f32 %v8074_v29  ;;  %v6473_v0 = vld [vmem:[#allocation8 + $0x230] sm:$0xf]  ;;  %v6701_v24 = vld [vmem:[#allocation8 + $0x3f8] sm:$0xf] }
 0x3d8   :  { %4720 = vmatpush.bf16.msrb.mxu1 %v6342_v36  ;;  %4681 = vmatpush.bf16.msra.mxu2 %v6818_v46  ;;  %v6950_v46 = vor.u32 %v7482_v56, %v6947_v33  ;;  %v7421_v56 = vld [vmem:[#allocation8 + $0x400] sm:$0xf0]  ;;  %v6414_v33 = vor.u32 %v7349_v25, %v6413_v31  ;;  %v6797_v25 = vld [vmem:[#allocation8 + $0x4b8] sm:$0xf] }
 0x3d9   :  { %4759 = vmatpush.bf16.msra.mxu0 %v6630_v48  ;;  %v6474_v48 = vor.u32 %v7364_v41, %v6473_v0  ;;  %v7464_v0 = vld [vmem:[#allocation8 + $0x55c] sm:$0xf]  ;;  %v6702_v41 = vor.u32 %v7421_v56, %v6701_v24  ;;  %v7373_v31 = vld [vmem:[#allocation8 + $0x280] sm:$0xf0] }
 0x3da   :  { %v7445_v24 = vld [vmem:[#allocation8 + $0x4c0] sm:$0xf0] }
 0x3db   :  { %v7531_v60 = vpop.eup %7530  ;;  %v4531_v3 = vpop.f32.mrf.mxu2  ;;  %4634 = vmatmul.bf16.vlgmr.msrb.gmra.mxu2 %v7973_v26 }
 0x3dc   :  { %v3183_v61 = vmul.f32 %v7531_v60, %v8074_v29  ;;  %v8079_v15 = vadd.f32 %v4531_v3, %v8064_v55  ;;  %4721 = vmatpush.bf16.msrb.mxu1 %v6330_v39  ;;  %4682 = vmatpush.bf16.msra.mxu2 %v6806_v40  ;;  %vm3189_vm14 = vweird.f32 %v7531_v60  ;;  %v6306_v55 = vor.u32 %v7322_v47, %v6305_v2  ;;  %v6761_v29 = vld [vmem:[#allocation8 + $0x470] sm:$0xf]  ;;  %v7430_v3 = vld [vmem:[#allocation8 + $0x448] sm:$0xf0] }
 0x3dd   :  { %4760 = vmatpush.bf16.msra.mxu0 %v6618_v18  ;;  %vm3190_vm0 = vmor %vm3188_vm15, %vm3189_vm14  ;;  %v6762_v50 = vor.u32 %v7436_v13, %v6761_v29  ;;  %v6462_v39 = vor.u32 %v7361_v63, %v6461_v37  ;;  %v6923_v18 = vld [vmem:[#allocation8 + $0x5c4] sm:$0xf0]  ;;  %v7470_v2 = vld [vmem:[#allocation8 + $0x58c] sm:$0xf] }
 0x3de   :  { %v3184_v4 = vmul.f32 %v7531_v60, %v3183_v61  ;;  %v7476_v61 = vld [vmem:[#allocation8 + $0x5bc] sm:$0xf]  ;;  %v6902_v7 = vor.u32 %v7470_v2, %v6899_v28  ;;  %v7346_v29 = vld [vmem:[#allocation8 + $0x1a8] sm:$0xf0]  ;;  %v6689_v13 = vld [vmem:[#allocation8 + $0x3e0] sm:$0xf] }
 0x3df   :  { %v6926_v5 = vor.u32 %v7476_v61, %v6923_v18  ;;  %v7343_v37 = vld [vmem:[#allocation8 + $0x190] sm:$0xf0]  ;;  %v6677_v63 = vld [vmem:[#allocation8 + $0x3c8] sm:$0xf]  ;;  %v7460_v61 = vld [vmem:[#allocation8 + $0x538] sm:$0xf0] }
 0x3e0   :  { %v3185_v51 = vmul.f32 0.5, %v3184_v4  ;;  %4722 = vmatpush.bf16.msrb.mxu1 %v6318_v11  ;;  %4683 = vmatpush.bf16.msra.mxu2 %v6794_v8  ;;  %v6738_v4 = vor.u32 %v7430_v3, %v6737_v58  ;;  %v6911_v11 = vld [vmem:[#allocation8 + $0x5ac] sm:$0xf0]  ;;  %v6725_v8 = vld [vmem:[#allocation8 + $0x428] sm:$0xf] }
 0x3e1   :  { %4761 = vmatpush.bf16.msra.mxu0 %v6606_v45  ;;  %v7427_v45 = vld [vmem:[#allocation8 + $0x430] sm:$0xf0]  ;;  %v6557_v3 = vld [vmem:[#allocation8 + $0x2d8] sm:$0xf]  ;;  %v6533_v2 = vld [vmem:[#allocation8 + $0x2a8] sm:$0xf] }
 0x3e2   :  { %v3186_v19 = vsub.f32 1.5, %v3185_v51  ;;  %v7355_v51 = vld [vmem:[#allocation8 + $0x1f0] sm:$0xf0]  ;;  %v6726_v47 = vor.u32 %v7427_v45, %v6725_v8  ;;  %v6833_v8 = vld [vmem:[#allocation8 + $0x500] sm:$0xf] }
 0x3e3   :  { %v4533_v35 = vpop.f32.mrf.mxu2  ;;  %v7454_v45 = vld [vmem:[#allocation8 + $0x508] sm:$0xf0]  ;;  %v6821_v28 = vld [vmem:[#allocation8 + $0x4e8] sm:$0xf] }
 0x3e4   :  { %v3187_v22 = vmul.f32 %v7531_v60, %v3186_v19  ;;  %4723 = vmatpush.bf16.msrb.mxu1 %v6306_v55  ;;  %4684 = vmatpush.bf16.msra.mxu2 %v6782_v9  ;;  %v6713_v19 = vld [vmem:[#allocation8 + $0x410] sm:$0xf]  ;;  %v7424_v55 = vld [vmem:[#allocation8 + $0x418] sm:$0xf0] }
 0x3e5   :  { %4762 = vmatpush.bf16.msra.mxu0 %v6594_v32  ;;  %v6714_v32 = vor.u32 %v7424_v55, %v6713_v19  ;;  %v6822_v55 = vor.u32 %v7451_v27, %v6821_v28 }
 0x3e6   :  { %v3191_v34 = vsel %vm3190_vm0, %v7531_v60, %v3187_v22  ;;  %v6938_v60 = vor.u32 %v7479_v52, %v6935_v57  ;;  %v7467_v22 = vld [vmem:[#allocation8 + $0x574] sm:$0xf]  ;;  %v6389_v57 = vld [vmem:[#allocation8 + $0x188] sm:$0xf] }
 0x3e7   :  { %v3199_v43 = vmul.f32 %v3191_v34, %v8053_v16  ;;  %v6749_v16 = vld [vmem:[#allocation8 + $0x458] sm:$0xf]  ;;  %v6890_v34 = vor.u32 %v7467_v22, %v6887_v30  ;;  %v6390_v18 = vor.u32 %v7343_v37, %v6389_v57  ;;  %v6809_v22 = vld [vmem:[#allocation8 + $0x4d0] sm:$0xf] }
 0x3e8   :  { %4724 = vmatpush.bf16.msrb.mxu1 %v6294_v14  ;;  %4685 = vmatpush.bf16.msra.mxu2 %v6770_v38  ;;  %v6750_v40 = vor.u32 %v7433_v59, %v6749_v16  ;;  %v6401_v14 = vld [vmem:[#allocation8 + $0x1a0] sm:$0xf]  ;;  %v7418_v38 = vld [vmem:[#allocation8 + $0x3e8] sm:$0xf0]  ;;  %v7415_v16 = vld [vmem:[#allocation8 + $0x3d0] sm:$0xf0] }
 0x3e9   :  { %v8084_v36 = vpack.c.bf16 %v3199_v43, %v3199_v43  ;;  %4763 = vmatpush.bf16.msra.mxu0 %v6582_v23  ;;  %v6875_v43 = vld [vmem:[#allocation8 + $0x564] sm:$0xf0]  ;;  %v6402_v23 = vor.u32 %v7346_v29, %v6401_v14  ;;  %v6569_v59 = vld [vmem:[#allocation8 + $0x2f0] sm:$0xf]  ;;  %v6678_v42 = vor.u32 %v7415_v16, %v6677_v63  ;;  %v6509_v30 = vld [vmem:[#allocation8 + $0x278] sm:$0xf] }
 0x3ea   :  { %v6941_v63 = vld [vmem:[#allocation8 + $0x5d8] sm:$0xf]  ;;  %v7481_v16 = vld [vmem:[#allocation8 + $0x5e0] sm:$0xf0] }
 0x3eb   :  { %4595 = vmatmul.bf16.vlgmr.msra.gmra.mxu3 %v8084_v36  ;;  %4725 = vmatmul.bf16.vlgmr.msrb.gmra.mxu1 %v7960_v20  ;;  %v6914_v20 = vor.u32 %v7473_v6, %v6911_v11  ;;  %v7457_v6 = vld [vmem:[#allocation8 + $0x520] sm:$0xf0] }
 0x3ec   :  { %4691 = vmatpush.bf16.msra.mxu3 %v6950_v46  ;;  %4730 = vmatpush.bf16.msrb.mxu2 %v6474_v48  ;;  %v7461_v46 = vld [vmem:[#allocation8 + $0x544] sm:$0xf]  ;;  %v6863_v48 = vld [vmem:[#allocation8 + $0x54c] sm:$0xf0] }
 0x3ed   :  { %4769 = vmatpush.bf16.msra.mxu1 %v6762_v50  ;;  %4764 = vmatmul.bf16.vlgmr.msra.gmra.mxu0 %v8008_v21  ;;  %v6438_v21 = vor.u32 %v7355_v51, %v6437_v53  ;;  %v6690_v50 = vor.u32 %v7418_v38, %v6689_v13  ;;  %v6545_v53 = vld [vmem:[#allocation8 + $0x2c0] sm:$0xf]  ;;  %v7382_v51 = vld [vmem:[#allocation8 + $0x2c8] sm:$0xf0]  ;;  %v6485_v13 = vld [vmem:[#allocation8 + $0x248] sm:$0xf] }
 0x3ee   :  { %4686 = vmatmul.bf16.vlgmr.msra.gmra.mxu2 %v8068_v12  ;;  %v7367_v38 = vld [vmem:[#allocation8 + $0x250] sm:$0xf0] }
 0x3f0   :  { %4692 = vmatpush.bf16.msra.mxu3 %v6938_v60  ;;  %4731 = vmatpush.bf16.msrb.mxu2 %v6462_v39  ;;  %v7388_v60 = vld [vmem:[#allocation8 + $0x2f8] sm:$0xf0]  ;;  %v6857_v39 = vld [vmem:[#allocation8 + $0x530] sm:$0xf] }
 0x3f1   :  { %4770 = vmatpush.bf16.msra.mxu1 %v6750_v40  ;;  %v4544_v9 = vpop.f32.mrf.mxu3  ;;  %v6866_v40 = vor.u32 %v7461_v46, %v6863_v48  ;;  %v6570_v1 = vor.u32 %v7388_v60, %v6569_v59  ;;  %v6858_v58 = vor.u32 %v7460_v61, %v6857_v39  ;;  %v6953_v46 = vld [vmem:[#allocation8 + $0x5f0] sm:$0xf]  ;;  %v7484_v48 = vld [vmem:[#allocation8 + $0x5f8] sm:$0xf0]  ;;  %v6942_v59 = vor.u32 %v7481_v16, %v6941_v63  ;;  %v6929_v60 = vld [vmem:[#allocation8 + $0x5c0] sm:$0xf] }
 0x3f2   :  { %v8091_v35 = vadd.f32 %v4544_v9, %v8079_v15  ;;  %v6878_v15 = vor.u32 %v7464_v0, %v6875_v43  ;;  %v7370_v0 = vld [vmem:[#allocation8 + $0x268] sm:$0xf0]  ;;  %v6954_v37 = vor.u32 %v7484_v48, %v6953_v46 }
 0x3f3   :  { %v7442_v43 = vld [vmem:[#allocation8 + $0x4a8] sm:$0xf0] }
 0x3f4   :  { %4693 = vmatpush.bf16.msra.mxu3 %v6926_v5  ;;  %4732 = vmatpush.bf16.msrb.mxu2 %v6450_v44  ;;  %v7385_v5 = vld [vmem:[#allocation8 + $0x2e0] sm:$0xf0]  ;;  %v6845_v44 = vld [vmem:[#allocation8 + $0x518] sm:$0xf]  ;;  %v7478_v39 = vld [vmem:[#allocation8 + $0x5c8] sm:$0xf0] }
 0x3f5   :  { %4771 = vmatpush.bf16.msra.mxu1 %v6738_v4  ;;  %v6558_v4 = vor.u32 %v7385_v5, %v6557_v3  ;;  %v6846_v11 = vor.u32 %v7457_v6, %v6845_v44  ;;  %v6905_v3 = vld [vmem:[#allocation8 + $0x590] sm:$0xf]  ;;  %v7472_v5 = vld [vmem:[#allocation8 + $0x598] sm:$0xf0] }
 0x3f6   :  { %v6906_v6 = vor.u32 %v7472_v5, %v6905_v3 }
 0x3f8   :  { %4694 = vmatpush.bf16.msra.mxu3 %v6914_v20  ;;  %4733 = vmatpush.bf16.msrb.mxu2 %v6438_v21  ;;  %v6546_v20 = vor.u32 %v7382_v51, %v6545_v53  ;;  %v6834_v21 = vor.u32 %v7454_v45, %v6833_v8  ;;  %v6881_v51 = vld [vmem:[#allocation8 + $0x560] sm:$0xf]  ;;  %v7466_v8 = vld [vmem:[#allocation8 + $0x568] sm:$0xf0] }
 0x3f9   :  { %4772 = vmatpush.bf16.msra.mxu1 %v6726_v47  ;;  %v4546_v52 = vpop.f32.mrf.mxu3  ;;  %v7379_v47 = vld [vmem:[#allocation8 + $0x2b0] sm:$0xf0] }
 0x3fb   :  { %4647 = vmatmul.bf16.vlgmr.msrb.gmra.mxu3 %v7992_v49 }
 0x3fc   :  { %4695 = vmatpush.bf16.msra.mxu3 %v6902_v7  ;;  %4734 = vmatpush.bf16.msrb.mxu2 %v6426_v62  ;;  %v6521_v7 = vld [vmem:[#allocation8 + $0x290] sm:$0xf]  ;;  %v7376_v62 = vld [vmem:[#allocation8 + $0x298] sm:$0xf0] }
 0x3fd   :  { %4773 = vmatpush.bf16.msra.mxu1 %v6714_v32  ;;  %v6522_v9 = vor.u32 %v7376_v62, %v6521_v7 }
 0x400   :  { %4696 = vmatpush.bf16.msra.mxu3 %v6890_v34  ;;  %4735 = vmatpush.bf16.msrb.mxu2 %v6414_v33  ;;  %v6510_v34 = vor.u32 %v7373_v31, %v6509_v30  ;;  %v6497_v33 = vld [vmem:[#allocation8 + $0x260] sm:$0xf]  ;;  %v3468_v30 = vperm.slane %v8046_v10, 2 }
 0x401   :  { %4774 = vmatpush.bf16.msra.mxu1 %v6702_v41  ;;  %v6785_v41 = vld [vmem:[#allocation8 + $0x4a0] sm:$0xf]  ;;  %v6498_v14 = vor.u32 %v7370_v0, %v6497_v33 }
 0x402   :  { %v6786_v29 = vor.u32 %v7442_v43, %v6785_v41 }
 0x404   :  { %4697 = vmatpush.bf16.msra.mxu3 %v6878_v15  ;;  %4736 = vmatpush.bf16.msrb.mxu2 %v6402_v23  ;;  %v6773_v15 = vld [vmem:[#allocation8 + $0x488] sm:$0xf]  ;;  %v7439_v23 = vld [vmem:[#allocation8 + $0x490] sm:$0xf0] }
 0x405   :  { %4775 = vmatpush.bf16.msra.mxu1 %v6690_v50  ;;  %v6486_v50 = vor.u32 %v7367_v38, %v6485_v13  ;;  %v6774_v57 = vor.u32 %v7439_v23, %v6773_v15 }
 0x408   :  { %4698 = vmatpush.bf16.msra.mxu3 %v6866_v40  ;;  %4737 = vmatpush.bf16.msrb.mxu2 %v6390_v18  ;;  %v4557_v54 = vpop.f32.mrf.mxu0  ;;  %v6930_v40 = vor.u32 %v7478_v39, %v6929_v60  ;;  %v6917_v18 = vld [vmem:[#allocation8 + $0x5a8] sm:$0xf] }
 0x409   :  { %4776 = vmatpush.bf16.msra.mxu1 %v6678_v42  ;;  %v8098_v19 = vadd.f32 %v4557_v54, %v8091_v35  ;;  %v6798_v35 = vor.u32 %v7445_v24, %v6797_v25  ;;  %v7475_v42 = vld [vmem:[#allocation8 + $0x5b0] sm:$0xf0] }
 0x40b   :  { %4738 = vmatmul.bf16.vlgmr.msrb.gmra.mxu2 %v7973_v26  ;;  %4699 = vmatmul.bf16.vlgmr.msra.gmra.mxu3 %v8084_v36  ;;  %v6534_v26 = vor.u32 %v7379_v47, %v6533_v2  ;;  %v7463_v2 = vld [vmem:[#allocation8 + $0x550] sm:$0xf0] }
 0x40c   :  { %4743 = vmatpush.bf16.msrb.mxu3 %v6570_v1  ;;  %4782 = vmatpush.bf16.msra.mxu2 %v6858_v58  ;;  %v6918_v58 = vor.u32 %v7475_v42, %v6917_v18 }
 0x40d   :  { %4777 = vmatmul.bf16.vlgmr.msra.gmra.mxu1 %v8029_v17  ;;  %v7448_v17 = vld [vmem:[#allocation8 + $0x4d8] sm:$0xf0] }
 0x40e   :  { %v6810_v32 = vor.u32 %v7448_v17, %v6809_v22 }
 0x410   :  { %4744 = vmatpush.bf16.msrb.mxu3 %v6558_v4  ;;  %4783 = vmatpush.bf16.msra.mxu2 %v6846_v11  ;;  %v4559_v56 = vpop.f32.mrf.mxu0  ;;  %v6893_v4 = vld [vmem:[#allocation8 + $0x578] sm:$0xf]  ;;  %v7469_v11 = vld [vmem:[#allocation8 + $0x580] sm:$0xf0] }
 0x414   :  { %4745 = vmatpush.bf16.msrb.mxu3 %v6546_v20  ;;  %4784 = vmatpush.bf16.msra.mxu2 %v6834_v21  ;;  %v6882_v20 = vor.u32 %v7466_v8, %v6881_v51  ;;  %v6869_v21 = vld [vmem:[#allocation8 + $0x548] sm:$0xf] }
 0x415   :  { %v6870_v54 = vor.u32 %v7463_v2, %v6869_v21 }
 0x418   :  { %4746 = vmatpush.bf16.msrb.mxu3 %v6534_v26  ;;  %4785 = vmatpush.bf16.msra.mxu2 %v6822_v55  ;;  %v4609_v52 = vpop.f32.mrf.mxu0 }
 0x41c   :  { %4747 = vmatpush.bf16.msrb.mxu3 %v6522_v9  ;;  %4786 = vmatpush.bf16.msra.mxu2 %v6810_v32 }
 0x420   :  { %4748 = vmatpush.bf16.msrb.mxu3 %v6510_v34  ;;  %4787 = vmatpush.bf16.msra.mxu2 %v6798_v35  ;;  %v4611_v61 = vpop.f32.mrf.mxu0 }
 0x424   :  { %4749 = vmatpush.bf16.msrb.mxu3 %v6498_v14  ;;  %4788 = vmatpush.bf16.msra.mxu2 %v6786_v29 }
 0x428   :  { %4750 = vmatpush.bf16.msrb.mxu3 %v6486_v50  ;;  %4789 = vmatpush.bf16.msra.mxu2 %v6774_v57  ;;  %v4570_v1 = vpop.f32.mrf.mxu1  ;;  %v4661_v44 = vpop.f32.mrf.mxu0 }
 0x429   :  { %v4571_v25 = vadd.f32 %v4570_v1, %v8098_v19 }
 0x42b   :  { %4751 = vmatmul.bf16.vlgmr.msrb.gmra.mxu3 %v7992_v49  ;;  %4790 = vmatmul.bf16.vlgmr.msra.gmra.mxu2 %v8068_v12  ;;  %v6894_v49 = vor.u32 %v7469_v11, %v6893_v4  ;;  %v3467_v12 = vperm.slane %v8046_v10, 1 }
 0x42c   :  { %4795 = vmatpush.bf16.msra.mxu3 %v6954_v37 }
 0x42d   :  { %v4610_v47 = vadd.f32 %v4609_v52, %v3467_v12 }
 0x430   :  { %4796 = vmatpush.bf16.msra.mxu3 %v6942_v59  ;;  %v4572_v53 = vpop.f32.mrf.mxu1  ;;  %v4663_v45 = vpop.f32.mrf.mxu0 }
 0x434   :  { %4797 = vmatpush.bf16.msra.mxu3 %v6930_v40 }
 0x438   :  { %4798 = vmatpush.bf16.msra.mxu3 %v6918_v58  ;;  %v4622_v28 = vpop.f32.mrf.mxu1 }
 0x439   :  { %v4623_v27 = vadd.f32 %v4622_v28, %v4610_v47 }
 0x43c   :  { %4799 = vmatpush.bf16.msra.mxu3 %v6906_v6 }
 0x440   :  { %4800 = vmatpush.bf16.msra.mxu3 %v6894_v49  ;;  %v4624_v26 = vpop.f32.mrf.mxu1 }
 0x444   :  { %4801 = vmatpush.bf16.msra.mxu3 %v6882_v20 }
 0x448   :  { %4802 = vmatpush.bf16.msra.mxu3 %v6870_v54  ;;  %v4713_v55 = vpop.f32.mrf.mxu0 }
 0x449   :  { %v4714_v24 = vadd.f32 %v4713_v55, %v3468_v30 }
 0x44a   :  { %v4674_v7 = vpop.f32.mrf.mxu1 }
 0x44b   :  { %4803 = vmatmul.bf16.vlgmr.msra.gmra.mxu3 %v8084_v36 }
 0x44e   :  { %v4583_v62 = vpop.f32.mrf.mxu2 }
 0x44f   :  { %v4584_v35 = vadd.f32 %v4583_v62, %v4571_v25 }
 0x450   :  { %v4715_v22 = vpop.f32.mrf.mxu0 }
 0x452   :  { %v4676_v17 = vpop.f32.mrf.mxu1 }
 0x456   :  { %v4585_v9 = vpop.f32.mrf.mxu2 }
 0x45e   :  { %v4635_v32 = vpop.f32.mrf.mxu2 }
 0x45f   :  { %v4636_v10 = vadd.f32 %v4635_v32, %v4623_v27 }
 0x466   :  { %v4637_v31 = vpop.f32.mrf.mxu2 }
 0x468   :  { %v4726_v56 = vpop.f32.mrf.mxu1 }
 0x469   :  { %v4727_v33 = vadd.f32 %v4726_v56, %v4714_v24 }
 0x46a   :  { %v4765_v34 = vpop.f32.mrf.mxu0 }
 0x46e   :  { %v4596_v0 = vpop.f32.mrf.mxu3 }
 0x46f   :  { %v4597_v36 = vadd.f32 %v4596_v0, %v4584_v35 }
 0x470   :  { %v4728_v43 = vpop.f32.mrf.mxu1 }
 0x471   :  { %7532 = vtanh.f32 %v4597_v36  ;;  %v4687_v41 = vpop.f32.mrf.mxu2 }
 0x472   :  { %v4767_v14 = vpop.f32.mrf.mxu0 }
 0x476   :  { %v4598_v29 = vpop.f32.mrf.mxu3 }
 0x477   :  { %v7533_v13 = vpop.eup %7532 }
 0x478   :  { %4811 = vst [vmem:[#allocation10] sm:$0xff] %v7533_v13 }
 0x479   :  { %v4689_v38 = vpop.f32.mrf.mxu2 }
 0x47e   :  { %v4648_v15 = vpop.f32.mrf.mxu3 }
 0x47f   :  { %v4649_v23 = vadd.f32 %v4648_v15, %v4636_v10 }
 0x481   :  { %v4662_v46 = vadd.f32 %v4661_v44, %v4649_v23 }
 0x483   :  { %v4675_v52 = vadd.f32 %v4674_v7, %v4662_v46 }
 0x485   :  { %v4688_v50 = vadd.f32 %v4687_v41, %v4675_v52 }
 0x486   :  { %v4650_v19 = vpop.f32.mrf.mxu3 }
 0x48a   :  { %v4778_v48 = vpop.f32.mrf.mxu1 }
 0x48e   :  { %v4739_v57 = vpop.f32.mrf.mxu2  ;;  %v4700_v37 = vpop.f32.mrf.mxu3 }
 0x48f   :  { %v4701_v63 = vadd.f32 %v4700_v37, %v4688_v50  ;;  %v4740_v61 = vadd.f32 %v4739_v57, %v4727_v33 }
 0x491   :  { %7534 = vtanh.f32 %v4701_v63 }
 0x492   :  { %v4780_v16 = vpop.f32.mrf.mxu1 }
 0x496   :  { %v4741_v59 = vpop.f32.mrf.mxu2  ;;  %v4702_v60 = vpop.f32.mrf.mxu3 }
 0x497   :  { %v7535_v39 = vpop.eup %7534 }
 0x498   :  { %4812 = vst [vmem:[#allocation10 + $0x8] sm:$0xff] %v7535_v39 }
 0x4ae   :  { %v4752_v40 = vpop.f32.mrf.mxu3  ;;  %v4791_v42 = vpop.f32.mrf.mxu2 }
 0x4af   :  { %v4753_v18 = vadd.f32 %v4752_v40, %v4740_v61 }
 0x4b1   :  { %v4766_v1 = vadd.f32 %v4765_v34, %v4753_v18 }
 0x4b3   :  { %v4779_v5 = vadd.f32 %v4778_v48, %v4766_v1 }
 0x4b5   :  { %v4792_v44 = vadd.f32 %v4791_v42, %v4779_v5 }
 0x4b6   :  { %v4754_v58 = vpop.f32.mrf.mxu3  ;;  %v4793_v3 = vpop.f32.mrf.mxu2 }
 0x4ce   :  { %v4804_v6 = vpop.f32.mrf.mxu3 }
 0x4cf   :  { %v4805_v4 = vadd.f32 %v4804_v6, %v4792_v44 }
 0x4d1   :  { %7536 = vtanh.f32 %v4805_v4 }
 0x4d6   :  { %v4806_v11 = vpop.f32.mrf.mxu3 }
 0x4d7   :  { %v7537_v53 = vpop.eup %7536 }
 0x4d8   :  { %4813 = vst [vmem:[#allocation10 + $0x10] sm:$0xff] %v7537_v53 }
 0x4d9   :  { %4824 = dma.vmem_to_hbm [thread:$0]  %s4820_s3, 384, %s4822_s5, [#allocation4]  }
 0x4da   :  { %7664 = dma.done.wait [#allocation4], 384  }
 0x4db   :  { %7665 = vsyncadd [#allocation4], 4294966912 }
 0x4dc   :  { %4829 = vsyncpa [#allocation3], 1 }
 0x4dd   :  { %4830 = vsyncpa [#allocation6], 1 }
 0x4de   :  { %4831 = vsyncpa [#allocation9], 1 }
 0x4df   :  { %4832 = vsyncpa [#allocation4], 1 }

</bundles_post_ra>
